<compile_context>
chip_gen: v5e
topology: v5e:2x2
jax: 0.10.0
libtpu: 0.0.40
codegen_flags: <defaults>
</compile_context>

<pallas_src>
import functools

import jax
import jax.numpy as jnp
from jax.experimental import pallas as pl
from jax.experimental.pallas import tpu as pltpu

LEAKY_SLOPE = 0.1
BN_EPS = 1e-5
NEG_FILL = float(jnp.finfo(jnp.float32).min)   # maxpool halo value
PAD = 2                                        # 5x5/s1 pool -> pad 2 per side
VMEM_LIMIT = 32 * 1024 * 1024                  # safe on v5e/v6e(128M) & v7x(64M)


def _leaky(y):
    # LeakyReLU(0.1) == max(y, 0.1*y): one mul + one max on the VPU.
    return jnp.maximum(y, LEAKY_SLOPE * y)


# ---------------------------------------------------------------------------
# Fused SPPF kernel: one (image, channel-tile) step.
# ---------------------------------------------------------------------------
def _sppf_kernel(x_ref, w1_ref, b1_ref, w2_ref, b2_ref, o_ref,
                 padbuf, rowbuf, *, H, W):
    """x_ref:(1,H,W,Cin)  w1:(Cin,tc)  b1:(1,tc)  w2:(4,tc,Cout)  b2:(1,Cout)
    o_ref:(1,H,W,Cout) output block, resident/accumulated across the c axis.
    padbuf:(H+4,W+4,tc) pool input with -inf halo; rowbuf:(H,W+4,tc)."""
    c_idx = pl.program_id(1)
    n_ct = pl.num_programs(1)
    HW = H * W
    Cin = x_ref.shape[-1]
    tc = w1_ref.shape[-1]
    Cout = w2_ref.shape[-1]

    # ---- conv1 (+ folded BN bias + LeakyReLU) for this channel tile ------
    x2d = x_ref[0].reshape(HW, Cin)
    x1 = _leaky(jnp.dot(x2d, w1_ref[...], preferred_element_type=jnp.float32)
                + b1_ref[...])                                    # (HW, tc)

    # ---- init conv2 accumulator (the resident output block) with its bias
    @pl.when(c_idx == 0)
    def _():
        o_ref[...] = jnp.broadcast_to(
            b2_ref[...].reshape(1, 1, 1, Cout),
            (1, H, W, Cout)).astype(o_ref.dtype)

    def accumulate(z2d, group):
        part = jnp.dot(z2d, w2_ref[group], preferred_element_type=jnp.float32)
        o_ref[0] = o_ref[0] + part.reshape(H, W, Cout).astype(o_ref.dtype)

    accumulate(x1, 0)

    # ---- -inf halo ring only; the data region is always fully overwritten
    padbuf[0:PAD, :, :] = jnp.full((PAD, W + 2 * PAD, tc), NEG_FILL,
                                   jnp.float32)
    padbuf[PAD + H:PAD + H + PAD, :, :] = jnp.full(
        (PAD, W + 2 * PAD, tc), NEG_FILL, jnp.float32)
    padbuf[PAD:PAD + H, 0:PAD, :] = jnp.full((H, PAD, tc), NEG_FILL,
                                             jnp.float32)
    padbuf[PAD:PAD + H, PAD + W:PAD + W + PAD, :] = jnp.full(
        (H, PAD, tc), NEG_FILL, jnp.float32)

    padbuf[PAD:PAD + H, PAD:PAD + W, :] = x1.reshape(H, W, tc)

    # ---- 3 chained 5x5/s1/p2 maxpools; conv2 group added after each ------
    for k in range(3):
        # vertical 5-tap max: leading-dim ref slices (cheap) + VPU max
        vmax = padbuf[0:H, :, :]
        for dh in range(1, 5):
            vmax = jnp.maximum(vmax, padbuf[dh:dh + H, :, :])
        rowbuf[...] = vmax
        # horizontal 5-tap max: W-offset ref slices + VPU max
        pooled = rowbuf[:, 0:W, :]
        for dw in range(1, 5):
            pooled = jnp.maximum(pooled, rowbuf[:, dw:dw + W, :])
        accumulate(pooled.reshape(HW, tc), k + 1)
        if k < 2:
            # feed this pool back as the next pool's input; halo untouched
            padbuf[PAD:PAD + H, PAD:PAD + W, :] = pooled

    # ---- finalize: LeakyReLU once every channel tile has been accumulated
    @pl.when(c_idx == n_ct - 1)
    def _():
        o_ref[...] = _leaky(o_ref[...])


# ---------------------------------------------------------------------------
# Wrapper
# ---------------------------------------------------------------------------
def _pick_channel_tile(c, tc_max):
    """Tile for the hidden (c_) axis: full extent if it fits, else a
    multiple-of-128 divisor <= tc_max (keeps blocks lane/sublane friendly)."""
    if c <= tc_max:
        return c
    t = tc_max - tc_max % 128
    while t >= 128:
        if c % t == 0:
            return t
        t -= 128
    return c          # no aligned divisor: fall back to one (untiled) block


def sppf_forward(x_nchw, params, *, tc_max=256):
    """SPPF forward: NCHW in -> NCHW out (channels-last inside the kernel)."""
    N, Cin, H, W = x_nchw.shape
    c_ = params["w1"].shape[1]
    Cout = params["w2"].shape[2]
    tc = _pick_channel_tile(c_, tc_max)
    nct = c_ // tc
    HW = H * W

    flops = int(N * (2 * HW * (Cin * c_ + 4 * c_ * Cout) + 3 * 8 * HW * c_))
    bytes_accessed = int(4 * (N * HW * (Cin + Cout)
                              + Cin * c_ + 4 * c_ * Cout + c_ + Cout))

    x_nhwc = jnp.transpose(x_nchw, (0, 2, 3, 1))
    out_nhwc = pl.pallas_call(
        functools.partial(_sppf_kernel, H=H, W=W),
        out_shape=jax.ShapeDtypeStruct((N, H, W, Cout), x_nchw.dtype),
        grid=(N, nct),
        in_specs=[
            pl.BlockSpec((1, H, W, Cin), lambda n, c: (n, 0, 0, 0)),
            pl.BlockSpec((Cin, tc), lambda n, c: (0, c)),
            pl.BlockSpec((1, tc), lambda n, c: (0, c)),
            pl.BlockSpec((4, tc, Cout), lambda n, c: (0, c, 0)),
            pl.BlockSpec((1, Cout), lambda n, c: (0, 0)),
        ],
        out_specs=pl.BlockSpec((1, H, W, Cout), lambda n, c: (n, 0, 0, 0)),
        scratch_shapes=[
            pltpu.VMEM((H + 2 * PAD, W + 2 * PAD, tc), jnp.float32),  # padbuf
            pltpu.VMEM((H, W + 2 * PAD, tc), jnp.float32),            # rowbuf
        ],
        compiler_params=pltpu.CompilerParams(
            dimension_semantics=("parallel", "arbitrary"),
            vmem_limit_bytes=VMEM_LIMIT),
        cost_estimate=pl.CostEstimate(
            flops=flops, transcendentals=0, bytes_accessed=bytes_accessed),
    )(x_nhwc, params["w1"], params["b1"], params["w2"], params["b2"])
    return jnp.transpose(out_nhwc, (0, 3, 1, 2))


# ---------------------------------------------------------------------------
# Parameter construction (deterministic) + BN folding
# ---------------------------------------------------------------------------
def _fold_bn(w_oc_ic, gamma, beta, mean, var, eps=BN_EPS):
    scale = gamma / jnp.sqrt(var + eps)
    return w_oc_ic * scale[:, None], beta - mean * scale


def init_sppf_params(key, in_channels, out_channels):
    c_ = in_channels // 2
    ks = jax.random.split(key, 10)
    w1 = jax.random.normal(ks[0], (c_, in_channels), jnp.float32) \
        * in_channels ** -0.5
    g1 = 1.0 + 0.1 * jax.random.normal(ks[1], (c_,), jnp.float32)
    be1 = 0.1 * jax.random.normal(ks[2], (c_,), jnp.float32)
    m1 = 0.1 * jax.random.normal(ks[3], (c_,), jnp.float32)
    v1 = jax.random.uniform(ks[4], (c_,), jnp.float32, 0.5, 1.5)
    w2 = jax.random.normal(ks[5], (out_channels, 4 * c_), jnp.float32) \
        * (4 * c_) ** -0.5
    g2 = 1.0 + 0.1 * jax.random.normal(ks[6], (out_channels,), jnp.float32)
    be2 = 0.1 * jax.random.normal(ks[7], (out_channels,), jnp.float32)
    m2 = 0.1 * jax.random.normal(ks[8], (out_channels,), jnp.float32)
    v2 = jax.random.uniform(ks[9], (out_channels,), jnp.float32, 0.5, 1.5)

    w1e, b1e = _fold_bn(w1, g1, be1, m1, v1)            # (c_, Cin), (c_,)
    w2e, b2e = _fold_bn(w2, g2, be2, m2, v2)            # (Cout, 4c_), (Cout,)
    return {
        "w1": jnp.transpose(w1e),                               # (Cin, c_)
        "b1": b1e.reshape(1, c_),
        "w2": jnp.transpose(w2e).reshape(4, c_, out_channels),  # (4, c_, Cout)
        "b2": b2e.reshape(1, out_channels),
    }


# ---------------------------------------------------------------------------
# Pure-JAX reference for sanity checking
# ---------------------------------------------------------------------------
def _sppf_reference(x, params):
    w1 = params["w1"]                                   # (Cin, c_)
    g, c_, cout = params["w2"].shape
    w2 = params["w2"].reshape(g * c_, cout)             # (4c_, Cout)

    def cbl(z, w_ci_co, b):
        y = jnp.einsum("nchw,co->nohw", z, w_ci_co) + b.reshape(1, -1, 1, 1)
        return jnp.where(y >= 0, y, LEAKY_SLOPE * y)

    def pool(z):
        zp = jnp.pad(z, ((0, 0), (0, 0), (PAD, PAD), (PAD, PAD)),
                     constant_values=NEG_FILL)
        return jax.lax.reduce_window(
            zp, -jnp.inf, jax.lax.max, (1, 1, 5, 5), (1, 1, 1, 1), "VALID")

    x1 = cbl(x, w1, params["b1"])
    p1 = pool(x1)
    p2 = pool(p1)
    p3 = pool(p2)
    return cbl(jnp.concatenate([x1, p1, p2, p3], axis=1), w2, params["b2"])


if __name__ == "__main__":
    # Small config: single channel tile (nct == 1).
    N, Cin, H, W, Cout = 2, 8, 16, 16, 16
    kx, kp = jax.random.split(jax.random.PRNGKey(0))
    x = jax.random.normal(kx, (N, Cin, H, W), jnp.float32)
    params = init_sppf_params(kp, Cin, Cout)

    fwd = jax.jit(sppf_forward)
    out = jax.block_until_ready(fwd(x, params))
    assert out.shape == (N, Cout, H, W), out.shape
    ref = jax.block_until_ready(_sppf_reference(x, params))
    err = float(jnp.max(jnp.abs(out - ref)))
    assert jnp.allclose(out, ref, rtol=2e-2, atol=2e-2), err

    # Wider config: exercises the channel-tiled accumulation path (nct == 2).
    N2, Cin2, H2, W2, Cout2 = 1, 512, 8, 8, 128
    kx2, kp2 = jax.random.split(jax.random.PRNGKey(1))
    x2 = jax.random.normal(kx2, (N2, Cin2, H2, W2), jnp.float32)
    params2 = init_sppf_params(kp2, Cin2, Cout2)
    fwd2 = jax.jit(functools.partial(sppf_forward, tc_max=128))
    out2 = jax.block_until_ready(fwd2(x2, params2))
    ref2 = jax.block_until_ready(_sppf_reference(x2, params2))
    err2 = float(jnp.max(jnp.abs(out2 - ref2)))
    assert jnp.allclose(out2, ref2, rtol=2e-2, atol=2e-2), err2

    print("KERNEL_OK")
</pallas_src>

<mosaic_0001>
module attributes {stable_mosaic.version = 11 : i64} {
  func.func @_sppf_kernel(%arg0: i32, %arg1: i32, %arg2: memref<1x16x16x8xf32, #tpu.memory_space<vmem>>, %arg3: memref<8x4xf32, #tpu.memory_space<vmem>>, %arg4: memref<1x4xf32, #tpu.memory_space<vmem>>, %arg5: memref<4x4x16xf32, #tpu.memory_space<vmem>>, %arg6: memref<1x16xf32, #tpu.memory_space<vmem>>, %arg7: memref<1x16x16x16xf32, #tpu.memory_space<vmem>>, %arg8: memref<20x20x4xf32, #tpu.memory_space<vmem>>, %arg9: memref<16x20x4xf32, #tpu.memory_space<vmem>>) attributes {dimension_semantics = [#tpu.dimension_semantics<parallel>, #tpu.dimension_semantics<arbitrary>], iteration_bounds = array<i64: 2, 1>, scalar_prefetch = 0 : i64, scratch_operands = 2 : i64, tpu.core_type = #tpu.core_type<tc>, window_params = [{transform_indices = @transform_0, window_bounds = array<i64: 1, 16, 16, 8>}, {transform_indices = @transform_1, window_bounds = array<i64: 8, 4>}, {transform_indices = @transform_2, window_bounds = array<i64: 1, 4>}, {transform_indices = @transform_3, window_bounds = array<i64: 4, 4, 16>}, {pipeline_mode = #tpu.pipeline_mode<synchronous>, transform_indices = @transform_4, window_bounds = array<i64: 1, 16>}, {transform_indices = @transform_5, window_bounds = array<i64: 1, 16, 16, 16>}]} {
    %c0 = arith.constant 0 : index
    %c0_0 = arith.constant 0 : index
    %c0_1 = arith.constant 0 : index
    %c0_2 = arith.constant 0 : index
    %0 = vector.load %arg2[%c0, %c0_0, %c0_1, %c0_2] : memref<1x16x16x8xf32, #tpu.memory_space<vmem>>, vector<1x16x16x8xf32>
    %1 = vector.shape_cast %0 : vector<1x16x16x8xf32> to vector<16x16x8xf32>
    %2 = vector.shape_cast %1 : vector<16x16x8xf32> to vector<256x8xf32>
    %c0_3 = arith.constant 0 : index
    %c0_4 = arith.constant 0 : index
    %3 = vector.load %arg3[%c0_3, %c0_4] : memref<8x4xf32, #tpu.memory_space<vmem>>, vector<8x4xf32>
    %cst = arith.constant dense<0.000000e+00> : vector<256x4xf32>
    %4 = tpu.matmul %2, %3, %cst {dimension_numbers = #tpu.dot_dimension_numbers<[1], [0], [0], [1], [0, 0, 1, 1], [], []>} : vector<256x8xf32>, vector<8x4xf32>, vector<256x4xf32> -> vector<256x4xf32>
    %c0_5 = arith.constant 0 : index
    %c0_6 = arith.constant 0 : index
    %5 = vector.load %arg4[%c0_5, %c0_6] : memref<1x4xf32, #tpu.memory_space<vmem>>, vector<1x4xf32>
    %6 = vector.broadcast %5 : vector<1x4xf32> to vector<256x4xf32>
    %7 = arith.addf %4, %6 : vector<256x4xf32>
    %cst_7 = arith.constant 1.000000e-01 : f32
    %8 = vector.broadcast %cst_7 : f32 to vector<256x4xf32>
    %9 = arith.mulf %8, %7 : vector<256x4xf32>
    %10 = arith.maximumf %7, %9 : vector<256x4xf32>
    %c0_i32 = arith.constant 0 : i32
    %11 = arith.cmpi eq, %arg1, %c0_i32 : i32
    %12 = arith.extui %11 : i1 to i32
    %c0_i32_8 = arith.constant 0 : i32
    %13 = arith.cmpi ne, %12, %c0_i32_8 : i32
    scf.if %13 {
      %c0_178 = arith.constant 0 : index
      %c0_179 = arith.constant 0 : index
      %129 = vector.load %arg6[%c0_178, %c0_179] : memref<1x16xf32, #tpu.memory_space<vmem>>, vector<1x16xf32>
      %130 = vector.shape_cast %129 : vector<1x16xf32> to vector<1x1x1x16xf32>
      %131 = vector.shape_cast %130 : vector<1x1x1x16xf32> to vector<1x1x1x16xf32>
      %132 = vector.broadcast %131 : vector<1x1x1x16xf32> to vector<1x16x16x16xf32>
      %c0_180 = arith.constant 0 : index
      %c0_181 = arith.constant 0 : index
      %c0_182 = arith.constant 0 : index
      %c0_183 = arith.constant 0 : index
      %133 = vector.load %arg7[%c0_180, %c0_181, %c0_182, %c0_183] : memref<1x16x16x16xf32, #tpu.memory_space<vmem>>, vector<1x16x16x16xf32>
      tpu.vector_store %arg7[%c0_180, %c0_181, %c0_182, %c0_183], %132 {strides = array<i32>} : memref<1x16x16x16xf32, #tpu.memory_space<vmem>>, vector<1x16x16x16xf32>,
    } else {
    }
    %c0_9 = arith.constant 0 : index
    %c0_10 = arith.constant 0 : index
    %c0_11 = arith.constant 0 : index
    %14 = vector.load %arg5[%c0_9, %c0_10, %c0_11] : memref<4x4x16xf32, #tpu.memory_space<vmem>>, vector<1x4x16xf32>
    %15 = vector.shape_cast %14 : vector<1x4x16xf32> to vector<4x16xf32>
    %cst_12 = arith.constant dense<0.000000e+00> : vector<256x16xf32>
    %16 = tpu.matmul %10, %15, %cst_12 {dimension_numbers = #tpu.dot_dimension_numbers<[1], [0], [0], [1], [0, 0, 1, 1], [], []>} : vector<256x4xf32>, vector<4x16xf32>, vector<256x16xf32> -> vector<256x16xf32>
    %c0_13 = arith.constant 0 : index
    %c0_14 = arith.constant 0 : index
    %c0_15 = arith.constant 0 : index
    %c0_16 = arith.constant 0 : index
    %17 = vector.load %arg7[%c0_13, %c0_14, %c0_15, %c0_16] : memref<1x16x16x16xf32, #tpu.memory_space<vmem>>, vector<1x16x16x16xf32>
    %18 = vector.shape_cast %17 : vector<1x16x16x16xf32> to vector<16x16x16xf32>
    %19 = vector.shape_cast %16 : vector<256x16xf32> to vector<16x16x16xf32>
    %20 = arith.addf %18, %19 : vector<16x16x16xf32>
    %c0_17 = arith.constant 0 : index
    %c0_18 = arith.constant 0 : index
    %c0_19 = arith.constant 0 : index
    %c0_20 = arith.constant 0 : index
    %21 = vector.load %arg7[%c0_17, %c0_18, %c0_19, %c0_20] : memref<1x16x16x16xf32, #tpu.memory_space<vmem>>, vector<1x16x16x16xf32>
    %22 = vector.shape_cast %21 : vector<1x16x16x16xf32> to vector<16x16x16xf32>
    %23 = vector.shape_cast %20 : vector<16x16x16xf32> to vector<1x16x16x16xf32>
    tpu.vector_store %arg7[%c0_17, %c0_18, %c0_19, %c0_20], %23 {strides = array<i32>} : memref<1x16x16x16xf32, #tpu.memory_space<vmem>>, vector<1x16x16x16xf32>,
    %cst_21 = arith.constant -3.40282347E+38 : f32
    %24 = vector.broadcast %cst_21 : f32 to vector<2x20x4xf32>
    %c0_22 = arith.constant 0 : index
    %c0_23 = arith.constant 0 : index
    %c0_24 = arith.constant 0 : index
    %25 = vector.load %arg8[%c0_22, %c0_23, %c0_24] : memref<20x20x4xf32, #tpu.memory_space<vmem>>, vector<2x20x4xf32>
    tpu.vector_store %arg8[%c0_22, %c0_23, %c0_24], %24 {strides = array<i32>} : memref<20x20x4xf32, #tpu.memory_space<vmem>>, vector<2x20x4xf32>,
    %cst_25 = arith.constant -3.40282347E+38 : f32
    %26 = vector.broadcast %cst_25 : f32 to vector<2x20x4xf32>
    %c18 = arith.constant 18 : index
    %c0_26 = arith.constant 0 : index
    %c0_27 = arith.constant 0 : index
    %27 = vector.load %arg8[%c18, %c0_26, %c0_27] : memref<20x20x4xf32, #tpu.memory_space<vmem>>, vector<2x20x4xf32>
    tpu.vector_store %arg8[%c18, %c0_26, %c0_27], %26 {strides = array<i32>} : memref<20x20x4xf32, #tpu.memory_space<vmem>>, vector<2x20x4xf32>,
    %cst_28 = arith.constant -3.40282347E+38 : f32
    %28 = vector.broadcast %cst_28 : f32 to vector<16x2x4xf32>
    %c2 = arith.constant 2 : index
    %c0_29 = arith.constant 0 : index
    %c0_30 = arith.constant 0 : index
    %29 = vector.load %arg8[%c2, %c0_29, %c0_30] : memref<20x20x4xf32, #tpu.memory_space<vmem>>, vector<16x2x4xf32>
    tpu.vector_store %arg8[%c2, %c0_29, %c0_30], %28 {strides = array<i32>} : memref<20x20x4xf32, #tpu.memory_space<vmem>>, vector<16x2x4xf32>,
    %cst_31 = arith.constant -3.40282347E+38 : f32
    %30 = vector.broadcast %cst_31 : f32 to vector<16x2x4xf32>
    %c2_32 = arith.constant 2 : index
    %c18_33 = arith.constant 18 : index
    %c0_34 = arith.constant 0 : index
    %31 = vector.load %arg8[%c2_32, %c18_33, %c0_34] : memref<20x20x4xf32, #tpu.memory_space<vmem>>, vector<16x2x4xf32>
    tpu.vector_store %arg8[%c2_32, %c18_33, %c0_34], %30 {strides = array<i32>} : memref<20x20x4xf32, #tpu.memory_space<vmem>>, vector<16x2x4xf32>,
    %32 = vector.shape_cast %10 : vector<256x4xf32> to vector<16x16x4xf32>
    %c2_35 = arith.constant 2 : index
    %c2_36 = arith.constant 2 : index
    %c0_37 = arith.constant 0 : index
    %33 = vector.load %arg8[%c2_35, %c2_36, %c0_37] : memref<20x20x4xf32, #tpu.memory_space<vmem>>, vector<16x16x4xf32>
    tpu.vector_store %arg8[%c2_35, %c2_36, %c0_37], %32 {strides = array<i32>} : memref<20x20x4xf32, #tpu.memory_space<vmem>>, vector<16x16x4xf32>,
    %c0_38 = arith.constant 0 : index
    %c0_39 = arith.constant 0 : index
    %c0_40 = arith.constant 0 : index
    %34 = vector.load %arg8[%c0_38, %c0_39, %c0_40] : memref<20x20x4xf32, #tpu.memory_space<vmem>>, vector<16x20x4xf32>
    %c1 = arith.constant 1 : index
    %c0_41 = arith.constant 0 : index
    %c0_42 = arith.constant 0 : index
    %35 = vector.load %arg8[%c1, %c0_41, %c0_42] : memref<20x20x4xf32, #tpu.memory_space<vmem>>, vector<16x20x4xf32>
    %36 = arith.maximumf %34, %35 : vector<16x20x4xf32>
    %c2_43 = arith.constant 2 : index
    %c0_44 = arith.constant 0 : index
    %c0_45 = arith.constant 0 : index
    %37 = vector.load %arg8[%c2_43, %c0_44, %c0_45] : memref<20x20x4xf32, #tpu.memory_space<vmem>>, vector<16x20x4xf32>
    %38 = arith.maximumf %36, %37 : vector<16x20x4xf32>
    %c3 = arith.constant 3 : index
    %c0_46 = arith.constant 0 : index
    %c0_47 = arith.constant 0 : index
    %39 = vector.load %arg8[%c3, %c0_46, %c0_47] : memref<20x20x4xf32, #tpu.memory_space<vmem>>, vector<16x20x4xf32>
    %40 = arith.maximumf %38, %39 : vector<16x20x4xf32>
    %c4 = arith.constant 4 : index
    %c0_48 = arith.constant 0 : index
    %c0_49 = arith.constant 0 : index
    %41 = vector.load %arg8[%c4, %c0_48, %c0_49] : memref<20x20x4xf32, #tpu.memory_space<vmem>>, vector<16x20x4xf32>
    %42 = arith.maximumf %40, %41 : vector<16x20x4xf32>
    %c0_50 = arith.constant 0 : index
    %c0_51 = arith.constant 0 : index
    %c0_52 = arith.constant 0 : index
    %43 = vector.load %arg9[%c0_50, %c0_51, %c0_52] : memref<16x20x4xf32, #tpu.memory_space<vmem>>, vector<16x20x4xf32>
    tpu.vector_store %arg9[%c0_50, %c0_51, %c0_52], %42 {strides = array<i32>} : memref<16x20x4xf32, #tpu.memory_space<vmem>>, vector<16x20x4xf32>,
    %c0_53 = arith.constant 0 : index
    %c0_54 = arith.constant 0 : index
    %c0_55 = arith.constant 0 : index
    %44 = vector.load %arg9[%c0_53, %c0_54, %c0_55] : memref<16x20x4xf32, #tpu.memory_space<vmem>>, vector<16x16x4xf32>
    %c0_56 = arith.constant 0 : index
    %c1_57 = arith.constant 1 : index
    %c0_58 = arith.constant 0 : index
    %45 = vector.load %arg9[%c0_56, %c1_57, %c0_58] : memref<16x20x4xf32, #tpu.memory_space<vmem>>, vector<16x16x4xf32>
    %46 = arith.maximumf %44, %45 : vector<16x16x4xf32>
    %c0_59 = arith.constant 0 : index
    %c2_60 = arith.constant 2 : index
    %c0_61 = arith.constant 0 : index
    %47 = vector.load %arg9[%c0_59, %c2_60, %c0_61] : memref<16x20x4xf32, #tpu.memory_space<vmem>>, vector<16x16x4xf32>
    %48 = arith.maximumf %46, %47 : vector<16x16x4xf32>
    %c0_62 = arith.constant 0 : index
    %c3_63 = arith.constant 3 : index
    %c0_64 = arith.constant 0 : index
    %49 = vector.load %arg9[%c0_62, %c3_63, %c0_64] : memref<16x20x4xf32, #tpu.memory_space<vmem>>, vector<16x16x4xf32>
    %50 = arith.maximumf %48, %49 : vector<16x16x4xf32>
    %c0_65 = arith.constant 0 : index
    %c4_66 = arith.constant 4 : index
    %c0_67 = arith.constant 0 : index
    %51 = vector.load %arg9[%c0_65, %c4_66, %c0_67] : memref<16x20x4xf32, #tpu.memory_space<vmem>>, vector<16x16x4xf32>
    %52 = arith.maximumf %50, %51 : vector<16x16x4xf32>
    %53 = vector.shape_cast %52 : vector<16x16x4xf32> to vector<256x4xf32>
    %c1_68 = arith.constant 1 : index
    %c0_69 = arith.constant 0 : index
    %c0_70 = arith.constant 0 : index
    %54 = vector.load %arg5[%c1_68, %c0_69, %c0_70] : memref<4x4x16xf32, #tpu.memory_space<vmem>>, vector<1x4x16xf32>
    %55 = vector.shape_cast %54 : vector<1x4x16xf32> to vector<4x16xf32>
    %cst_71 = arith.constant dense<0.000000e+00> : vector<256x16xf32>
    %56 = tpu.matmul %53, %55, %cst_71 {dimension_numbers = #tpu.dot_dimension_numbers<[1], [0], [0], [1], [0, 0, 1, 1], [], []>} : vector<256x4xf32>, vector<4x16xf32>, vector<256x16xf32> -> vector<256x16xf32>
    %c0_72 = arith.constant 0 : index
    %c0_73 = arith.constant 0 : index
    %c0_74 = arith.constant 0 : index
    %c0_75 = arith.constant 0 : index
    %57 = vector.load %arg7[%c0_72, %c0_73, %c0_74, %c0_75] : memref<1x16x16x16xf32, #tpu.memory_space<vmem>>, vector<1x16x16x16xf32>
    %58 = vector.shape_cast %57 : vector<1x16x16x16xf32> to vector<16x16x16xf32>
    %59 = vector.shape_cast %56 : vector<256x16xf32> to vector<16x16x16xf32>
    %60 = arith.addf %58, %59 : vector<16x16x16xf32>
    %c0_76 = arith.constant 0 : index
    %c0_77 = arith.constant 0 : index
    %c0_78 = arith.constant 0 : index
    %c0_79 = arith.constant 0 : index
    %61 = vector.load %arg7[%c0_76, %c0_77, %c0_78, %c0_79] : memref<1x16x16x16xf32, #tpu.memory_space<vmem>>, vector<1x16x16x16xf32>
    %62 = vector.shape_cast %61 : vector<1x16x16x16xf32> to vector<16x16x16xf32>
    %63 = vector.shape_cast %60 : vector<16x16x16xf32> to vector<1x16x16x16xf32>
    tpu.vector_store %arg7[%c0_76, %c0_77, %c0_78, %c0_79], %63 {strides = array<i32>} : memref<1x16x16x16xf32, #tpu.memory_space<vmem>>, vector<1x16x16x16xf32>,
    %c2_80 = arith.constant 2 : index
    %c2_81 = arith.constant 2 : index
    %c0_82 = arith.constant 0 : index
    %64 = vector.load %arg8[%c2_80, %c2_81, %c0_82] : memref<20x20x4xf32, #tpu.memory_space<vmem>>, vector<16x16x4xf32>
    tpu.vector_store %arg8[%c2_80, %c2_81, %c0_82], %52 {strides = array<i32>} : memref<20x20x4xf32, #tpu.memory_space<vmem>>, vector<16x16x4xf32>,
    %c0_83 = arith.constant 0 : index
    %c0_84 = arith.constant 0 : index
    %c0_85 = arith.constant 0 : index
    %65 = vector.load %arg8[%c0_83, %c0_84, %c0_85] : memref<20x20x4xf32, #tpu.memory_space<vmem>>, vector<16x20x4xf32>
    %c1_86 = arith.constant 1 : index
    %c0_87 = arith.constant 0 : index
    %c0_88 = arith.constant 0 : index
    %66 = vector.load %arg8[%c1_86, %c0_87, %c0_88] : memref<20x20x4xf32, #tpu.memory_space<vmem>>, vector<16x20x4xf32>
    %67 = arith.maximumf %65, %66 : vector<16x20x4xf32>
    %c2_89 = arith.constant 2 : index
    %c0_90 = arith.constant 0 : index
    %c0_91 = arith.constant 0 : index
    %68 = vector.load %arg8[%c2_89, %c0_90, %c0_91] : memref<20x20x4xf32, #tpu.memory_space<vmem>>, vector<16x20x4xf32>
    %69 = arith.maximumf %67, %68 : vector<16x20x4xf32>
    %c3_92 = arith.constant 3 : index
    %c0_93 = arith.constant 0 : index
    %c0_94 = arith.constant 0 : index
    %70 = vector.load %arg8[%c3_92, %c0_93, %c0_94] : memref<20x20x4xf32, #tpu.memory_space<vmem>>, vector<16x20x4xf32>
    %71 = arith.maximumf %69, %70 : vector<16x20x4xf32>
    %c4_95 = arith.constant 4 : index
    %c0_96 = arith.constant 0 : index
    %c0_97 = arith.constant 0 : index
    %72 = vector.load %arg8[%c4_95, %c0_96, %c0_97] : memref<20x20x4xf32, #tpu.memory_space<vmem>>, vector<16x20x4xf32>
    %73 = arith.maximumf %71, %72 : vector<16x20x4xf32>
    %c0_98 = arith.constant 0 : index
    %c0_99 = arith.constant 0 : index
    %c0_100 = arith.constant 0 : index
    %74 = vector.load %arg9[%c0_98, %c0_99, %c0_100] : memref<16x20x4xf32, #tpu.memory_space<vmem>>, vector<16x20x4xf32>
    tpu.vector_store %arg9[%c0_98, %c0_99, %c0_100], %73 {strides = array<i32>} : memref<16x20x4xf32, #tpu.memory_space<vmem>>, vector<16x20x4xf32>,
    %c0_101 = arith.constant 0 : index
    %c0_102 = arith.constant 0 : index
    %c0_103 = arith.constant 0 : index
    %75 = vector.load %arg9[%c0_101, %c0_102, %c0_103] : memref<16x20x4xf32, #tpu.memory_space<vmem>>, vector<16x16x4xf32>
    %c0_104 = arith.constant 0 : index
    %c1_105 = arith.constant 1 : index
    %c0_106 = arith.constant 0 : index
    %76 = vector.load %arg9[%c0_104, %c1_105, %c0_106] : memref<16x20x4xf32, #tpu.memory_space<vmem>>, vector<16x16x4xf32>
    %77 = arith.maximumf %75, %76 : vector<16x16x4xf32>
    %c0_107 = arith.constant 0 : index
    %c2_108 = arith.constant 2 : index
    %c0_109 = arith.constant 0 : index
    %78 = vector.load %arg9[%c0_107, %c2_108, %c0_109] : memref<16x20x4xf32, #tpu.memory_space<vmem>>, vector<16x16x4xf32>
    %79 = arith.maximumf %77, %78 : vector<16x16x4xf32>
    %c0_110 = arith.constant 0 : index
    %c3_111 = arith.constant 3 : index
    %c0_112 = arith.constant 0 : index
    %80 = vector.load %arg9[%c0_110, %c3_111, %c0_112] : memref<16x20x4xf32, #tpu.memory_space<vmem>>, vector<16x16x4xf32>
    %81 = arith.maximumf %79, %80 : vector<16x16x4xf32>
    %c0_113 = arith.constant 0 : index
    %c4_114 = arith.constant 4 : index
    %c0_115 = arith.constant 0 : index
    %82 = vector.load %arg9[%c0_113, %c4_114, %c0_115] : memref<16x20x4xf32, #tpu.memory_space<vmem>>, vector<16x16x4xf32>
    %83 = arith.maximumf %81, %82 : vector<16x16x4xf32>
    %84 = vector.shape_cast %83 : vector<16x16x4xf32> to vector<256x4xf32>
    %c2_116 = arith.constant 2 : index
    %c0_117 = arith.constant 0 : index
    %c0_118 = arith.constant 0 : index
    %85 = vector.load %arg5[%c2_116, %c0_117, %c0_118] : memref<4x4x16xf32, #tpu.memory_space<vmem>>, vector<1x4x16xf32>
    %86 = vector.shape_cast %85 : vector<1x4x16xf32> to vector<4x16xf32>
    %cst_119 = arith.constant dense<0.000000e+00> : vector<256x16xf32>
    %87 = tpu.matmul %84, %86, %cst_119 {dimension_numbers = #tpu.dot_dimension_numbers<[1], [0], [0], [1], [0, 0, 1, 1], [], []>} : vector<256x4xf32>, vector<4x16xf32>, vector<256x16xf32> -> vector<256x16xf32>
    %c0_120 = arith.constant 0 : index
    %c0_121 = arith.constant 0 : index
    %c0_122 = arith.constant 0 : index
    %c0_123 = arith.constant 0 : index
    %88 = vector.load %arg7[%c0_120, %c0_121, %c0_122, %c0_123] : memref<1x16x16x16xf32, #tpu.memory_space<vmem>>, vector<1x16x16x16xf32>
    %89 = vector.shape_cast %88 : vector<1x16x16x16xf32> to vector<16x16x16xf32>
    %90 = vector.shape_cast %87 : vector<256x16xf32> to vector<16x16x16xf32>
    %91 = arith.addf %89, %90 : vector<16x16x16xf32>
    %c0_124 = arith.constant 0 : index
    %c0_125 = arith.constant 0 : index
    %c0_126 = arith.constant 0 : index
    %c0_127 = arith.constant 0 : index
    %92 = vector.load %arg7[%c0_124, %c0_125, %c0_126, %c0_127] : memref<1x16x16x16xf32, #tpu.memory_space<vmem>>, vector<1x16x16x16xf32>
    %93 = vector.shape_cast %92 : vector<1x16x16x16xf32> to vector<16x16x16xf32>
    %94 = vector.shape_cast %91 : vector<16x16x16xf32> to vector<1x16x16x16xf32>
    tpu.vector_store %arg7[%c0_124, %c0_125, %c0_126, %c0_127], %94 {strides = array<i32>} : memref<1x16x16x16xf32, #tpu.memory_space<vmem>>, vector<1x16x16x16xf32>,
    %c2_128 = arith.constant 2 : index
    %c2_129 = arith.constant 2 : index
    %c0_130 = arith.constant 0 : index
    %95 = vector.load %arg8[%c2_128, %c2_129, %c0_130] : memref<20x20x4xf32, #tpu.memory_space<vmem>>, vector<16x16x4xf32>
    tpu.vector_store %arg8[%c2_128, %c2_129, %c0_130], %83 {strides = array<i32>} : memref<20x20x4xf32, #tpu.memory_space<vmem>>, vector<16x16x4xf32>,
    %c0_131 = arith.constant 0 : index
    %c0_132 = arith.constant 0 : index
    %c0_133 = arith.constant 0 : index
    %96 = vector.load %arg8[%c0_131, %c0_132, %c0_133] : memref<20x20x4xf32, #tpu.memory_space<vmem>>, vector<16x20x4xf32>
    %c1_134 = arith.constant 1 : index
    %c0_135 = arith.constant 0 : index
    %c0_136 = arith.constant 0 : index
    %97 = vector.load %arg8[%c1_134, %c0_135, %c0_136] : memref<20x20x4xf32, #tpu.memory_space<vmem>>, vector<16x20x4xf32>
    %98 = arith.maximumf %96, %97 : vector<16x20x4xf32>
    %c2_137 = arith.constant 2 : index
    %c0_138 = arith.constant 0 : index
    %c0_139 = arith.constant 0 : index
    %99 = vector.load %arg8[%c2_137, %c0_138, %c0_139] : memref<20x20x4xf32, #tpu.memory_space<vmem>>, vector<16x20x4xf32>
    %100 = arith.maximumf %98, %99 : vector<16x20x4xf32>
    %c3_140 = arith.constant 3 : index
    %c0_141 = arith.constant 0 : index
    %c0_142 = arith.constant 0 : index
    %101 = vector.load %arg8[%c3_140, %c0_141, %c0_142] : memref<20x20x4xf32, #tpu.memory_space<vmem>>, vector<16x20x4xf32>
    %102 = arith.maximumf %100, %101 : vector<16x20x4xf32>
    %c4_143 = arith.constant 4 : index
    %c0_144 = arith.constant 0 : index
    %c0_145 = arith.constant 0 : index
    %103 = vector.load %arg8[%c4_143, %c0_144, %c0_145] : memref<20x20x4xf32, #tpu.memory_space<vmem>>, vector<16x20x4xf32>
    %104 = arith.maximumf %102, %103 : vector<16x20x4xf32>
    %c0_146 = arith.constant 0 : index
    %c0_147 = arith.constant 0 : index
    %c0_148 = arith.constant 0 : index
    %105 = vector.load %arg9[%c0_146, %c0_147, %c0_148] : memref<16x20x4xf32, #tpu.memory_space<vmem>>, vector<16x20x4xf32>
    tpu.vector_store %arg9[%c0_146, %c0_147, %c0_148], %104 {strides = array<i32>} : memref<16x20x4xf32, #tpu.memory_space<vmem>>, vector<16x20x4xf32>,
    %c0_149 = arith.constant 0 : index
    %c0_150 = arith.constant 0 : index
    %c0_151 = arith.constant 0 : index
    %106 = vector.load %arg9[%c0_149, %c0_150, %c0_151] : memref<16x20x4xf32, #tpu.memory_space<vmem>>, vector<16x16x4xf32>
    %c0_152 = arith.constant 0 : index
    %c1_153 = arith.constant 1 : index
    %c0_154 = arith.constant 0 : index
    %107 = vector.load %arg9[%c0_152, %c1_153, %c0_154] : memref<16x20x4xf32, #tpu.memory_space<vmem>>, vector<16x16x4xf32>
    %108 = arith.maximumf %106, %107 : vector<16x16x4xf32>
    %c0_155 = arith.constant 0 : index
    %c2_156 = arith.constant 2 : index
    %c0_157 = arith.constant 0 : index
    %109 = vector.load %arg9[%c0_155, %c2_156, %c0_157] : memref<16x20x4xf32, #tpu.memory_space<vmem>>, vector<16x16x4xf32>
    %110 = arith.maximumf %108, %109 : vector<16x16x4xf32>
    %c0_158 = arith.constant 0 : index
    %c3_159 = arith.constant 3 : index
    %c0_160 = arith.constant 0 : index
    %111 = vector.load %arg9[%c0_158, %c3_159, %c0_160] : memref<16x20x4xf32, #tpu.memory_space<vmem>>, vector<16x16x4xf32>
    %112 = arith.maximumf %110, %111 : vector<16x16x4xf32>
    %c0_161 = arith.constant 0 : index
    %c4_162 = arith.constant 4 : index
    %c0_163 = arith.constant 0 : index
    %113 = vector.load %arg9[%c0_161, %c4_162, %c0_163] : memref<16x20x4xf32, #tpu.memory_space<vmem>>, vector<16x16x4xf32>
    %114 = arith.maximumf %112, %113 : vector<16x16x4xf32>
    %115 = vector.shape_cast %114 : vector<16x16x4xf32> to vector<256x4xf32>
    %c3_164 = arith.constant 3 : index
    %c0_165 = arith.constant 0 : index
    %c0_166 = arith.constant 0 : index
    %116 = vector.load %arg5[%c3_164, %c0_165, %c0_166] : memref<4x4x16xf32, #tpu.memory_space<vmem>>, vector<1x4x16xf32>
    %117 = vector.shape_cast %116 : vector<1x4x16xf32> to vector<4x16xf32>
    %cst_167 = arith.constant dense<0.000000e+00> : vector<256x16xf32>
    %118 = tpu.matmul %115, %117, %cst_167 {dimension_numbers = #tpu.dot_dimension_numbers<[1], [0], [0], [1], [0, 0, 1, 1], [], []>} : vector<256x4xf32>, vector<4x16xf32>, vector<256x16xf32> -> vector<256x16xf32>
    %c0_168 = arith.constant 0 : index
    %c0_169 = arith.constant 0 : index
    %c0_170 = arith.constant 0 : index
    %c0_171 = arith.constant 0 : index
    %119 = vector.load %arg7[%c0_168, %c0_169, %c0_170, %c0_171] : memref<1x16x16x16xf32, #tpu.memory_space<vmem>>, vector<1x16x16x16xf32>
    %120 = vector.shape_cast %119 : vector<1x16x16x16xf32> to vector<16x16x16xf32>
    %121 = vector.shape_cast %118 : vector<256x16xf32> to vector<16x16x16xf32>
    %122 = arith.addf %120, %121 : vector<16x16x16xf32>
    %c0_172 = arith.constant 0 : index
    %c0_173 = arith.constant 0 : index
    %c0_174 = arith.constant 0 : index
    %c0_175 = arith.constant 0 : index
    %123 = vector.load %arg7[%c0_172, %c0_173, %c0_174, %c0_175] : memref<1x16x16x16xf32, #tpu.memory_space<vmem>>, vector<1x16x16x16xf32>
    %124 = vector.shape_cast %123 : vector<1x16x16x16xf32> to vector<16x16x16xf32>
    %125 = vector.shape_cast %122 : vector<16x16x16xf32> to vector<1x16x16x16xf32>
    tpu.vector_store %arg7[%c0_172, %c0_173, %c0_174, %c0_175], %125 {strides = array<i32>} : memref<1x16x16x16xf32, #tpu.memory_space<vmem>>, vector<1x16x16x16xf32>,
    %c0_i32_176 = arith.constant 0 : i32
    %126 = arith.cmpi eq, %arg1, %c0_i32_176 : i32
    %127 = arith.extui %126 : i1 to i32
    %c0_i32_177 = arith.constant 0 : i32
    %128 = arith.cmpi ne, %127, %c0_i32_177 : i32
    scf.if %128 {
      %c0_178 = arith.constant 0 : index
      %c0_179 = arith.constant 0 : index
      %c0_180 = arith.constant 0 : index
      %c0_181 = arith.constant 0 : index
      %129 = vector.load %arg7[%c0_178, %c0_179, %c0_180, %c0_181] : memref<1x16x16x16xf32, #tpu.memory_space<vmem>>, vector<1x16x16x16xf32>
      %cst_182 = arith.constant 1.000000e-01 : f32
      %130 = vector.broadcast %cst_182 : f32 to vector<1x16x16x16xf32>
      %131 = arith.mulf %130, %129 : vector<1x16x16x16xf32>
      %132 = arith.maximumf %129, %131 : vector<1x16x16x16xf32>
      %c0_183 = arith.constant 0 : index
      %c0_184 = arith.constant 0 : index
      %c0_185 = arith.constant 0 : index
      %c0_186 = arith.constant 0 : index
      %133 = vector.load %arg7[%c0_183, %c0_184, %c0_185, %c0_186] : memref<1x16x16x16xf32, #tpu.memory_space<vmem>>, vector<1x16x16x16xf32>
      tpu.vector_store %arg7[%c0_183, %c0_184, %c0_185, %c0_186], %132 {strides = array<i32>} : memref<1x16x16x16xf32, #tpu.memory_space<vmem>>, vector<1x16x16x16xf32>,
    } else {
    }
    return
  }
  func.func @transform_0(%arg0: i32, %arg1: i32) -> (i32, i32, i32, i32) {
    %c0_i32 = arith.constant 0 : i32
    %c0_i32_0 = arith.constant 0 : i32
    %c0_i32_1 = arith.constant 0 : i32
    %c0_i32_2 = arith.constant 0 : i32
    return %arg0, %c0_i32, %c0_i32_0, %c0_i32_1 : i32, i32, i32, i32
  }
  func.func @transform_1(%arg0: i32, %arg1: i32) -> (i32, i32) {
    %c0_i32 = arith.constant 0 : i32
    %c0_i32_0 = arith.constant 0 : i32
    return %c0_i32, %arg1 : i32, i32
  }
  func.func @transform_2(%arg0: i32, %arg1: i32) -> (i32, i32) {
    %c0_i32 = arith.constant 0 : i32
    %c0_i32_0 = arith.constant 0 : i32
    return %c0_i32, %arg1 : i32, i32
  }
  func.func @transform_3(%arg0: i32, %arg1: i32) -> (i32, i32, i32) {
    %c0_i32 = arith.constant 0 : i32
    %c0_i32_0 = arith.constant 0 : i32
    %c0_i32_1 = arith.constant 0 : i32
    return %c0_i32, %arg1, %c0_i32_0 : i32, i32, i32
  }
  func.func @transform_4(%arg0: i32, %arg1: i32) -> (i32, i32) {
    %c0_i32 = arith.constant 0 : i32
    %c0_i32_0 = arith.constant 0 : i32
    %c0_i32_1 = arith.constant 0 : i32
    return %c0_i32, %c0_i32_0 : i32, i32
  }
  func.func @transform_5(%arg0: i32, %arg1: i32) -> (i32, i32, i32, i32) {
    %c0_i32 = arith.constant 0 : i32
    %c0_i32_0 = arith.constant 0 : i32
    %c0_i32_1 = arith.constant 0 : i32
    %c0_i32_2 = arith.constant 0 : i32
    return %arg0, %c0_i32, %c0_i32_0, %c0_i32_1 : i32, i32, i32, i32
  }
}

</mosaic_0001>

<bundles_post_ra>
// kernel: sppf_forward.1
= control target key start
LH: loop header
LB: loop body
LE: loop exit
PB: predicated region body
PF: predicated region fallthrough
CT: control target
= control target key end

     0   :  { %s4849_s18 = smov 0   ;;  %s4851_s19 = smov 0   ;;  %s7392_s0 = inlined_call_operand.vmem [shape: f32[2,16,16,8], index: 0, kind: input, shape index: {}]   ;;  %s7393_s1 = inlined_call_operand.vmem [shape: f32[8,4], index: 1, kind: input, shape index: {}]   ;;  %s7394_s2 = inlined_call_operand.vmem [shape: f32[1,4], index: 2, kind: input, shape index: {}]   ;;  %s7395_s3 = inlined_call_operand.vmem [shape: f32[4,4,16], index: 3, kind: input, shape index: {}]   ;;  %s7396_s4 = inlined_call_operand.vmem [shape: f32[1,16], index: 4, kind: input, shape index: {}]   ;;  %s7397_s5 = inlined_call_operand.vmem [shape: f32[2,16,16,16], index: 5, kind: output, shape index: {}]  }
   0x1   :  { %s4853_s20 = smov 0  }
   0x2 LB: > { %s27_s21 = sadd.s32 1, %s4812_s19  ;;  %p4574_p0 = scmp.ge.s32.totalorder %s4816_s20, 1  ;;  %s4816_s20 = sphi %s4853_s20, %s15_s20   ;;  %s4812_s19 = sphi %s4851_s19, %s7473_s19   ;;  %s4808_s18 = sphi %s4849_s18, %s7472_s18  }
   0x3   : > { %p29_p1 = scmp.ge.s32.totalorder %s27_s21, 2  ;;  %p225_p2 = scmp.lt.s32.totalorder %s4816_s20, 3 }
   0x5   : > { %s7475_s21 = smov (%p29_p1, %s27_s21), 0  ;;  %p226_p3 = pnand %p4574_p0, %p225_p2 }
   0x7   : > { %229 = sbr.rel (%p226_p3) target bundleno = 773 (0x305), region = 40 }
   0xc   : > { %v317_v0 = vld [vmem:[%s7393_s1] sm:$0xff]  ;;  %p264_p4 = scmp.lt.s32.totalorder %s4808_s18, 1  ;;  %vm322_vm0 = vcmask 64512   ;;  %vm638_vm1 = vcmask 31744   ;;  %vm964_vm2 = vcmask 25600   ;;  %vm735_vm3 = vcmask 1043456  }
   0xd   : > { %434 = vmatpush.msra.mxu0 %v317_v0  ;;  %4750 = vmatpush.msra.mxu1 %v317_v0  ;;  %v4818_v33 = vmov -3.4028235e+38   ;;  %v637_v34 = vld [vmem:[%s7395_s3] sm:$0xf]  ;;  %vm951_vm4 = vcmask 27648   ;;  %vm604_vm5 = vcmask 130048  }
   0xe   : > { %4751 = vmatpush.msra.mxu2 %v317_v0  ;;  %s7477_s18 = smov (!%p264_p4, %s4808_s18), 1  ;;  %4752 = vmatpush.msra.mxu3 %v317_v0  ;;  %949 = vst.msk [vmem:[#allocation2] sm:$0xff] %vm638_vm1, %v4818_v33  ;;  %v4997_v35 = vld [vmem:[%s7394_s2] ss:$0 sm:$0xff] }
   0xf   : > { %s4748_s24 = sshll.u32 %s7477_s18, 8  ;;  %953 = vst.msk [vmem:[#allocation2 + $0x18] sm:$0xff] %vm638_vm1, %v4818_v33  ;;  %4611 = vmatpush.msk.msrb.mxu1 %vm735_vm3, %v637_v34 }
  0x10   : > { %s4878_s27 = scalar_lea.vmem %s7392_s0, %s4748_s24  ;;  %965 = vst.msk [vmem:[#allocation2 + $0x30] sm:$0x3] %vm964_vm2, %v4818_v33  ;;  %s5544_s15 = scalar_lea.vmem %s7397_s5, %s4748_s24 }
  0x11   : > { %v285_v1 = vld [vmem:[%s4878_s27] sm:$0xff]  ;;  %v286_v5 = vld [vmem:[%s4878_s27 + $0x8] sm:$0xff]  ;;  %v287_v9 = vld [vmem:[%s4878_s27 + $0x10] sm:$0xff]  ;;  %950 = vst.msk [vmem:[#allocation2 + $0x8] sm:$0xff] %vm638_vm1, %v4818_v33 }
  0x12   : > { %v293_v2 = vld [vmem:[%s4878_s27 + $0x40] sm:$0xff]  ;;  %4579 = vmatmul.msk.f32.vlgmr.msra.gmra.mxu0 %vm322_vm0, %v285_v1  ;;  %v294_v6 = vld [vmem:[%s4878_s27 + $0x48] sm:$0xff]  ;;  %v295_v10 = vld [vmem:[%s4878_s27 + $0x50] sm:$0xff]  ;;  %954 = vst.msk [vmem:[#allocation2 + $0x20] sm:$0xff] %vm638_vm1, %v4818_v33 }
  0x13   : > { %v301_v3 = vld [vmem:[%s4878_s27 + $0x80] sm:$0xff]  ;;  %4587 = vmatmul.msk.f32.vlgmr.msra.gmra.mxu1 %vm322_vm0, %v293_v2  ;;  %v302_v7 = vld [vmem:[%s4878_s27 + $0x88] sm:$0xff]  ;;  %v303_v11 = vld [vmem:[%s4878_s27 + $0x90] sm:$0xff]  ;;  %957 = vst.msk [vmem:[#allocation2 + $0x1b0] sm:$0xff] %vm638_vm1, %v4818_v33 }
  0x14   : > { %4595 = vmatmul.msk.f32.vlgmr.msra.gmra.mxu2 %vm322_vm0, %v301_v3  ;;  %v309_v4 = vld [vmem:[%s4878_s27 + $0xc0] sm:$0xff]  ;;  %v310_v8 = vld [vmem:[%s4878_s27 + $0xc8] sm:$0xff]  ;;  %v311_v12 = vld [vmem:[%s4878_s27 + $0xd0] sm:$0xff]  ;;  %958 = vst.msk [vmem:[#allocation2 + $0x1b8] sm:$0xff] %vm638_vm1, %v4818_v33 }
  0x15   : > { %4603 = vmatmul.msk.f32.vlgmr.msra.gmra.mxu3 %vm322_vm0, %v309_v4  ;;  %v288_v13 = vld [vmem:[%s4878_s27 + $0x18] sm:$0xff]  ;;  %v289_v17 = vld [vmem:[%s4878_s27 + $0x20] sm:$0xff]  ;;  %v290_v21 = vld [vmem:[%s4878_s27 + $0x28] sm:$0xff]  ;;  %960 = vst.msk [vmem:[#allocation2 + $0x1c8] sm:$0xff] %vm638_vm1, %v4818_v33 }
  0x16   : > { %v296_v14 = vld [vmem:[%s4878_s27 + $0x58] sm:$0xff]  ;;  %v297_v18 = vld [vmem:[%s4878_s27 + $0x60] sm:$0xff]  ;;  %v298_v22 = vld [vmem:[%s4878_s27 + $0x68] sm:$0xff]  ;;  %961 = vst.msk [vmem:[#allocation2 + $0x1d0] sm:$0xff] %vm638_vm1, %v4818_v33 }
  0x17   : > { %v304_v15 = vld [vmem:[%s4878_s27 + $0x98] sm:$0xff]  ;;  %v305_v19 = vld [vmem:[%s4878_s27 + $0xa0] sm:$0xff]  ;;  %v306_v23 = vld [vmem:[%s4878_s27 + $0xa8] sm:$0xff]  ;;  %966 = vst.msk [vmem:[#allocation2 + $0x48] sm:$0x3] %vm964_vm2, %v4818_v33 }
  0x18   : > { %v312_v16 = vld [vmem:[%s4878_s27 + $0xd8] sm:$0xff]  ;;  %v313_v20 = vld [vmem:[%s4878_s27 + $0xe0] sm:$0xff]  ;;  %v314_v24 = vld [vmem:[%s4878_s27 + $0xe8] sm:$0xff]  ;;  %967 = vst.msk [vmem:[#allocation2 + $0x60] sm:$0x3] %vm964_vm2, %v4818_v33 }
  0x19   : > { %v291_v25 = vld [vmem:[%s4878_s27 + $0x30] sm:$0xff]  ;;  %v292_v29 = vld [vmem:[%s4878_s27 + $0x38] sm:$0xff]  ;;  %968 = vst.msk [vmem:[#allocation2 + $0x78] sm:$0x3] %vm964_vm2, %v4818_v33 }
  0x1a   : > { %4580 = vmatmul.msk.f32.gmra.mxu0 %vm322_vm0, %v286_v5  ;;  %v299_v26 = vld [vmem:[%s4878_s27 + $0x70] sm:$0xff]  ;;  %v300_v30 = vld [vmem:[%s4878_s27 + $0x78] sm:$0xff]  ;;  %969 = vst.msk [vmem:[#allocation2 + $0x90] sm:$0x3] %vm964_vm2, %v4818_v33 }
  0x1b   : > { %4588 = vmatmul.msk.f32.gmra.mxu1 %vm322_vm0, %v294_v6  ;;  %v307_v27 = vld [vmem:[%s4878_s27 + $0xb0] sm:$0xff]  ;;  %v308_v31 = vld [vmem:[%s4878_s27 + $0xb8] sm:$0xff]  ;;  %970 = vst.msk [vmem:[#allocation2 + $0xa8] sm:$0x3] %vm964_vm2, %v4818_v33 }
  0x1c   : > { %4596 = vmatmul.msk.f32.gmra.mxu2 %vm322_vm0, %v302_v7  ;;  %v315_v28 = vld [vmem:[%s4878_s27 + $0xf0] sm:$0xff]  ;;  %v316_v32 = vld [vmem:[%s4878_s27 + $0xf8] sm:$0xff]  ;;  %971 = vst.msk [vmem:[#allocation2 + $0xc0] sm:$0x3] %vm964_vm2, %v4818_v33 }
  0x1d   : > { %4604 = vmatmul.msk.f32.gmra.mxu3 %vm322_vm0, %v310_v8  ;;  %972 = vst.msk [vmem:[#allocation2 + $0xd8] sm:$0x3] %vm964_vm2, %v4818_v33 }
  0x1e   : > { %973 = vst.msk [vmem:[#allocation2 + $0xf0] sm:$0x3] %vm964_vm2, %v4818_v33 }
  0x1f   : > { %974 = vst.msk [vmem:[#allocation2 + $0x108] sm:$0x3] %vm964_vm2, %v4818_v33 }
  0x20   : > { %975 = vst.msk [vmem:[#allocation2 + $0x120] sm:$0x3] %vm964_vm2, %v4818_v33 }
  0x21   : > { %976 = vst.msk [vmem:[#allocation2 + $0x138] sm:$0x3] %vm964_vm2, %v4818_v33 }
  0x22   : > { %4581 = vmatmul.msk.f32.gmra.mxu0 %vm322_vm0, %v287_v9  ;;  %977 = vst.msk [vmem:[#allocation2 + $0x150] sm:$0x3] %vm964_vm2, %v4818_v33 }
  0x23   : > { %4589 = vmatmul.msk.f32.gmra.mxu1 %vm322_vm0, %v295_v10  ;;  %978 = vst.msk [vmem:[#allocation2 + $0x168] sm:$0x3] %vm964_vm2, %v4818_v33 }
  0x24   : > { %4597 = vmatmul.msk.f32.gmra.mxu2 %vm322_vm0, %v303_v11  ;;  %979 = vst.msk [vmem:[#allocation2 + $0x180] sm:$0x3] %vm964_vm2, %v4818_v33 }
  0x25   : > { %4605 = vmatmul.msk.f32.gmra.mxu3 %vm322_vm0, %v311_v12  ;;  %980 = vst.msk [vmem:[#allocation2 + $0x198] sm:$0x3] %vm964_vm2, %v4818_v33 }
  0x26   : > { %981 = vst.msk [vmem:[#allocation2 + $0x42] sm:$0x3] %vm964_vm2, %v4818_v33 }
  0x27   : > { %982 = vst.msk [vmem:[#allocation2 + $0x5a] sm:$0x3] %vm964_vm2, %v4818_v33 }
  0x28   : > { %983 = vst.msk [vmem:[#allocation2 + $0x72] sm:$0x3] %vm964_vm2, %v4818_v33 }
  0x29   : > { %984 = vst.msk [vmem:[#allocation2 + $0x8a] sm:$0x3] %vm964_vm2, %v4818_v33 }
  0x2a   : > { %4582 = vmatmul.msk.f32.gmra.mxu0 %vm322_vm0, %v288_v13  ;;  %985 = vst.msk [vmem:[#allocation2 + $0xa2] sm:$0x3] %vm964_vm2, %v4818_v33 }
  0x2b   : > { %4590 = vmatmul.msk.f32.gmra.mxu1 %vm322_vm0, %v296_v14  ;;  %986 = vst.msk [vmem:[#allocation2 + $0xba] sm:$0x3] %vm964_vm2, %v4818_v33 }
  0x2c   : > { %4598 = vmatmul.msk.f32.gmra.mxu2 %vm322_vm0, %v304_v15  ;;  %987 = vst.msk [vmem:[#allocation2 + $0xd2] sm:$0x3] %vm964_vm2, %v4818_v33 }
  0x2d   : > { %4606 = vmatmul.msk.f32.gmra.mxu3 %vm322_vm0, %v312_v16  ;;  %988 = vst.msk [vmem:[#allocation2 + $0xea] sm:$0x3] %vm964_vm2, %v4818_v33 }
  0x2e   : > { %989 = vst.msk [vmem:[#allocation2 + $0x102] sm:$0x3] %vm964_vm2, %v4818_v33 }
  0x2f   : > { %990 = vst.msk [vmem:[#allocation2 + $0x11a] sm:$0x3] %vm964_vm2, %v4818_v33 }
  0x30   : > { %991 = vst.msk [vmem:[#allocation2 + $0x132] sm:$0x3] %vm964_vm2, %v4818_v33 }
  0x31   : > { %992 = vst.msk [vmem:[#allocation2 + $0x14a] sm:$0x3] %vm964_vm2, %v4818_v33 }
  0x32   : > { %4583 = vmatmul.msk.f32.gmra.mxu0 %vm322_vm0, %v289_v17  ;;  %993 = vst.msk [vmem:[#allocation2 + $0x162] sm:$0x3] %vm964_vm2, %v4818_v33 }
  0x33   : > { %4591 = vmatmul.msk.f32.gmra.mxu1 %vm322_vm0, %v297_v18  ;;  %994 = vst.msk [vmem:[#allocation2 + $0x17a] sm:$0x3] %vm964_vm2, %v4818_v33 }
  0x34   : > { %4599 = vmatmul.msk.f32.gmra.mxu2 %vm322_vm0, %v305_v19  ;;  %995 = vst.msk [vmem:[#allocation2 + $0x192] sm:$0x3] %vm964_vm2, %v4818_v33 }
  0x35   : > { %4607 = vmatmul.msk.f32.gmra.mxu3 %vm322_vm0, %v313_v20  ;;  %996 = vst.msk [vmem:[#allocation2 + $0x1aa] sm:$0x3] %vm964_vm2, %v4818_v33 }
  0x36   : > { %952 = vst.msk [vmem:[#allocation2 + $0x10] sm:$0xf] %vm951_vm4, %v4818_v33 }
  0x37   : > { %955 = vst.msk [vmem:[#allocation2 + $0x28] sm:$0xf] %vm951_vm4, %v4818_v33 }
  0x38   : > { %959 = vst.msk [vmem:[#allocation2 + $0x1c0] sm:$0xf] %vm951_vm4, %v4818_v33 }
  0x39   : > { %962 = vst.msk [vmem:[#allocation2 + $0x1d8] sm:$0xf] %vm951_vm4, %v4818_v33 }
  0x3a   : > { %4584 = vmatmul.msk.f32.gmra.mxu0 %vm322_vm0, %v290_v21 }
  0x3b   : > { %4592 = vmatmul.msk.f32.gmra.mxu1 %vm322_vm0, %v298_v22 }
  0x3c   : > { %4600 = vmatmul.msk.f32.gmra.mxu2 %vm322_vm0, %v306_v23 }
  0x3d   : > { %4608 = vmatmul.msk.f32.gmra.mxu3 %vm322_vm0, %v314_v24 }
  0x42   : > { %4585 = vmatmul.msk.f32.gmra.mxu0 %vm322_vm0, %v291_v25 }
  0x43   : > { %4593 = vmatmul.msk.f32.gmra.mxu1 %vm322_vm0, %v299_v26 }
  0x44   : > { %4601 = vmatmul.msk.f32.gmra.mxu2 %vm322_vm0, %v307_v27 }
  0x45   : > { %4609 = vmatmul.msk.f32.gmra.mxu3 %vm322_vm0, %v315_v28 }
  0x4a   : > { %4586 = vmatmul.msk.f32.gmra.mxu0 %vm322_vm0, %v292_v29 }
  0x4b   : > { %4594 = vmatmul.msk.f32.gmra.mxu1 %vm322_vm0, %v300_v30 }
  0x4c   : > { %4602 = vmatmul.msk.f32.gmra.mxu2 %vm322_vm0, %v308_v31 }
  0x4d   : > { %4610 = vmatmul.msk.f32.gmra.mxu3 %vm322_vm0, %v316_v32 }
  0x8f   : > { %v436_v36 = vpop.f32.mrf.mxu0 }
  0x90   : > { %v460_v37 = vpop.f32.mrf.mxu1  ;;  %v437_v38 = vadd.f32 %v4997_v35, %v436_v36 }
  0x91   : > { %v461_v40 = vadd.f32 %v4997_v35, %v460_v37 }
  0x92   : > { %v532_v39 = vmul.f32 0.1, %v437_v38 }
  0x93   : > { %v540_v42 = vmul.f32 0.1, %v461_v40 }
  0x94   : > { %v564_v41 = vmax.f32 %v437_v38, %v532_v39 }
  0x95   : > { %v5034_v51 = vmax.f32 %v461_v40, %v540_v42 }
  0x96   : > { %997 = vst.msk [vmem:[#allocation2 + $0x32] sm:$0xff] %vm638_vm1, %v564_v41  ;;  %4612 = vmatmul.msk.f32.vlgmr.msrb.gmra.mxu1 %vm638_vm1, %v564_v41 }
  0x97   : > { %v484_v43 = vpop.f32.mrf.mxu2  ;;  %v439_v45 = vpop.f32.mrf.mxu0  ;;  %1005 = vst.msk [vmem:[#allocation2 + $0x92] sm:$0xff] %vm638_vm1, %v5034_v51 }
  0x98   : > { %v485_v44 = vadd.f32 %v4997_v35, %v484_v43  ;;  %v463_v46 = vpop.f32.mrf.mxu1  ;;  %v440_v47 = vadd.f32 %v4997_v35, %v439_v45  ;;  %v508_v48 = vpop.f32.mrf.mxu3  ;;  %v1029_v43 = vld [vmem:[#allocation2] sm:$0xff] }
  0x99   : > { %v464_v50 = vadd.f32 %v4997_v35, %v463_v46  ;;  %v509_v54 = vadd.f32 %v4997_v35, %v508_v48 }
  0x9a   : > { %v548_v49 = vmul.f32 0.1, %v485_v44  ;;  %v533_v52 = vmul.f32 0.1, %v440_v47 }
  0x9b   : > { %v541_v56 = vmul.f32 0.1, %v464_v50  ;;  %v556_v59 = vmul.f32 0.1, %v509_v54 }
  0x9c   : > { %v5038_v53 = vmax.f32 %v485_v44, %v548_v49  ;;  %v565_v55 = vmax.f32 %v440_v47, %v533_v52  ;;  %v5109_v44 = vld [vmem:[#allocation2 + $0x18] sm:$0xff] }
  0x9d   : > { %v5057_v1 = vmax.f32 %v464_v50, %v541_v56  ;;  %v5065_v7 = vmax.f32 %v509_v54, %v556_v59  ;;  %v5121_v54 = vmax.f32 %v1029_v43, %v5109_v44  ;;  %v5124_v56 = vld [vmem:[#allocation2 + $0x30] sm:$0xff] }
  0x9e   : > { %7422 = vst [vmem:[#allocation4_spill] sm:$0xff] %v5038_v53  ;;  %4613 = vmatmul.msk.f32.gmra.mxu1 %vm638_vm1, %v565_v55 }
  0x9f   : > { %v487_v57 = vpop.f32.mrf.mxu2  ;;  %1013 = vst.msk [vmem:[#allocation2 + $0xf2] sm:$0xff] %vm638_vm1, %v5038_v53  ;;  %v442_v60 = vpop.f32.mrf.mxu0 }
  0xa0   : > { %v488_v58 = vadd.f32 %v4997_v35, %v487_v57  ;;  %v466_v61 = vpop.f32.mrf.mxu1  ;;  %v443_v62 = vadd.f32 %v4997_v35, %v442_v60  ;;  %v511_v0 = vpop.f32.mrf.mxu3  ;;  %998 = vst.msk [vmem:[#allocation2 + $0x3a] sm:$0xff] %vm638_vm1, %v565_v55 }
  0xa1   : > { %v467_v63 = vadd.f32 %v4997_v35, %v466_v61  ;;  %v512_v3 = vadd.f32 %v4997_v35, %v511_v0  ;;  %7424 = vst [vmem:[#allocation6_spill] sm:$0xff] %v5065_v7  ;;  %v1222_v0 = vmax.f32 %v5121_v54, %v5124_v56 }
  0xa2   : > { %v549_v2 = vmul.f32 0.1, %v488_v58  ;;  %v534_v4 = vmul.f32 0.1, %v443_v62  ;;  %1006 = vst.msk [vmem:[#allocation2 + $0x9a] sm:$0xff] %vm638_vm1, %v5057_v1 }
  0xa3   : > { %v542_v5 = vmul.f32 0.1, %v467_v63  ;;  %v557_v8 = vmul.f32 0.1, %v512_v3  ;;  %1021 = vst.msk [vmem:[#allocation2 + $0x152] sm:$0xff] %vm638_vm1, %v5065_v7 }
  0xa4   : > { %v5063_v6 = vmax.f32 %v488_v58, %v549_v2  ;;  %v566_v9 = vmax.f32 %v443_v62, %v534_v4  ;;  %7431 = vst [vmem:[#allocation13_spill] sm:$0xff] %v5121_v54  ;;  %v1030_v4 = vld [vmem:[#allocation2 + $0x8] sm:$0xff] }
  0xa5   : > { %v5071_v10 = vmax.f32 %v467_v63, %v542_v5  ;;  %v5075_v12 = vmax.f32 %v512_v3, %v557_v8 }
  0xa6   : > { %7423 = vst [vmem:[#allocation5_spill] sm:$0xff] %v5063_v6  ;;  %4614 = vmatmul.msk.f32.gmra.mxu1 %vm638_vm1, %v566_v9 }
  0xa7   : > { %1014 = vst.msk [vmem:[#allocation2 + $0xfa] sm:$0xff] %vm638_vm1, %v5063_v6  ;;  %v490_v11 = vpop.f32.mrf.mxu2  ;;  %v445_v14 = vpop.f32.mrf.mxu0 }
  0xa8   : > { %7425 = vst [vmem:[#allocation7_spill] sm:$0xff] %v5075_v12  ;;  %v491_v13 = vadd.f32 %v4997_v35, %v490_v11  ;;  %v469_v15 = vpop.f32.mrf.mxu1  ;;  %v446_v16 = vadd.f32 %v4997_v35, %v445_v14  ;;  %v514_v18 = vpop.f32.mrf.mxu3  ;;  %v5140_v11 = vld [vmem:[#allocation2 + $0x20] sm:$0xff] }
  0xa9   : > { %999 = vst.msk [vmem:[#allocation2 + $0x4a] sm:$0xff] %vm638_vm1, %v566_v9  ;;  %v470_v17 = vadd.f32 %v4997_v35, %v469_v15  ;;  %v515_v19 = vadd.f32 %v4997_v35, %v514_v18  ;;  %v1031_v9 = vld [vmem:[#allocation2 + $0x10] sm:$0xf] }
  0xaa   : > { %1007 = vst.msk [vmem:[#allocation2 + $0xaa] sm:$0xff] %vm638_vm1, %v5071_v10  ;;  %v550_v20 = vmul.f32 0.1, %v491_v13  ;;  %v535_v21 = vmul.f32 0.1, %v446_v16 }
  0xab   : > { %1022 = vst.msk [vmem:[#allocation2 + $0x15a] sm:$0xff] %vm638_vm1, %v5075_v12  ;;  %v543_v22 = vmul.f32 0.1, %v470_v17  ;;  %v558_v23 = vmul.f32 0.1, %v515_v19 }
  0xac   : > { %v5089_v24 = vmax.f32 %v491_v13, %v550_v20  ;;  %v567_v25 = vmax.f32 %v446_v16, %v535_v21  ;;  %v1080_v13 = vld [vmem:[#allocation2 + $0x28] sm:$0xf] }
  0xad   : > { %v5091_v26 = vmax.f32 %v470_v17, %v543_v22  ;;  %v5096_v29 = vmax.f32 %v515_v19, %v558_v23  ;;  %v5155_v23 = vmax.f32 %v1030_v4, %v5140_v11 }
  0xae   : > { %7426 = vst [vmem:[#allocation8_spill] sm:$0xff] %v5089_v24  ;;  %4615 = vmatmul.msk.f32.gmra.mxu1 %vm638_vm1, %v567_v25 }
  0xaf   : > { %1015 = vst.msk [vmem:[#allocation2 + $0x10a] sm:$0xff] %vm638_vm1, %v5089_v24  ;;  %v493_v27 = vpop.f32.mrf.mxu2  ;;  %v448_v30 = vpop.f32.mrf.mxu0 }
  0xb0   : > { %v494_v28 = vadd.f32 %v4997_v35, %v493_v27  ;;  %7427 = vst [vmem:[#allocation9_spill] sm:$0xff] %v5096_v29  ;;  %v472_v31 = vpop.f32.mrf.mxu1  ;;  %v449_v32 = vadd.f32 %v4997_v35, %v448_v30  ;;  %v517_v34 = vpop.f32.mrf.mxu3  ;;  %v5132_v61 = vld [vmem:[#allocation2 + $0x48] sm:$0xff]  ;;  %v1176_v30 = vld [vmem:[#allocation2 + $0x40] sm:$0xf] }
  0xb1   : > { %1000 = vst.msk [vmem:[#allocation2 + $0x52] sm:$0xff] %vm638_vm1, %v567_v25  ;;  %v473_v33 = vadd.f32 %v4997_v35, %v472_v31  ;;  %v518_v36 = vadd.f32 %v4997_v35, %v517_v34  ;;  %v1319_v14 = vmax.f32 %v1222_v0, %v5132_v61  ;;  %v1128_v25 = vmax.f32 %v1031_v9, %v1080_v13 }
  0xb2   : > { %1008 = vst.msk [vmem:[#allocation2 + $0xb2] sm:$0xff] %vm638_vm1, %v5091_v26  ;;  %v551_v37 = vmul.f32 0.1, %v494_v28  ;;  %v536_v38 = vmul.f32 0.1, %v449_v32 }
  0xb3   : > { %1023 = vst.msk [vmem:[#allocation2 + $0x16a] sm:$0xff] %vm638_vm1, %v5096_v29  ;;  %v544_v39 = vmul.f32 0.1, %v473_v33  ;;  %v559_v40 = vmul.f32 0.1, %v518_v36 }
  0xb4   : > { %v5107_v41 = vmax.f32 %v494_v28, %v551_v37  ;;  %v568_v42 = vmax.f32 %v449_v32, %v536_v38  ;;  %7435 = vst [vmem:[#allocation17_spill] sm:$0xff] %v5155_v23  ;;  %v5160_v28 = vld [vmem:[#allocation2 + $0x38] sm:$0xff]  ;;  %v1224_v38 = vmax.f32 %v1128_v25, %v1176_v30  ;;  %v5202_v25 = vld [vmem:[#allocation2 + $0x90] sm:$0xff] }
  0xb5   : > { %v5111_v45 = vmax.f32 %v473_v33, %v544_v39  ;;  %v5116_v48 = vmax.f32 %v518_v36, %v559_v40  ;;  %v1223_v37 = vmax.f32 %v5155_v23, %v5160_v28 }
  0xb6   : > { %7428 = vst [vmem:[#allocation10_spill] sm:$0xff] %v5107_v41  ;;  %4616 = vmatmul.msk.f32.gmra.mxu1 %vm638_vm1, %v568_v42 }
  0xb7   : > { %7429 = vst [vmem:[#allocation11_spill] sm:$0xff] %v5111_v45  ;;  %v496_v46 = vpop.f32.mrf.mxu2  ;;  %v451_v49 = vpop.f32.mrf.mxu0 }
  0xb8   : > { %1016 = vst.msk [vmem:[#allocation2 + $0x112] sm:$0xff] %vm638_vm1, %v5107_v41  ;;  %v497_v47 = vadd.f32 %v4997_v35, %v496_v46  ;;  %v475_v50 = vpop.f32.mrf.mxu1  ;;  %v520_v52 = vpop.f32.mrf.mxu3  ;;  %v452_v55 = vadd.f32 %v4997_v35, %v451_v49  ;;  %v5166_v33 = vld [vmem:[#allocation2 + $0x50] sm:$0xff]  ;;  %v1273_v34 = vld [vmem:[#allocation2 + $0x58] sm:$0xf] }
  0xb9   : > { %7430 = vst [vmem:[#allocation12_spill] sm:$0xff] %v5116_v48  ;;  %v476_v57 = vadd.f32 %v4997_v35, %v475_v50  ;;  %v521_v58 = vadd.f32 %v4997_v35, %v520_v52  ;;  %v1320_v50 = vmax.f32 %v1223_v37, %v5166_v33  ;;  %v1321_v52 = vmax.f32 %v1224_v38, %v1273_v34  ;;  %v5212_v34 = vld [vmem:[#allocation2 + $0xa8] sm:$0xff]  ;;  %v1191_v54 = vld [vmem:[#allocation2 + $0xb8] sm:$0xf] }
  0xba   : > { %1001 = vst.msk [vmem:[#allocation2 + $0x62] sm:$0xff] %vm638_vm1, %v568_v42  ;;  %v552_v59 = vmul.f32 0.1, %v497_v47  ;;  %v537_v60 = vmul.f32 0.1, %v452_v55 }
  0xbb   : > { %1009 = vst.msk [vmem:[#allocation2 + $0xc2] sm:$0xff] %vm638_vm1, %v5111_v45  ;;  %v545_v62 = vmul.f32 0.1, %v476_v57  ;;  %v560_v63 = vmul.f32 0.1, %v521_v58 }
  0xbc   : > { %1024 = vst.msk [vmem:[#allocation2 + $0x172] sm:$0xff] %vm638_vm1, %v5116_v48  ;;  %v5136_v2 = vmax.f32 %v497_v47, %v552_v59  ;;  %v569_v3 = vmax.f32 %v452_v55, %v537_v60 }
  0xbd   : > { %v5138_v5 = vmax.f32 %v476_v57, %v545_v62  ;;  %v5149_v19 = vmax.f32 %v521_v58, %v560_v63  ;;  %v4644_v58 = vld [vmem:[%s7395_s3 + $0x4] sm:$0xf] }
  0xbe   : > { %7432 = vst [vmem:[#allocation14_spill] sm:$0xff] %v5136_v2  ;;  %4617 = vmatmul.msk.f32.gmra.mxu1 %vm638_vm1, %v569_v3  ;;  %4645 = vmatpush.msk.msrb.mxu2 %vm735_vm3, %v4644_v58  ;;  %v1144_v58 = vmax.f32 %v5202_v25, %v5212_v34 }
  0xbf   : > { %7433 = vst [vmem:[#allocation15_spill] sm:$0xff] %v5138_v5  ;;  %v499_v8 = vpop.f32.mrf.mxu2  ;;  %v454_v15 = vpop.f32.mrf.mxu0 }
  0xc0   : > { %v478_v16 = vpop.f32.mrf.mxu1  ;;  %1017 = vst.msk [vmem:[#allocation2 + $0x122] sm:$0xff] %vm638_vm1, %v5136_v2  ;;  %v500_v18 = vadd.f32 %v4997_v35, %v499_v8  ;;  %v523_v20 = vpop.f32.mrf.mxu3  ;;  %v455_v22 = vadd.f32 %v4997_v35, %v454_v15 }
  0xc1   : > { %v5144_v17 = vld [vmem:[#allocation2 + $0x60] sm:$0xff]  ;;  %7434 = vst [vmem:[#allocation16_spill] sm:$0xff] %v5149_v19  ;;  %v479_v27 = vadd.f32 %v4997_v35, %v478_v16  ;;  %v524_v31 = vadd.f32 %v4997_v35, %v523_v20 }
  0xc2   : > { %v1416_v21 = vmax.f32 %v1319_v14, %v5144_v17  ;;  %1002 = vst.msk [vmem:[#allocation2 + $0x6a] sm:$0xff] %vm638_vm1, %v569_v3  ;;  %v553_v32 = vmul.f32 0.1, %v500_v18  ;;  %v538_v36 = vmul.f32 0.1, %v455_v22  ;;  %v1129_v14 = vmax.f32 %v5109_v44, %v5124_v56 }
  0xc3   : > { %1010 = vst.msk [vmem:[#allocation2 + $0xca] sm:$0xff] %vm638_vm1, %v5138_v5  ;;  %v546_v40 = vmul.f32 0.1, %v479_v27  ;;  %v561_v46 = vmul.f32 0.1, %v524_v31 }
  0xc4   : > { %1464 = vst.msk [vmem:[#allocation3] sm:$0xff] %vm638_vm1, %v1416_v21  ;;  %v5170_v39 = vmax.f32 %v500_v18, %v553_v32  ;;  %v570_v43 = vmax.f32 %v455_v22, %v538_v36  ;;  %v1132_v18 = vmax.f32 %v5124_v56, %v5132_v61  ;;  %v5210_v56 = vld [vmem:[#allocation2 + $0xf0] sm:$0xff]  ;;  %v1034_v32 = vld [vmem:[#allocation2 + $0x28] sm:$0xf]  ;;  %v1135_v36 = vmax.f32 %v5132_v61, %v5144_v17  ;;  %v1297_v5 = vld [vmem:[#allocation2 + $0x118] sm:$0xf] }
  0xc5   : > { %1025 = vst.msk [vmem:[#allocation2 + $0x182] sm:$0xff] %vm638_vm1, %v5149_v19  ;;  %v5186_v3 = vmax.f32 %v479_v27, %v546_v40  ;;  %v5188_v8 = vmax.f32 %v524_v31, %v561_v46  ;;  %v1225_v27 = vmax.f32 %v1129_v14, %v5132_v61  ;;  %v1083_v40 = vld [vmem:[#allocation2 + $0x40] sm:$0xf] }
  0xc6   : > { %7436 = vst [vmem:[#allocation18_spill] sm:$0xff] %v5170_v39  ;;  %4618 = vmatmul.msk.f32.gmra.mxu1 %vm638_vm1, %v570_v43  ;;  %v1228_v37 = vmax.f32 %v1132_v18, %v5144_v17  ;;  %v5229_v61 = vld [vmem:[#allocation2 + $0xc0] sm:$0xff]  ;;  %v1131_v14 = vmax.f32 %v1034_v32, %v1083_v40 }
  0xc7   : > { %v502_v42 = vpop.f32.mrf.mxu2  ;;  %v457_v47 = vpop.f32.mrf.mxu0  ;;  %1018 = vst.msk [vmem:[#allocation2 + $0x12a] sm:$0xff] %vm638_vm1, %v5170_v39  ;;  %v1147_v18 = vmax.f32 %v5212_v34, %v5229_v61 }
  0xc8   : > { %v481_v49 = vpop.f32.mrf.mxu1  ;;  %v503_v57 = vadd.f32 %v4997_v35, %v502_v42  ;;  %v458_v60 = vadd.f32 %v4997_v35, %v457_v47  ;;  %1003 = vst.msk [vmem:[#allocation2 + $0x7a] sm:$0xff] %vm638_vm1, %v570_v43  ;;  %v526_v4 = vpop.f32.mrf.mxu3  ;;  %v1322_v42 = vmax.f32 %v1225_v27, %v5144_v17  ;;  %v5225_v47 = vld [vmem:[#allocation2 + $0x108] sm:$0xff] }
  0xc9   : > { %v5173_v55 = vld [vmem:[#allocation2 + $0x68] sm:$0xff]  ;;  %v1370_v59 = vld [vmem:[#allocation2 + $0x70] sm:$0xf]  ;;  %v482_v62 = vadd.f32 %v4997_v35, %v481_v49  ;;  %7437 = vst [vmem:[#allocation19_spill] sm:$0xff] %v5186_v3  ;;  %v527_v9 = vadd.f32 %v4997_v35, %v526_v4  ;;  %v5227_v49 = vld [vmem:[#allocation2 + $0x58] sm:$0xf] }
  0xca   : > { %v1417_v63 = vmax.f32 %v1320_v50, %v5173_v55  ;;  %v1418_v0 = vmax.f32 %v1321_v52, %v1370_v59  ;;  %7438 = vst [vmem:[#allocation20_spill] sm:$0xff] %v5188_v8  ;;  %v554_v13 = vmul.f32 0.1, %v503_v57  ;;  %v539_v15 = vmul.f32 0.1, %v458_v60 }
  0xcb   : > { %v547_v16 = vmul.f32 0.1, %v482_v62  ;;  %1011 = vst.msk [vmem:[#allocation2 + $0xda] sm:$0xff] %vm638_vm1, %v5186_v3  ;;  %v562_v22 = vmul.f32 0.1, %v527_v9  ;;  %v1156_v59 = vmax.f32 %v5210_v56, %v5225_v47 }
  0xcc   : > { %1466 = vst.msk [vmem:[#allocation3 + $0x10] sm:$0xf] %vm951_vm4, %v1418_v0  ;;  %v5200_v20 = vmax.f32 %v503_v57, %v554_v13  ;;  %v571_v44 = vmax.f32 %v458_v60, %v539_v15  ;;  %v1130_v0 = vmax.f32 %v5140_v11, %v5160_v28  ;;  %v1065_v11 = vld [vmem:[#allocation2 + $0x120] sm:$0xff]  ;;  %v1182_v15 = vld [vmem:[#allocation2 + $0x70] sm:$0xf] }
  0xcd   : > { %1465 = vst.msk [vmem:[#allocation3 + $0x8] sm:$0xff] %vm638_vm1, %v1417_v63  ;;  %v5207_v30 = vmax.f32 %v482_v62, %v547_v16  ;;  %v5217_v38 = vmax.f32 %v527_v9, %v562_v22  ;;  %v5245_v63 = vld [vmem:[#allocation2 + $0x40] sm:$0xf]  ;;  %v1179_v16 = vld [vmem:[#allocation2 + $0x58] sm:$0xf]  ;;  %v1159_v27 = vmax.f32 %v5225_v47, %v1065_v11  ;;  %v1252_v40 = vmax.f32 %v1156_v59, %v1065_v11 }
  0xce   : > { %7439 = vst [vmem:[#allocation21_spill] sm:$0xff] %v5200_v20  ;;  %4619 = vmatmul.msk.f32.gmra.mxu1 %vm638_vm1, %v571_v44  ;;  %v5322_v29 = vld [vmem:[#allocation2 + $0x180] sm:$0xff]  ;;  %v5334_v23 = vld [vmem:[#allocation2 + $0xd0] sm:$0xf] }
  0xcf   : > { %v505_v21 = vpop.f32.mrf.mxu2  ;;  %1026 = vst.msk [vmem:[#allocation2 + $0x18a] sm:$0xff] %vm638_vm1, %v5188_v8  ;;  %v5220_v43 = vld [vmem:[#allocation2 + $0x78] sm:$0xff]  ;;  %v1194_v53 = vld [vmem:[#allocation2 + $0xd0] sm:$0xf] }
  0xd0   : > { %7440 = vst [vmem:[#allocation22_spill] sm:$0xff] %v5207_v30  ;;  %v506_v31 = vadd.f32 %v4997_v35, %v505_v21  ;;  %v1141_v50 = vmax.f32 %v5220_v43, %v5202_v25  ;;  %v1231_v52 = vmax.f32 %v1135_v36, %v5220_v43  ;;  %v1325_v57 = vmax.f32 %v1228_v37, %v5220_v43  ;;  %v5265_v36 = vld [vmem:[#allocation2 + $0xa0] sm:$0xf]  ;;  %v5267_v37 = vld [vmem:[#allocation2 + $0x150] sm:$0xff] }
  0xd1   : > { %7441 = vst [vmem:[#allocation23_spill] sm:$0xff] %v5217_v38  ;;  %v1419_v60 = vmax.f32 %v1322_v42, %v5220_v43  ;;  %v1240_v21 = vmax.f32 %v1144_v58, %v5229_v61  ;;  %v5275_v58 = vmax.f32 %v1131_v14, %v1179_v16  ;;  %v1288_v3 = vld [vmem:[#allocation2 + $0xd0] sm:$0xf] }
  0xd2   : > { %1019 = vst.msk [vmem:[#allocation2 + $0x13a] sm:$0xff] %vm638_vm1, %v5200_v20  ;;  %v555_v46 = vmul.f32 0.1, %v506_v31  ;;  %v1237_v4 = vmax.f32 %v1141_v50, %v5212_v34  ;;  %v1328_v9 = vmax.f32 %v1231_v52, %v5202_v25  ;;  %v1422_v13 = vmax.f32 %v1325_v57, %v5202_v25  ;;  %v1056_v22 = vld [vmem:[#allocation2 + $0xd8] sm:$0xff]  ;;  %v529_v52 = vpop.f32.mrf.mxu3  ;;  %v1206_v45 = vld [vmem:[#allocation2 + $0x130] sm:$0xf] }
  0xd3   : > { %7442 = vst [vmem:[#allocation24_spill] sm:$0xff] %v5229_v61  ;;  %v1153_v32 = vmax.f32 %v1056_v22, %v5210_v56  ;;  %v1243_v42 = vmax.f32 %v1147_v18, %v1056_v22  ;;  %v1337_v50 = vmax.f32 %v1240_v21, %v1056_v22  ;;  %v5273_v57 = vmax.f32 %v1130_v0, %v5166_v33  ;;  %v5287_v18 = vld [vmem:[#allocation2 + $0x168] sm:$0xff] }
  0xd4   : > { %1004 = vst.msk [vmem:[#allocation2 + $0x82] sm:$0xff] %vm638_vm1, %v571_v44  ;;  %v5243_v62 = vmax.f32 %v506_v31, %v555_v46  ;;  %v1425_v44 = vmax.f32 %v1328_v9, %v5212_v34  ;;  %v1150_v31 = vmax.f32 %v5229_v61, %v1056_v22  ;;  %v1334_v46 = vmax.f32 %v1237_v4, %v5229_v61  ;;  %v4678_v4 = vld [vmem:[%s7395_s3 + $0x8] sm:$0xf] }
  0xd5   : > { %1012 = vst.msk [vmem:[#allocation2 + $0xe2] sm:$0xff] %vm638_vm1, %v5207_v30  ;;  %v1249_v59 = vmax.f32 %v1153_v32, %v5225_v47  ;;  %v1340_v0 = vmax.f32 %v1243_v42, %v5210_v56  ;;  %v1434_v16 = vmax.f32 %v1337_v50, %v5210_v56  ;;  %4679 = vmatpush.msk.msrb.mxu3 %vm735_vm3, %v4678_v4  ;;  %v1089_v32 = vld [vmem:[#allocation2 + $0x70] sm:$0xf]  ;;  %v5306_v42 = vld [vmem:[#allocation2 + $0x100] sm:$0xf] }
  0xd6   : > { %7443 = vst [vmem:[#allocation25_spill] sm:$0xff] %v5243_v62  ;;  %v1246_v9 = vmax.f32 %v1150_v31, %v5210_v56  ;;  %v1431_v14 = vmax.f32 %v1334_v46, %v1056_v22  ;;  %v5293_v31 = vld [vmem:[#allocation2 + $0x110] sm:$0xff]  ;;  %v5298_v48 = vadd.f32 %v4997_v35, %v529_v52  ;;  %4620 = vmatmul.msk.f32.gmra.mxu1 %vm638_vm1, %v5034_v51  ;;  %v5302_v56 = vld [vmem:[#allocation2 + $0x98] sm:$0xff]  ;;  %v5304_v22 = vld [vmem:[#allocation2 + $0xa0] sm:$0xf] }
  0xd7   : > { %1027 = vst.msk [vmem:[#allocation2 + $0x19a] sm:$0xff] %vm638_vm1, %v5217_v38  ;;  %v1346_v19 = vmax.f32 %v1249_v59, %v1065_v11  ;;  %v5310_v50 = vld [vmem:[#allocation2 + $0x118] sm:$0xf]  ;;  %v5320_v4 = vld [vmem:[#allocation2 + $0x70] sm:$0xf]  ;;  %v7444_v59 = vmax.f32 %v5245_v63, %v5227_v49  ;;  %v1323_v39 = vmax.f32 %v5273_v57, %v5173_v55 }
  0xd8   : > { %1467 = vst.msk [vmem:[#allocation3 + $0x18] sm:$0xff] %vm638_vm1, %v1419_v60  ;;  %v5277_v60 = vld [vmem:[#allocation2 + $0xb8] sm:$0xf]  ;;  %v1343_v38 = vmax.f32 %v1246_v9, %v5225_v47  ;;  %v1158_v24 = vmax.f32 %v5306_v42, %v5310_v50  ;;  %v1324_v6 = vmax.f32 %v5275_v58, %v5320_v4 }
  0xd9   : > { %1470 = vst.msk [vmem:[#allocation3 + $0x30] sm:$0xff] %vm638_vm1, %v1422_v13  ;;  %v5282_v13 = vld [vmem:[#allocation2 + $0x138] sm:$0xff]  ;;  %v1230_v7 = vmax.f32 %v7444_v59, %v1182_v15  ;;  %v5351_v59 = vld [vmem:[#allocation2 + $0xb0] sm:$0xff] }
  0xda   : > { %1020 = vst.msk [vmem:[#allocation2 + $0x142] sm:$0xff] %vm638_vm1, %v5243_v62  ;;  %v1162_v21 = vmax.f32 %v1065_v11, %v5282_v13  ;;  %v1255_v8 = vmax.f32 %v1159_v27, %v5282_v13  ;;  %v1437_v27 = vmax.f32 %v1340_v0, %v5225_v47  ;;  %v1349_v52 = vmax.f32 %v1252_v40, %v5282_v13  ;;  %v5329_v40 = vld [vmem:[#allocation2 + $0xb8] sm:$0xf] }
  0xdb   : > { %1473 = vst.msk [vmem:[#allocation3 + $0x48] sm:$0xff] %vm638_vm1, %v1425_v44  ;;  %v1040_v44 = vld [vmem:[#allocation2 + $0x58] sm:$0xf]  ;;  %v5316_v51 = vld [vmem:[#allocation2 + $0x80] sm:$0xff]  ;;  %v1046_v9 = vld [vmem:[#allocation2 + $0x88] sm:$0xf]  ;;  %v1440_v46 = vmax.f32 %v1343_v38, %v1065_v11  ;;  %v1443_v0 = vmax.f32 %v1346_v19, %v5282_v13 }
  0xdc   : > { %1479 = vst.msk [vmem:[#allocation3 + $0x78] sm:$0xff] %vm638_vm1, %v1431_v14  ;;  %v1258_v35 = vmax.f32 %v1162_v21, %v5267_v37  ;;  %v1352_v47 = vmax.f32 %v1255_v8, %v5267_v37  ;;  %v1185_v14 = vld [vmem:[#allocation2 + $0x88] sm:$0xf]  ;;  %v5327_v21 = vld [vmem:[#allocation2 + $0xf8] sm:$0xff]  ;;  %v1137_v12 = vmax.f32 %v1040_v44, %v1089_v32  ;;  %v1446_v8 = vmax.f32 %v1349_v52, %v5267_v37  ;;  %v1282_v19 = vld [vmem:[#allocation2 + $0xa0] sm:$0xf] }
  0xdd   : > { %1482 = vst.msk [vmem:[#allocation3 + $0x90] sm:$0xff] %vm638_vm1, %v1434_v16  ;;  %v1279_v11 = vld [vmem:[#allocation2 + $0x88] sm:$0xf]  ;;  %v5339_v16 = vld [vmem:[#allocation2 + $0x100] sm:$0xf]  ;;  %v5341_v62 = vld [vmem:[#allocation2 + $0x158] sm:$0xff]  ;;  %v1142_v63 = vmax.f32 %v5316_v51, %v5302_v56  ;;  %v1143_v15 = vmax.f32 %v1046_v9, %v5304_v22  ;;  %v1157_v20 = vmax.f32 %v5327_v21, %v5293_v31  ;;  %v1420_v58 = vmax.f32 %v1323_v39, %v5316_v51 }
  0xde   : > { %1485 = vst.msk [vmem:[#allocation3 + $0xa8] sm:$0xff] %vm638_vm1, %v1437_v27  ;;  %v1355_v38 = vmax.f32 %v1258_v35, %v5287_v18  ;;  %v5343_v44 = vld [vmem:[#allocation2 + $0x170] sm:$0xff]  ;;  %v1449_v49 = vmax.f32 %v1352_v47, %v5287_v18  ;;  %v563_v27 = vmul.f32 0.1, %v5298_v48  ;;  %v1376_v35 = vld [vmem:[#allocation2 + $0xa0] sm:$0xf]  ;;  %v1233_v47 = vmax.f32 %v1137_v12, %v1185_v14  ;;  %4621 = vmatmul.msk.f32.gmra.mxu1 %vm638_vm1, %v5057_v1 }
  0xdf   : > { %v1101_v32 = vld [vmem:[#allocation2 + $0xd0] sm:$0xf]  ;;  %1488 = vst.msk [vmem:[#allocation3 + $0xc0] sm:$0xff] %vm638_vm1, %v1440_v46  ;;  %v1200_v52 = vld [vmem:[#allocation2 + $0x100] sm:$0xf]  ;;  %v1238_v57 = vmax.f32 %v1142_v63, %v5351_v59  ;;  %v1239_v42 = vmax.f32 %v1143_v15, %v1191_v54  ;;  %v5384_v15 = vld [vmem:[#allocation2 + $0xc8] sm:$0xff] }
  0xe0   : > { %7445 = vst [vmem:[#allocation26_spill] sm:$0xff] %v5351_v59  ;;  %v1452_v46 = vmax.f32 %v1355_v38, %v5322_v29  ;;  %v1373_v2 = vld [vmem:[#allocation2 + $0x88] sm:$0xf]  ;;  %v1379_v22 = vld [vmem:[#allocation2 + $0xb8] sm:$0xf]  ;;  %v1327_v38 = vmax.f32 %v1230_v7, %v1279_v11  ;;  %v5367_v30 = vld [vmem:[#allocation2 + $0xe0] sm:$0xff]  ;;  %v1330_v50 = vmax.f32 %v1233_v47, %v1282_v19  ;;  %v1149_v7 = vmax.f32 %v5329_v40, %v1101_v32 }
  0xe1   : > { %1491 = vst.msk [vmem:[#allocation3 + $0xd8] sm:$0xff] %vm638_vm1, %v1443_v0  ;;  %v1104_v41 = vld [vmem:[#allocation2 + $0xe8] sm:$0xf]  ;;  %v5359_v9 = vld [vmem:[#allocation2 + $0x118] sm:$0xf]  ;;  %v1421_v61 = vmax.f32 %v1324_v6, %v1373_v2  ;;  %v1154_v40 = vmax.f32 %v5367_v30, %v5327_v21  ;;  %v5391_v2 = vmax.f32 %v5298_v48, %v563_v27  ;;  %v5404_v48 = vmax.f32 %v1158_v24, %v1206_v45 }
  0xe2   : > { %1494 = vst.msk [vmem:[#allocation3 + $0xf0] sm:$0xff] %vm638_vm1, %v1446_v8  ;;  %v1058_v12 = vld [vmem:[#allocation2 + $0xe8] sm:$0xf]  ;;  %v5369_v0 = vld [vmem:[#allocation2 + $0x100] sm:$0xf]  ;;  %v1424_v14 = vmax.f32 %v1327_v38, %v1376_v35  ;;  %v1152_v59 = vmax.f32 %v5334_v23, %v1104_v41  ;;  %v1427_v47 = vmax.f32 %v1330_v50, %v1379_v22  ;;  %v7446_v23 = vmax.f32 %v5265_v36, %v5277_v60 }
  0xe3   : > { %1497 = vst.msk [vmem:[#allocation3 + $0x108] sm:$0xff] %vm638_vm1, %v1449_v49  ;;  %v1197_v4 = vld [vmem:[#allocation2 + $0xe8] sm:$0xf]  ;;  %v1203_v8 = vld [vmem:[#allocation2 + $0x118] sm:$0xf]  ;;  %v1155_v32 = vmax.f32 %v1058_v12, %v5339_v16  ;;  %v1335_v50 = vmax.f32 %v1238_v57, %v5384_v15  ;;  %v1336_v36 = vmax.f32 %v1239_v42, %v1288_v3  ;;  %v1250_v60 = vmax.f32 %v1154_v40, %v5293_v31 }
  0xe4   : > { %v5376_v11 = vld [vmem:[#allocation2 + $0x128] sm:$0xff]  ;;  %v1113_v63 = vld [vmem:[#allocation2 + $0x130] sm:$0xf]  ;;  %1500 = vst.msk [vmem:[#allocation3 + $0x120] sm:$0xff] %vm638_vm1, %v1452_v46  ;;  %v1388_v49 = vld [vmem:[#allocation2 + $0x100] sm:$0xf]  ;;  %v1242_v35 = vmax.f32 %v7446_v23, %v1194_v53  ;;  %v1245_v22 = vmax.f32 %v1149_v7, %v1197_v4  ;;  %v1248_v38 = vmax.f32 %v1152_v59, %v1200_v52 }
  0xe5   : > { %v5380_v54 = vld [vmem:[#allocation2 + $0x160] sm:$0xf]  ;;  %v1391_v19 = vld [vmem:[#allocation2 + $0x118] sm:$0xf]  ;;  %1468 = vst.msk [vmem:[#allocation3 + $0x20] sm:$0xff] %vm638_vm1, %v1420_v58  ;;  %v1161_v16 = vmax.f32 %v5359_v9, %v1113_v63  ;;  %v5402_v12 = vmax.f32 %v1157_v20, %v5376_v11  ;;  %v1251_v45 = vmax.f32 %v1155_v32, %v1203_v8  ;;  %v1171_v32 = vmax.f32 %v5287_v18, %v5322_v29 }
  0xe6   : > { %v5382_v39 = vld [vmem:[#allocation2 + $0x178] sm:$0xf]  ;;  %v1291_v6 = vld [vmem:[#allocation2 + $0xe8] sm:$0xf]  ;;  %v5393_v41 = vld [vmem:[#allocation2 + $0x160] sm:$0xf]  ;;  %v1342_v59 = vmax.f32 %v1245_v22, %v5369_v0  ;;  %v1345_v4 = vmax.f32 %v1248_v38, %v1297_v5  ;;  %v1347_v22 = vmax.f32 %v1250_v60, %v5376_v11  ;;  %4622 = vmatmul.msk.f32.gmra.mxu1 %vm638_vm1, %v5071_v10 }
  0xe7   : > { %v1067_v46 = vld [vmem:[#allocation2 + $0x130] sm:$0xf]  ;;  %1469 = vst.msk [vmem:[#allocation3 + $0x28] sm:$0xf] %vm951_vm4, %v1421_v61  ;;  %v1385_v58 = vld [vmem:[#allocation2 + $0xe8] sm:$0xf]  ;;  %v1165_v61 = vmax.f32 %v5282_v13, %v5267_v37  ;;  %v1339_v52 = vmax.f32 %v1242_v35, %v1291_v6  ;;  %v1170_v42 = vmax.f32 %v5380_v54, %v5382_v39 }
  0xe8   : > { %v1394_v27 = vld [vmem:[#allocation2 + $0x130] sm:$0xf]  ;;  %1472 = vst.msk [vmem:[#allocation3 + $0x40] sm:$0xf] %vm951_vm4, %v1424_v14  ;;  %v1116_v53 = vld [vmem:[#allocation2 + $0x148] sm:$0xf]  ;;  %v1432_v14 = vmax.f32 %v1335_v50, %v5367_v30  ;;  %v1433_v3 = vmax.f32 %v1336_v36, %v1385_v58  ;;  %v7447_v50 = vmax.f32 %v5267_v37, %v5287_v18 }
  0xe9   : > { %1475 = vst.msk [vmem:[#allocation3 + $0x58] sm:$0xf] %vm951_vm4, %v1427_v47  ;;  %v1070_v9 = vld [vmem:[#allocation2 + $0x148] sm:$0xf]  ;;  %v1212_v57 = vld [vmem:[#allocation2 + $0x160] sm:$0xf]  ;;  %v1436_v63 = vmax.f32 %v1339_v52, %v1388_v49  ;;  %v1439_v47 = vmax.f32 %v1342_v59, %v1391_v19  ;;  %v1164_v40 = vmax.f32 %v1067_v46, %v1116_v53  ;;  %v1442_v23 = vmax.f32 %v1345_v4, %v1394_v27 }
  0xea   : > { %v1209_v20 = vld [vmem:[#allocation2 + $0x148] sm:$0xf]  ;;  %v1306_v24 = vld [vmem:[#allocation2 + $0x160] sm:$0xf]  ;;  %1028 = vst.msk [vmem:[#allocation2 + $0x1a2] sm:$0xff] %vm638_vm1, %v5391_v2  ;;  %v1167_v35 = vmax.f32 %v1070_v9, %v5393_v41  ;;  %v1261_v49 = vmax.f32 %v1165_v61, %v5287_v18  ;;  %v1264_v58 = vmax.f32 %v7447_v50, %v5322_v29  ;;  %v1219_v36 = vld [vmem:[#allocation2 + $0x198] sm:$0xff] }
  0xeb   : > { %v1400_v13 = vld [vmem:[#allocation2 + $0x160] sm:$0xf]  ;;  %v1300_v7 = vld [vmem:[#allocation2 + $0x130] sm:$0xf]  ;;  %v1303_v6 = vld [vmem:[#allocation2 + $0x148] sm:$0xf]  ;;  %v1257_v54 = vmax.f32 %v1161_v16, %v1209_v20  ;;  %v1260_v1 = vmax.f32 %v1164_v40, %v1212_v57 }
  0xec   : > { %v1069_v0 = vld [vmem:[#allocation2 + $0x140] sm:$0xff]  ;;  %v1215_v5 = vld [vmem:[#allocation2 + $0x178] sm:$0xf]  ;;  %1481 = vst.msk [vmem:[#allocation3 + $0x88] sm:$0xf] %vm951_vm4, %v1433_v3  ;;  %v1348_v41 = vmax.f32 %v1251_v45, %v1300_v7  ;;  %v1351_v27 = vmax.f32 %v5404_v48, %v1303_v6  ;;  %v5437_v61 = vld [vmem:[#allocation2 + $0x188] sm:$0xff]  ;;  %v1267_v3 = vmax.f32 %v1171_v32, %v1219_v36  ;;  %v1358_v7 = vmax.f32 %v1261_v49, %v5322_v29 }
  0xed   : > { %v1309_v8 = vld [vmem:[#allocation2 + $0x178] sm:$0xf]  ;;  %v1218_v19 = vld [vmem:[#allocation2 + $0x190] sm:$0xf]  ;;  %1480 = vst.msk [vmem:[#allocation3 + $0x80] sm:$0xff] %vm638_vm1, %v1432_v14  ;;  %v1166_v46 = vmax.f32 %v1069_v0, %v5341_v62  ;;  %v1350_v16 = vmax.f32 %v5402_v12, %v1069_v0  ;;  %v1263_v60 = vmax.f32 %v1167_v35, %v1215_v5  ;;  %v1354_v52 = vmax.f32 %v1257_v54, %v1306_v24  ;;  %v1544_v59 = vld [vmem:[#allocation3 + $0x1] sm:$0xff] }
  0xee   : > { %v1403_v39 = vld [vmem:[#allocation2 + $0x178] sm:$0xf]  ;;  %v1397_v38 = vld [vmem:[#allocation2 + $0x148] sm:$0xf]  ;;  %1484 = vst.msk [vmem:[#allocation3 + $0xa0] sm:$0xf] %vm951_vm4, %v1436_v63  ;;  %v1357_v37 = vmax.f32 %v1260_v1, %v1309_v8  ;;  %v1266_v9 = vmax.f32 %v1170_v42, %v1218_v19  ;;  %v1444_v12 = vmax.f32 %v1347_v22, %v1069_v0  ;;  %v1448_v45 = vmax.f32 %v1351_v27, %v1400_v13 }
  0xef   : > { %v4712_v53 = vld [vmem:[%s7395_s3 + $0xc] sm:$0xf]  ;;  %1487 = vst.msk [vmem:[#allocation3 + $0xb8] sm:$0xf] %vm951_vm4, %v1439_v47  ;;  %v1316_v18 = vld [vmem:[#allocation2 + $0x1b0] sm:$0xff]  ;;  %v1445_v48 = vmax.f32 %v1348_v41, %v1397_v38  ;;  %v1262_v4 = vmax.f32 %v1166_v46, %v5343_v44  ;;  %v1447_v14 = vmax.f32 %v1350_v16, %v5341_v62  ;;  %v1512_v24 = vld [vmem:[#allocation3] sm:$0xff]  ;;  %v7448_v42 = vmax.f32 %v5341_v62, %v5343_v44 }
  0xf0   : > { %v1312_v20 = vld [vmem:[#allocation2 + $0x190] sm:$0xf]  ;;  %1490 = vst.msk [vmem:[#allocation3 + $0xd0] sm:$0xf] %vm951_vm4, %v1442_v23  ;;  %4713 = vmatpush.msk.msrb.mxu0 %vm735_vm3, %v4712_v53  ;;  %v1451_v40 = vmax.f32 %v1354_v52, %v1403_v39  ;;  %v1361_v13 = vmax.f32 %v1264_v58, %v1219_v36  ;;  %v1413_v0 = vld [vmem:[#allocation2 + $0x1c8] sm:$0xff]  ;;  %v1576_v6 = vmax.f32 %v1512_v24, %v1544_v59  ;;  %v1546_v49 = vld [vmem:[#allocation3 + $0x19] sm:$0xff] }
  0xf1   : > { %v1406_v57 = vld [vmem:[#allocation2 + $0x190] sm:$0xf]  ;;  %v1315_v63 = vld [vmem:[#allocation2 + $0x1a8] sm:$0xf]  ;;  %v1265_v47 = vmax.f32 %v7448_v42, %v5437_v61  ;;  %1493 = vst.msk [vmem:[#allocation3 + $0xe8] sm:$0xf] %vm951_vm4, %v1445_v48  ;;  %v1133_v8 = vmax.f32 %v5160_v28, %v5166_v33  ;;  %v1364_v32 = vmax.f32 %v1267_v3, %v1316_v18  ;;  %v1360_v35 = vmax.f32 %v1263_v60, %v1312_v20 }
  0xf2   : > { %v1513_v5 = vld [vmem:[#allocation3 + $0x8] sm:$0xff]  ;;  %v1454_v29 = vmax.f32 %v1357_v37, %v1406_v57  ;;  %1496 = vst.msk [vmem:[#allocation3 + $0x100] sm:$0xf] %vm951_vm4, %v1448_v45  ;;  %v1220_v23 = vld [vmem:[#allocation2 + $0x1a0] sm:$0xff]  ;;  %v1136_v62 = vmax.f32 %v5166_v33, %v5173_v55  ;;  %v1455_v44 = vmax.f32 %v1358_v7, %v1219_v36  ;;  %v1363_v39 = vmax.f32 %v1266_v9, %v1315_v63  ;;  %v1514_v53 = vld [vmem:[#allocation3 + $0x18] sm:$0xff] }
  0xf3   : > { %v1545_v54 = vld [vmem:[#allocation3 + $0x9] sm:$0xff]  ;;  %1492 = vst.msk [vmem:[#allocation3 + $0xe0] sm:$0xff] %vm638_vm1, %v1444_v12  ;;  %v1515_v46 = vld [vmem:[#allocation3 + $0x20] sm:$0xff]  ;;  %v1229_v28 = vmax.f32 %v1133_v8, %v5173_v55  ;;  %v1138_v22 = vmax.f32 %v5144_v17, %v5220_v43  ;;  %v1458_v38 = vmax.f32 %v1361_v13, %v1316_v18  ;;  %v1359_v50 = vmax.f32 %v1262_v4, %v5437_v61  ;;  %v1317_v60 = vld [vmem:[#allocation2 + $0x1b8] sm:$0xff] }
  0xf4   : > { %v1409_v19 = vld [vmem:[#allocation2 + $0x1a8] sm:$0xf]  ;;  %1495 = vst.msk [vmem:[#allocation3 + $0xf8] sm:$0xff] %vm638_vm1, %v1447_v14  ;;  %v1412_v58 = vld [vmem:[#allocation2 + $0x1c0] sm:$0xf]  ;;  %v1461_v33 = vmax.f32 %v1364_v32, %v1413_v0  ;;  %v1362_v16 = vmax.f32 %v1265_v47, %v1220_v23  ;;  %v1577_v36 = vmax.f32 %v1513_v5, %v1545_v54  ;;  %v1578_v43 = vmax.f32 %v1514_v53, %v1546_v49  ;;  %v1737_v13 = vld [vmem:[#allocation3 + $0xc] sm:$0xff] }
  0xf5   : > { %v1547_v1 = vld [vmem:[#allocation3 + $0x21] sm:$0xff]  ;;  %1499 = vst.msk [vmem:[#allocation3 + $0x118] sm:$0xf] %vm951_vm4, %v1451_v40  ;;  %v1457_v52 = vmax.f32 %v1360_v35, %v1409_v19  ;;  %v1609_v17 = vld [vmem:[#allocation3 + $0xa] sm:$0xff]  ;;  %v1232_v18 = vmax.f32 %v1136_v62, %v5316_v51  ;;  %v1460_v59 = vmax.f32 %v1363_v39, %v1412_v58  ;;  %v1234_v48 = vmax.f32 %v1138_v22, %v5202_v25 }
  0xf6   : > { %v1608_v41 = vld [vmem:[#allocation3 + $0x2] sm:$0xff]  ;;  %1502 = vst.msk [vmem:[#allocation3 + $0x130] sm:$0xf] %vm951_vm4, %v1454_v29  ;;  %v1579_v61 = vmax.f32 %v1515_v46, %v1547_v1  ;;  %v1641_v20 = vmax.f32 %v1577_v36, %v1609_v17  ;;  %v1610_v57 = vld [vmem:[#allocation3 + $0x1a] sm:$0xff]  ;;  %v1456_v45 = vmax.f32 %v1359_v50, %v1220_v23  ;;  %v1673_v14 = vld [vmem:[#allocation3 + $0xb] sm:$0xff]  ;;  %v1459_v7 = vmax.f32 %v1362_v16, %v1317_v60 }
  0xf7   : > { %v1640_v27 = vmax.f32 %v1576_v6, %v1608_v41  ;;  %v1672_v37 = vld [vmem:[#allocation3 + $0x3] sm:$0xff]  ;;  %1503 = vst.msk [vmem:[#allocation3 + $0x138] sm:$0xff] %vm638_vm1, %v1455_v44  ;;  %v1642_v3 = vmax.f32 %v1578_v43, %v1610_v57  ;;  %v1674_v42 = vld [vmem:[#allocation3 + $0x1b] sm:$0xff]  ;;  %v1326_v40 = vmax.f32 %v1229_v28, %v5316_v51  ;;  %v1329_v6 = vmax.f32 %v1232_v18, %v5302_v56  ;;  %v1043_v19 = vld [vmem:[#allocation2 + $0x70] sm:$0xf] }
  0xf8   : > { %v1611_v12 = vld [vmem:[#allocation3 + $0x22] sm:$0xff]  ;;  %1506 = vst.msk [vmem:[#allocation3 + $0x150] sm:$0xff] %vm638_vm1, %v1458_v38  ;;  %v1705_v24 = vmax.f32 %v1641_v20, %v1673_v14  ;;  %v1331_v29 = vmax.f32 %v1234_v48, %v5212_v34  ;;  %v1139_v32 = vmax.f32 %v5173_v55, %v5316_v51  ;;  %4623 = vmatmul.msk.f32.gmra.mxu1 %vm638_vm1, %v5091_v26  ;;  %v7449_v34 = vld [vmem:[#allocation26_spill] sm:$0xff]  ;;  %v7451_v50 = vld [vmem:[#allocation11_spill] sm:$0xff] }
  0xf9   : > { %v1704_v9 = vmax.f32 %v1640_v27, %v1672_v37  ;;  %v1736_v4 = vld [vmem:[#allocation3 + $0x4] sm:$0xff]  ;;  %v1643_v10 = vmax.f32 %v1579_v61, %v1611_v12  ;;  %1509 = vst.msk [vmem:[#allocation3 + $0x168] sm:$0xff] %vm638_vm1, %v1461_v33  ;;  %v1706_v25 = vmax.f32 %v1642_v3, %v1674_v42  ;;  %v1738_v8 = vld [vmem:[#allocation3 + $0x1c] sm:$0xff]  ;;  %v1423_v49 = vmax.f32 %v1326_v40, %v5302_v56  ;;  %v1516_v16 = vld [vmem:[#allocation3 + $0x30] sm:$0xff] }
  0xfa   : > { %v1675_v47 = vld [vmem:[#allocation3 + $0x23] sm:$0xff]  ;;  %1505 = vst.msk [vmem:[#allocation3 + $0x148] sm:$0xf] %vm951_vm4, %v1457_v52  ;;  %v1769_v5 = vmax.f32 %v1705_v24, %v1737_v13  ;;  %v1426_v62 = vmax.f32 %v1329_v6, %v7449_v34  ;;  %v1235_v55 = vmax.f32 %v1139_v32, %v5302_v56  ;;  %v1145_v26 = vmax.f32 %v5302_v56, %v7449_v34  ;;  %v1285_v37 = vld [vmem:[#allocation2 + $0xb8] sm:$0xf] }
  0xfb   : > { %v1768_v63 = vmax.f32 %v1704_v9, %v1736_v4  ;;  %v1707_v0 = vmax.f32 %v1643_v10, %v1675_v47  ;;  %1508 = vst.msk [vmem:[#allocation3 + $0x160] sm:$0xf] %vm951_vm4, %v1460_v59  ;;  %v1770_v23 = vmax.f32 %v1706_v25, %v1738_v8  ;;  %v1739_v35 = vld [vmem:[#allocation3 + $0x24] sm:$0xff]  ;;  %v1148_v46 = vmax.f32 %v7449_v34, %v5384_v15  ;;  %v1188_v41 = vld [vmem:[#allocation2 + $0xa0] sm:$0xf]  ;;  %v5514_v10 = vld [vmem:[#allocation2 + $0x18] sm:$0xff] }
  0xfc   : > { %1504 = vst.msk [vmem:[#allocation3 + $0x140] sm:$0xff] %vm638_vm1, %v1456_v45  ;;  %v7450_v51 = vld [vmem:[#allocation24_spill] sm:$0xff]  ;;  %v1092_v39 = vld [vmem:[#allocation2 + $0x88] sm:$0xf]  ;;  %v1332_v28 = vmax.f32 %v1235_v55, %v7449_v34  ;;  %v1241_v22 = vmax.f32 %v1145_v26, %v5384_v15  ;;  %v1382_v4 = vld [vmem:[#allocation2 + $0xd0] sm:$0xf] }
  0xfd   : > { %4646 = vmatmul.msk.f32.vlgmr.msrb.gmra.mxu2 %vm638_vm1, %v1768_v63  ;;  %1507 = vst.msk [vmem:[#allocation3 + $0x158] sm:$0xff] %vm638_vm1, %v1459_v7  ;;  %v5480_v54 = vmax.f32 %v1707_v0, %v1739_v35  ;;  %v1428_v44 = vmax.f32 %v1331_v29, %v7450_v51  ;;  %v1140_v1 = vmax.f32 %v1043_v19, %v1092_v39  ;;  %v1518_v61 = vld [vmem:[#allocation3 + $0x48] sm:$0xff]  ;;  %v5511_v9 = vld [vmem:[#allocation2 + $0x20] sm:$0xff]  ;;  %v7452_v42 = vld [vmem:[#allocation15_spill] sm:$0xff] }
  0xfe   : > { %2110 = vst.msk [vmem:[#allocation2 + $0x32] sm:$0xff] %vm638_vm1, %v1768_v63  ;;  %v1244_v38 = vmax.f32 %v1148_v46, %v5367_v30  ;;  %v1429_v58 = vmax.f32 %v1332_v28, %v5384_v15  ;;  %v1338_v56 = vmax.f32 %v1241_v22, %v5367_v30  ;;  %v2143_v59 = vld [vmem:[#allocation2 + $0x8] sm:$0xff]  ;;  %v2142_v12 = vld [vmem:[#allocation2] sm:$0xff]  ;;  %v2144_v8 = vld [vmem:[#allocation2 + $0x10] sm:$0xf] }
  0xff   : > { %2111 = vst.msk [vmem:[#allocation2 + $0x3a] sm:$0xff] %vm638_vm1, %v1769_v5  ;;  %v1236_v33 = vmax.f32 %v1140_v1, %v1188_v41  ;;  %v2192_v29 = vld [vmem:[#allocation2 + $0x28] sm:$0xf] }
 0x100   : > { %2112 = vst.msk [vmem:[#allocation2 + $0x4a] sm:$0xff] %vm638_vm1, %v1770_v23  ;;  %4624 = vmatmul.msk.f32.gmra.mxu1 %vm638_vm1, %v7451_v50  ;;  %v1341_v36 = vmax.f32 %v1244_v38, %v5327_v21  ;;  %v1435_v45 = vmax.f32 %v1338_v56, %v5327_v21  ;;  %v2240_v1 = vmax.f32 %v2144_v8, %v2192_v29 }
 0x101   : > { %2113 = vst.msk [vmem:[#allocation2 + $0x52] sm:$0xff] %vm638_vm1, %v5480_v54  ;;  %v1333_v18 = vmax.f32 %v1236_v33, %v1285_v37 }
 0x102   : > { %1471 = vst.msk [vmem:[#allocation3 + $0x38] sm:$0xff] %vm638_vm1, %v1423_v49  ;;  %v1438_v25 = vmax.f32 %v1341_v36, %v5293_v31  ;;  %v2238_v49 = vmax.f32 %v2142_v12, %v5514_v10  ;;  %v2239_v31 = vmax.f32 %v2143_v59, %v5511_v9  ;;  %v5554_v36 = vld [vmem:[%s7396_s4] ss:$0 sm:$0xff]  ;;  %v7454_v12 = vld [vmem:[#allocation22_spill] sm:$0xff] }
 0x103   : > { %1474 = vst.msk [vmem:[#allocation3 + $0x50] sm:$0xff] %vm638_vm1, %v1426_v62  ;;  %v1430_v55 = vmax.f32 %v1333_v18, %v1382_v4 }
 0x104   : > { %1476 = vst.msk [vmem:[#allocation3 + $0x60] sm:$0xff] %vm638_vm1, %v1428_v44 }
 0x105   : > { %4647 = vmatmul.msk.f32.gmra.mxu2 %vm638_vm1, %v1769_v5  ;;  %1477 = vst.msk [vmem:[#allocation3 + $0x68] sm:$0xff] %vm638_vm1, %v1429_v58  ;;  %v5522_v51 = vld [vmem:[#allocation2 + $0x30] sm:$0xff] }
 0x106   : > { %1483 = vst.msk [vmem:[#allocation3 + $0x98] sm:$0xff] %vm638_vm1, %v1435_v45  ;;  %v5525_v26 = vld [vmem:[#allocation2 + $0x38] sm:$0xff]  ;;  %v2288_v50 = vld [vmem:[#allocation2 + $0x40] sm:$0xf]  ;;  %v2334_v33 = vmax.f32 %v2238_v49, %v5522_v51 }
 0x107   : > { %1486 = vst.msk [vmem:[#allocation3 + $0xb0] sm:$0xff] %vm638_vm1, %v1438_v25  ;;  %v5528_v22 = vld [vmem:[#allocation2 + $0x48] sm:$0xff] }
 0x108   : > { %4625 = vmatmul.msk.f32.gmra.mxu1 %vm638_vm1, %v7452_v42  ;;  %v5535_v41 = vld [vmem:[#allocation2 + $0x50] sm:$0xff]  ;;  %1478 = vst.msk [vmem:[#allocation3 + $0x70] sm:$0xf] %vm951_vm4, %v1430_v55  ;;  %v2241_v55 = vmax.f32 %v5514_v10, %v5522_v51  ;;  %v1523_v10 = vld [vmem:[#allocation3 + $0x80] sm:$0xff] }
 0x109   : > { %v1548_v27 = vld [vmem:[#allocation3 + $0x31] sm:$0xff]  ;;  %v1549_v52 = vld [vmem:[#allocation3 + $0x39] sm:$0xff]  ;;  %605 = vst.msk [vmem:[%s5544_s15] sm:$0xff] %vm604_vm5, %v5554_v36 }
 0x10a   : > { %v1580_v53 = vmax.f32 %v1516_v16, %v1548_v27  ;;  %v1517_v60 = vld [vmem:[#allocation3 + $0x38] sm:$0xff]  ;;  %v1550_v48 = vld [vmem:[#allocation3 + $0x49] sm:$0xff]  ;;  %606 = vst.msk [vmem:[%s5544_s15 + $0x8] sm:$0xff] %vm604_vm5, %v5554_v36 }
 0x10b   : > { %v1612_v17 = vld [vmem:[#allocation3 + $0x32] sm:$0xff]  ;;  %v1581_v43 = vmax.f32 %v1517_v60, %v1549_v52  ;;  %v1613_v57 = vld [vmem:[#allocation3 + $0x3a] sm:$0xff]  ;;  %v1582_v7 = vmax.f32 %v1518_v61, %v1550_v48  ;;  %v1614_v40 = vld [vmem:[#allocation3 + $0x4a] sm:$0xff]  ;;  %v2336_v52 = vmax.f32 %v2240_v1, %v2288_v50  ;;  %607 = vst.msk [vmem:[%s5544_s15 + $0x10] sm:$0xff] %vm604_vm5, %v5554_v36 }
 0x10c   : > { %v1644_v20 = vmax.f32 %v1580_v53, %v1612_v17  ;;  %v1676_v14 = vld [vmem:[#allocation3 + $0x33] sm:$0xff]  ;;  %v1677_v47 = vld [vmem:[#allocation3 + $0x3b] sm:$0xff]  ;;  %v1678_v34 = vld [vmem:[#allocation3 + $0x4b] sm:$0xff]  ;;  %v2430_v53 = vmax.f32 %v2334_v33, %v5528_v22  ;;  %608 = vst.msk [vmem:[%s5544_s15 + $0x18] sm:$0xff] %vm604_vm5, %v5554_v36 }
 0x10d   : > { %4648 = vmatmul.msk.f32.gmra.mxu2 %vm638_vm1, %v1770_v23  ;;  %v1645_v3 = vmax.f32 %v1581_v43, %v1613_v57  ;;  %v1519_v63 = vld [vmem:[#allocation3 + $0x50] sm:$0xff]  ;;  %v1646_v5 = vmax.f32 %v1582_v7, %v1614_v40  ;;  %v1741_v35 = vld [vmem:[#allocation3 + $0x3c] sm:$0xff]  ;;  %v2384_v16 = vld [vmem:[#allocation2 + $0x58] sm:$0xf]  ;;  %609 = vst.msk [vmem:[%s5544_s15 + $0x20] sm:$0xff] %vm604_vm5, %v5554_v36 }
 0x10e   : > { %v1708_v24 = vmax.f32 %v1644_v20, %v1676_v14  ;;  %v1551_v13 = vld [vmem:[#allocation3 + $0x51] sm:$0xff]  ;;  %v2432_v17 = vmax.f32 %v2336_v52, %v2384_v16  ;;  %610 = vst.msk [vmem:[%s5544_s15 + $0x28] sm:$0xff] %vm604_vm5, %v5554_v36  ;;  %v1552_v8 = vld [vmem:[#allocation3 + $0x61] sm:$0xff]  ;;  %v1554_v1 = vld [vmem:[#allocation3 + $0x79] sm:$0xff] }
 0x10f   : > { %v1740_v0 = vld [vmem:[#allocation3 + $0x34] sm:$0xff]  ;;  %v1709_v6 = vmax.f32 %v1645_v3, %v1677_v47  ;;  %v1583_v32 = vmax.f32 %v1519_v63, %v1551_v13  ;;  %v1710_v39 = vmax.f32 %v1646_v5, %v1678_v34  ;;  %v1742_v46 = vld [vmem:[#allocation3 + $0x4c] sm:$0xff]  ;;  %611 = vst.msk [vmem:[%s5544_s15 + $0x30] sm:$0xff] %vm604_vm5, %v5554_v36  ;;  %v7455_v47 = vld [vmem:[#allocation4_spill] sm:$0xff] }
 0x110   : > { %v1772_v23 = vmax.f32 %v1708_v24, %v1740_v0  ;;  %v1615_v62 = vld [vmem:[#allocation3 + $0x52] sm:$0xff]  ;;  %v852_v45 = vld [vmem:[%s5544_s15] sm:$0xff]  ;;  %612 = vst.msk [vmem:[%s5544_s15 + $0x38] sm:$0xff] %vm604_vm5, %v5554_v36  ;;  %v7456_v34 = vld [vmem:[#allocation5_spill] sm:$0xff] }
 0x111   : > { %v1773_v44 = vmax.f32 %v1709_v6, %v1741_v35  ;;  %v1647_v19 = vmax.f32 %v1583_v32, %v1615_v62  ;;  %v1679_v28 = vld [vmem:[#allocation3 + $0x53] sm:$0xff]  ;;  %v5533_v38 = vmax.f32 %v1710_v39, %v1742_v46  ;;  %613 = vst.msk [vmem:[%s5544_s15 + $0x40] sm:$0xff] %vm604_vm5, %v5554_v36  ;;  %v1553_v39 = vld [vmem:[#allocation3 + $0x69] sm:$0xff]  ;;  %v1555_v50 = vld [vmem:[#allocation3 + $0x81] sm:$0xff] }
 0x112   : > { %2114 = vst.msk [vmem:[#allocation2 + $0x62] sm:$0xff] %vm638_vm1, %v1772_v23  ;;  %v1743_v56 = vld [vmem:[#allocation3 + $0x54] sm:$0xff]  ;;  %v1680_v16 = vld [vmem:[#allocation3 + $0x63] sm:$0xff] }
 0x113   : > { %2115 = vst.msk [vmem:[#allocation2 + $0x6a] sm:$0xff] %vm638_vm1, %v1773_v44  ;;  %v1711_v58 = vmax.f32 %v1647_v19, %v1679_v28  ;;  %v7453_v60 = vld [vmem:[#allocation19_spill] sm:$0xff]  ;;  %v756_v48 = vpop.f32.mrf.mxu1  ;;  %v2242_v19 = vmax.f32 %v5511_v9, %v5525_v26 }
 0x114   : > { %2116 = vst.msk [vmem:[#allocation2 + $0x7a] sm:$0xff] %vm638_vm1, %v5533_v38  ;;  %4626 = vmatmul.msk.f32.gmra.mxu1 %vm638_vm1, %v7453_v60  ;;  %v884_v4 = vadd.f32 %v852_v45, %v756_v48  ;;  %v1522_v9 = vld [vmem:[#allocation3 + $0x78] sm:$0xff]  ;;  %v1617_v48 = vld [vmem:[#allocation3 + $0x6a] sm:$0xff]  ;;  %v7457_v45 = vld [vmem:[#allocation8_spill] sm:$0xff] }
 0x115   : > { %4649 = vmatmul.msk.f32.gmra.mxu2 %vm638_vm1, %v5480_v54  ;;  %v2335_v54 = vmax.f32 %v2239_v31, %v5525_v26  ;;  %v5549_v27 = vmax.f32 %v1711_v58, %v1743_v56  ;;  %614 = vst.msk [vmem:[%s5544_s15 + $0x48] sm:$0xff] %vm604_vm5, %v5554_v36  ;;  %v1616_v31 = vld [vmem:[#allocation3 + $0x62] sm:$0xff]  ;;  %v2338_v58 = vmax.f32 %v2242_v19, %v5535_v41  ;;  %v1556_v56 = vld [vmem:[#allocation3 + $0x91] sm:$0xff]  ;;  %v1557_v60 = vld [vmem:[#allocation3 + $0x99] sm:$0xff] }
 0x116   : > { %917 = vst.msk [vmem:[%s5544_s15] sm:$0xff] %vm604_vm5, %v884_v4  ;;  %v1586_v52 = vmax.f32 %v1522_v9, %v1554_v1  ;;  %v1684_v9 = vld [vmem:[#allocation3 + $0x93] sm:$0xff] }
 0x117   : > { %v2431_v37 = vmax.f32 %v2335_v54, %v5535_v41  ;;  %2117 = vst.msk [vmem:[#allocation2 + $0x82] sm:$0xff] %vm638_vm1, %v5549_v27 }
 0x118   : > { %615 = vst.msk [vmem:[%s5544_s15 + $0x50] sm:$0xff] %vm604_vm5, %v5554_v36 }
 0x119   : > { %v5565_v43 = vld [vmem:[#allocation2 + $0x60] sm:$0xff]  ;;  %616 = vst.msk [vmem:[%s5544_s15 + $0x58] sm:$0xff] %vm604_vm5, %v5554_v36 }
 0x11a   : > { %v5570_v61 = vld [vmem:[#allocation2 + $0x68] sm:$0xff]  ;;  %v2526_v18 = vmax.f32 %v2430_v53, %v5565_v43  ;;  %v2480_v20 = vld [vmem:[#allocation2 + $0x70] sm:$0xf]  ;;  %617 = vst.msk [vmem:[%s5544_s15 + $0x60] sm:$0xff] %vm604_vm5, %v5554_v36  ;;  %v1525_v53 = vld [vmem:[#allocation3 + $0x98] sm:$0xff] }
 0x11b   : > { %v2527_v59 = vmax.f32 %v2431_v37, %v5570_v61  ;;  %v2528_v57 = vmax.f32 %v2432_v17, %v2480_v20  ;;  %618 = vst.msk [vmem:[%s5544_s15 + $0x68] sm:$0xff] %vm604_vm5, %v5554_v36  ;;  %v1524_v37 = vld [vmem:[#allocation3 + $0x90] sm:$0xff]  ;;  %v5678_v4 = vld [vmem:[#allocation2 + $0x78] sm:$0xff] }
 0x11c   : > { %2574 = vst.msk [vmem:[#allocation3] sm:$0xff] %vm638_vm1, %v2526_v18  ;;  %4627 = vmatmul.msk.f32.gmra.mxu1 %vm638_vm1, %v7454_v12  ;;  %v1558_v17 = vld [vmem:[#allocation3 + $0xa9] sm:$0xff]  ;;  %v1587_v18 = vmax.f32 %v1523_v10, %v1555_v50  ;;  %v1588_v12 = vmax.f32 %v1524_v37, %v1556_v56  ;;  %v1151_v10 = vmax.f32 %v5384_v15, %v5367_v30  ;;  %v2198_v50 = vld [vmem:[#allocation2 + $0x58] sm:$0xf]  ;;  %v1746_v15 = vld [vmem:[#allocation3 + $0x7c] sm:$0xff] }
 0x11d   : > { %4650 = vmatmul.msk.f32.gmra.mxu2 %vm638_vm1, %v1772_v23  ;;  %2575 = vst.msk [vmem:[#allocation3 + $0x8] sm:$0xff] %vm638_vm1, %v2527_v59  ;;  %v1520_v23 = vld [vmem:[#allocation3 + $0x60] sm:$0xff]  ;;  %v1527_v20 = vld [vmem:[#allocation3 + $0xb0] sm:$0xff] }
 0x11e   : > { %2576 = vst.msk [vmem:[#allocation3 + $0x10] sm:$0xf] %vm951_vm4, %v2528_v57  ;;  %v1584_v35 = vmax.f32 %v1520_v23, %v1552_v8  ;;  %v1559_v57 = vld [vmem:[#allocation3 + $0xb1] sm:$0xff]  ;;  %v1621_v23 = vld [vmem:[#allocation3 + $0x9a] sm:$0xff] }
 0x11f   : > { %619 = vst.msk [vmem:[%s5544_s15 + $0x70] sm:$0xff] %vm604_vm5, %v5554_v36  ;;  %v7458_v37 = vld [vmem:[#allocation10_spill] sm:$0xff] }
 0x120   : > { %620 = vst.msk [vmem:[%s5544_s15 + $0x78] sm:$0xff] %vm604_vm5, %v5554_v36  ;;  %v1648_v46 = vmax.f32 %v1584_v35, %v1616_v31  ;;  %v1622_v31 = vld [vmem:[#allocation3 + $0xaa] sm:$0xff] }
 0x121   : > { %621 = vst.msk [vmem:[%s5544_s15 + $0x80] sm:$0xff] %vm604_vm5, %v5554_v36 }
 0x122   : > { %622 = vst.msk [vmem:[%s5544_s15 + $0x88] sm:$0xff] %vm604_vm5, %v5554_v36 }
 0x123   : > { %v2622_v14 = vld [vmem:[#allocation3] sm:$0xff]  ;;  %623 = vst.msk [vmem:[%s5544_s15 + $0x90] sm:$0xff] %vm604_vm5, %v5554_v36 }
 0x124   : > { %v2654_v3 = vld [vmem:[#allocation3 + $0x1] sm:$0xff]  ;;  %4628 = vmatmul.msk.f32.gmra.mxu1 %vm638_vm1, %v7455_v47  ;;  %624 = vst.msk [vmem:[%s5544_s15 + $0x98] sm:$0xff] %vm604_vm5, %v5554_v36 }
 0x125   : > { %4651 = vmatmul.msk.f32.gmra.mxu2 %vm638_vm1, %v1773_v44  ;;  %v2686_v7 = vmax.f32 %v2622_v14, %v2654_v3  ;;  %v2623_v63 = vld [vmem:[#allocation3 + $0x8] sm:$0xff]  ;;  %625 = vst.msk [vmem:[%s5544_s15 + $0xa0] sm:$0xff] %vm604_vm5, %v5554_v36  ;;  %v2434_v14 = vmax.f32 %v2338_v58, %v5570_v61 }
 0x126   : > { %v2655_v24 = vld [vmem:[#allocation3 + $0x9] sm:$0xff]  ;;  %626 = vst.msk [vmem:[%s5544_s15 + $0xa8] sm:$0xff] %vm604_vm5, %v5554_v36 }
 0x127   : > { %v2718_v42 = vld [vmem:[#allocation3 + $0x2] sm:$0xff]  ;;  %v2687_v13 = vmax.f32 %v2623_v63, %v2655_v24  ;;  %v2719_v5 = vld [vmem:[#allocation3 + $0xa] sm:$0xff]  ;;  %627 = vst.msk [vmem:[%s5544_s15 + $0xb0] sm:$0xff] %vm604_vm5, %v5554_v36  ;;  %v1618_v63 = vld [vmem:[#allocation3 + $0x7a] sm:$0xff] }
 0x128   : > { %v2750_v40 = vmax.f32 %v2686_v7, %v2718_v42  ;;  %v2782_v25 = vld [vmem:[#allocation3 + $0x3] sm:$0xff]  ;;  %v2783_v49 = vld [vmem:[#allocation3 + $0xb] sm:$0xff]  ;;  %628 = vst.msk [vmem:[%s5544_s15 + $0xb8] sm:$0xff] %vm604_vm5, %v5554_v36  ;;  %v1589_v7 = vmax.f32 %v1525_v53, %v1557_v60  ;;  %v1685_v53 = vld [vmem:[#allocation3 + $0x9b] sm:$0xff] }
 0x129   : > { %v2846_v6 = vld [vmem:[#allocation3 + $0x4] sm:$0xff]  ;;  %v2751_v32 = vmax.f32 %v2687_v13, %v2719_v5  ;;  %v2847_v28 = vld [vmem:[#allocation3 + $0xc] sm:$0xff]  ;;  %629 = vst.msk [vmem:[%s5544_s15 + $0xc0] sm:$0xff] %vm604_vm5, %v5554_v36 }
 0x12a   : > { %v2814_v0 = vmax.f32 %v2750_v40, %v2782_v25  ;;  %v1521_v44 = vld [vmem:[#allocation3 + $0x68] sm:$0xff]  ;;  %630 = vst.msk [vmem:[%s5544_s15 + $0xc8] sm:$0xff] %vm604_vm5, %v5554_v36  ;;  %v5684_v42 = vld [vmem:[#allocation2 + $0x80] sm:$0xff]  ;;  %v1650_v25 = vmax.f32 %v1586_v52, %v1618_v63  ;;  %v1620_v5 = vld [vmem:[#allocation3 + $0x92] sm:$0xff] }
 0x12b   : > { %v2815_v62 = vmax.f32 %v2751_v32, %v2783_v49  ;;  %v1585_v54 = vmax.f32 %v1521_v44, %v1553_v39  ;;  %v1526_v3 = vld [vmem:[#allocation3 + $0xa8] sm:$0xff]  ;;  %631 = vst.msk [vmem:[%s5544_s15 + $0xd0] sm:$0xff] %vm604_vm5, %v5554_v36  ;;  %v1652_v35 = vmax.f32 %v1588_v12, %v1620_v5  ;;  %v1653_v44 = vmax.f32 %v1589_v7, %v1621_v23  ;;  %v1682_v39 = vld [vmem:[#allocation3 + $0x7b] sm:$0xff] }
 0x12c   : > { %v5619_v29 = vmax.f32 %v2814_v0, %v2846_v6  ;;  %4629 = vmatmul.msk.f32.gmra.mxu1 %vm638_vm1, %v7456_v34  ;;  %v1744_v47 = vld [vmem:[#allocation3 + $0x64] sm:$0xff]  ;;  %v1590_v40 = vmax.f32 %v1526_v3, %v1558_v17  ;;  %632 = vst.msk [vmem:[%s5544_s15 + $0xd8] sm:$0xff] %vm604_vm5, %v5554_v36  ;;  %v1591_v6 = vmax.f32 %v1527_v20, %v1559_v57  ;;  %v1687_v20 = vld [vmem:[#allocation3 + $0xb3] sm:$0xff] }
 0x12d   : > { %4652 = vmatmul.msk.f32.gmra.mxu2 %vm638_vm1, %v5533_v38  ;;  %v2337_v38 = vmax.f32 %v2241_v55, %v5528_v22  ;;  %v5657_v33 = vmax.f32 %v2815_v62, %v2847_v28  ;;  %v1649_v24 = vmax.f32 %v1585_v54, %v1617_v48  ;;  %v1619_v13 = vld [vmem:[#allocation3 + $0x82] sm:$0xff]  ;;  %633 = vst.msk [vmem:[%s5544_s15 + $0xe0] sm:$0xff] %vm604_vm5, %v5554_v36  ;;  %v1681_v49 = vld [vmem:[#allocation3 + $0x6b] sm:$0xff]  ;;  %v759_v62 = vpop.f32.mrf.mxu1  ;;  %v1748_v7 = vld [vmem:[#allocation3 + $0x94] sm:$0xff] }
 0x12e   : > { %4680 = vmatmul.msk.f32.vlgmr.msrb.gmra.mxu3 %vm638_vm1, %v5619_v29  ;;  %v1651_v8 = vmax.f32 %v1587_v18, %v1619_v13  ;;  %634 = vst.msk [vmem:[%s5544_s15 + $0xe8] sm:$0xff] %vm604_vm5, %v5554_v36  ;;  %v2530_v34 = vmax.f32 %v2434_v14, %v5684_v42  ;;  %v853_v55 = vld [vmem:[%s5544_s15 + $0x8] sm:$0xff]  ;;  %v1654_v1 = vmax.f32 %v1590_v40, %v1622_v31  ;;  %v2195_v18 = vld [vmem:[#allocation2 + $0x40] sm:$0xf]  ;;  %v2294_v40 = vld [vmem:[#allocation2 + $0x70] sm:$0xf] }
 0x12f   : > { %v2433_v59 = vmax.f32 %v2337_v38, %v5565_v43  ;;  %v1713_v19 = vmax.f32 %v1649_v24, %v1681_v49  ;;  %635 = vst.msk [vmem:[%s5544_s15 + $0xf0] sm:$0xff] %vm604_vm5, %v5554_v36  ;;  %v1683_v28 = vld [vmem:[#allocation3 + $0x83] sm:$0xff]  ;;  %v1714_v38 = vmax.f32 %v1650_v25, %v1682_v39  ;;  %v2244_v54 = vmax.f32 %v5522_v51, %v5528_v22  ;;  %v1686_v60 = vld [vmem:[#allocation3 + $0xab] sm:$0xff]  ;;  %v2291_v24 = vld [vmem:[#allocation2 + $0x58] sm:$0xf] }
 0x130   : > { %636 = vst.msk [vmem:[%s5544_s15 + $0xf8] sm:$0xff] %vm604_vm5, %v5554_v36  ;;  %v1715_v56 = vmax.f32 %v1651_v8, %v1683_v28  ;;  %v1716_v52 = vmax.f32 %v1652_v35, %v1684_v9  ;;  %v1717_v30 = vmax.f32 %v1653_v44, %v1685_v53  ;;  %v2147_v17 = vld [vmem:[#allocation2 + $0x28] sm:$0xf]  ;;  %v2245_v51 = vmax.f32 %v5525_v26, %v5535_v41  ;;  %v1749_v13 = vld [vmem:[#allocation3 + $0x9c] sm:$0xff]  ;;  %v2153_v5 = vld [vmem:[#allocation2 + $0x58] sm:$0xf] }
 0x131   : > { %v2529_v32 = vmax.f32 %v2433_v59, %v5678_v4  ;;  %2578 = vst.msk [vmem:[#allocation3 + $0x20] sm:$0xff] %vm638_vm1, %v2530_v34  ;;  %v2150_v59 = vld [vmem:[#allocation2 + $0x40] sm:$0xf]  ;;  %v1718_v57 = vmax.f32 %v1654_v1, %v1686_v60  ;;  %v1747_v12 = vld [vmem:[#allocation3 + $0x84] sm:$0xff]  ;;  %v5720_v48 = vmax.f32 %v1714_v38, %v1746_v15  ;;  %v2247_v26 = vmax.f32 %v5528_v22, %v5565_v43  ;;  %v5746_v49 = vld [vmem:[#allocation2 + $0x110] sm:$0xff] }
 0x132   : > { %3220 = vst.msk [vmem:[#allocation2 + $0x32] sm:$0xff] %vm638_vm1, %v5619_v29  ;;  %v2246_v14 = vmax.f32 %v2150_v59, %v2198_v50  ;;  %v5724_v63 = vmax.f32 %v1715_v56, %v1747_v12  ;;  %v2340_v29 = vmax.f32 %v2244_v54, %v5565_v43  ;;  %v5731_v25 = vmax.f32 %v1716_v52, %v1748_v7  ;;  %v2204_v31 = vld [vmem:[#allocation2 + $0x88] sm:$0xf]  ;;  %v2387_v39 = vld [vmem:[#allocation2 + $0x70] sm:$0xf] }
 0x133   : > { %2577 = vst.msk [vmem:[#allocation3 + $0x18] sm:$0xff] %vm638_vm1, %v2529_v32  ;;  %v2248_v22 = vmax.f32 %v5535_v41, %v5570_v61  ;;  %v5740_v8 = vmax.f32 %v2245_v51, %v5570_v61  ;;  %v1751_v32 = vld [vmem:[#allocation3 + $0xb4] sm:$0xff]  ;;  %v2297_v28 = vld [vmem:[#allocation2 + $0x88] sm:$0xf]  ;;  %v2156_v50 = vld [vmem:[#allocation2 + $0x70] sm:$0xf] }
 0x134   : > { %4630 = vmatmul.msk.f32.gmra.mxu1 %vm638_vm1, %v7457_v45  ;;  %v1247_v45 = vmax.f32 %v1151_v10, %v5327_v21  ;;  %v2243_v21 = vmax.f32 %v2147_v17, %v2195_v18  ;;  %2120 = vst.msk [vmem:[#allocation2 + $0xaa] sm:$0xff] %vm638_vm1, %v5720_v48  ;;  %v2436_v1 = vmax.f32 %v2340_v29, %v5678_v4  ;;  %v7459_v10 = vld [vmem:[#allocation14_spill] sm:$0xff]  ;;  %v2390_v9 = vld [vmem:[#allocation2 + $0x88] sm:$0xf] }
 0x135   : > { %4653 = vmatmul.msk.f32.gmra.mxu2 %vm638_vm1, %v5549_v27  ;;  %v1712_v27 = vmax.f32 %v1648_v46, %v1680_v16  ;;  %v1623_v46 = vld [vmem:[#allocation3 + $0xb2] sm:$0xff]  ;;  %v885_v16 = vadd.f32 %v853_v55, %v759_v62  ;;  %v5749_v55 = vmax.f32 %v2246_v14, %v2294_v40  ;;  %2121 = vst.msk [vmem:[#allocation2 + $0xb2] sm:$0xff] %vm638_vm1, %v5724_v63  ;;  %v2483_v15 = vld [vmem:[#allocation2 + $0x88] sm:$0xf] }
 0x136   : > { %4681 = vmatmul.msk.f32.gmra.mxu3 %vm638_vm1, %v5657_v33  ;;  %v1655_v58 = vmax.f32 %v1591_v6, %v1623_v46  ;;  %v1750_v6 = vld [vmem:[#allocation3 + $0xac] sm:$0xff]  ;;  %v2339_v35 = vmax.f32 %v2243_v21, %v2291_v24  ;;  %v1344_v34 = vmax.f32 %v1247_v45, %v5746_v49  ;;  %v5758_v46 = vmax.f32 %v2247_v26, %v5678_v4 }
 0x137   : > { %v1776_v0 = vmax.f32 %v1712_v27, %v1744_v47  ;;  %v1745_v27 = vld [vmem:[#allocation3 + $0x6c] sm:$0xff]  ;;  %918 = vst.msk [vmem:[%s5544_s15 + $0x8] sm:$0xff] %vm604_vm5, %v885_v16  ;;  %v5742_v23 = vmax.f32 %v1718_v57, %v1750_v6  ;;  %v2344_v54 = vmax.f32 %v2248_v22, %v5684_v42  ;;  %v2437_v16 = vmax.f32 %v5740_v8, %v5684_v42 }
 0x138   : > { %v1777_v36 = vmax.f32 %v1713_v19, %v1745_v27  ;;  %v1719_v3 = vmax.f32 %v1655_v58, %v1687_v20  ;;  %v2201_v47 = vld [vmem:[#allocation2 + $0x70] sm:$0xf]  ;;  %v2250_v19 = vmax.f32 %v5565_v43, %v5678_v4  ;;  %2122 = vst.msk [vmem:[#allocation2 + $0xc2] sm:$0xff] %vm638_vm1, %v5731_v25  ;;  %v2251_v58 = vmax.f32 %v5570_v61, %v5684_v42  ;;  %v2159_v27 = vld [vmem:[#allocation2 + $0x88] sm:$0xf] }
 0x139   : > { %2118 = vst.msk [vmem:[#allocation2 + $0x92] sm:$0xff] %vm638_vm1, %v1776_v0  ;;  %v2249_v62 = vmax.f32 %v2153_v5, %v2201_v47  ;;  %v2252_v43 = vmax.f32 %v2156_v50, %v2204_v31  ;;  %v2435_v52 = vmax.f32 %v2339_v35, %v2387_v39  ;;  %v2438_v17 = vmax.f32 %v5749_v55, %v2390_v9  ;;  %v7460_v35 = vld [vmem:[#allocation18_spill] sm:$0xff] }
 0x13a   : > { %2119 = vst.msk [vmem:[#allocation2 + $0x9a] sm:$0xff] %vm638_vm1, %v1777_v36  ;;  %v2624_v44 = vld [vmem:[#allocation3 + $0x18] sm:$0xff]  ;;  %v5751_v41 = vmax.f32 %v1719_v3, %v1751_v32 }
 0x13b   : > { %v2656_v38 = vld [vmem:[#allocation3 + $0x19] sm:$0xff]  ;;  %2124 = vst.msk [vmem:[#allocation2 + $0xda] sm:$0xff] %vm638_vm1, %v5742_v23  ;;  %v2345_v61 = vmax.f32 %v2249_v62, %v2297_v28  ;;  %v5796_v26 = vld [vmem:[#allocation2 + $0xa8] sm:$0xff]  ;;  %v2531_v47 = vmax.f32 %v2435_v52, %v2483_v15 }
 0x13c   : > { %4631 = vmatmul.msk.f32.gmra.mxu1 %vm638_vm1, %v7458_v37  ;;  %v2688_v56 = vmax.f32 %v2624_v44, %v2656_v38  ;;  %v2720_v53 = vld [vmem:[#allocation3 + $0x1a] sm:$0xff]  ;;  %2125 = vst.msk [vmem:[#allocation2 + $0xe2] sm:$0xff] %vm638_vm1, %v5751_v41 }
 0x13d   : > { %4654 = vmatmul.msk.f32.gmra.mxu2 %vm638_vm1, %v1776_v0  ;;  %v5733_v0 = vmax.f32 %v1717_v30, %v1749_v13  ;;  %v2784_v18 = vld [vmem:[#allocation3 + $0x1b] sm:$0xff]  ;;  %3221 = vst.msk [vmem:[#allocation2 + $0x3a] sm:$0xff] %vm638_vm1, %v5657_v33  ;;  %v5799_v13 = vld [vmem:[#allocation2 + $0xb0] sm:$0xff] }
 0x13e   : > { %v2752_v37 = vmax.f32 %v2688_v56, %v2720_v53  ;;  %v2848_v24 = vld [vmem:[#allocation3 + $0x1c] sm:$0xff]  ;;  %v2303_v6 = vld [vmem:[#allocation2 + $0xb8] sm:$0xf]  ;;  %2579 = vst.msk [vmem:[#allocation3 + $0x28] sm:$0xf] %vm951_vm4, %v2531_v47 }
 0x13f   : > { %2123 = vst.msk [vmem:[#allocation2 + $0xca] sm:$0xff] %vm638_vm1, %v5733_v0  ;;  %v2396_v62 = vld [vmem:[#allocation2 + $0xb8] sm:$0xf]  ;;  %v5812_v44 = vld [vmem:[#allocation2 + $0xc0] sm:$0xff] }
 0x140   : > { %v5772_v60 = vld [vmem:[#allocation2 + $0x90] sm:$0xff] }
 0x141   : > { %v2253_v30 = vmax.f32 %v5678_v4, %v5772_v60  ;;  %v2346_v59 = vmax.f32 %v2250_v19, %v5772_v60  ;;  %v2439_v51 = vmax.f32 %v5758_v46, %v5772_v60  ;;  %v2532_v20 = vmax.f32 %v2436_v1, %v5772_v60  ;;  %v5786_v57 = vld [vmem:[#allocation2 + $0x98] sm:$0xff]  ;;  %v2207_v12 = vld [vmem:[#allocation2 + $0xa0] sm:$0xf] }
 0x142   : > { %v2816_v4 = vmax.f32 %v2752_v37, %v2784_v18  ;;  %v2255_v45 = vmax.f32 %v2159_v27, %v2207_v12  ;;  %v2300_v14 = vld [vmem:[#allocation2 + $0xa0] sm:$0xf]  ;;  %v2347_v3 = vmax.f32 %v2251_v58, %v5786_v57  ;;  %v2440_v33 = vmax.f32 %v2344_v54, %v5786_v57  ;;  %v2489_v19 = vld [vmem:[#allocation2 + $0xb8] sm:$0xf]  ;;  %v5827_v54 = vld [vmem:[#allocation2 + $0x128] sm:$0xff] }
 0x143   : > { %v2393_v7 = vld [vmem:[#allocation2 + $0xa0] sm:$0xf]  ;;  %2580 = vst.msk [vmem:[#allocation3 + $0x30] sm:$0xff] %vm638_vm1, %v2532_v20  ;;  %v2348_v29 = vmax.f32 %v2252_v43, %v2300_v14  ;;  %v2442_v5 = vmax.f32 %v2346_v59, %v5796_v26  ;;  %v2533_v32 = vmax.f32 %v2437_v16, %v5786_v57  ;;  %v2535_v31 = vmax.f32 %v2439_v51, %v5796_v26  ;;  %v5831_v53 = vld [vmem:[#allocation2 + $0xd8] sm:$0xff]  ;;  %v2495_v15 = vld [vmem:[#allocation2 + $0xe8] sm:$0xf] }
 0x144   : > { %4632 = vmatmul.msk.f32.gmra.mxu1 %vm638_vm1, %v7459_v10  ;;  %v2880_v40 = vmax.f32 %v2816_v4, %v2848_v24  ;;  %v2441_v21 = vmax.f32 %v2345_v61, %v2393_v7  ;;  %v2443_v22 = vmax.f32 %v2347_v3, %v5799_v13  ;;  %v2486_v8 = vld [vmem:[#allocation2 + $0xa0] sm:$0xf]  ;;  %v2536_v46 = vmax.f32 %v2440_v33, %v5799_v13  ;;  %v5849_v4 = vld [vmem:[#allocation2 + $0x38] sm:$0xff]  ;;  %v5852_v7 = vld [vmem:[#allocation2 + $0x30] sm:$0xff] }
 0x145   : > { %4655 = vmatmul.msk.f32.gmra.mxu2 %vm638_vm1, %v1777_v36  ;;  %v1441_v36 = vmax.f32 %v1344_v34, %v5376_v11  ;;  %v2254_v11 = vmax.f32 %v5684_v42, %v5786_v57  ;;  %v2349_v42 = vmax.f32 %v2253_v30, %v5796_v26  ;;  %v2351_v34 = vmax.f32 %v2255_v45, %v2303_v6  ;;  %v5834_v27 = vld [vmem:[#allocation2 + $0xe0] sm:$0xff] }
 0x146   : > { %4682 = vmatmul.msk.f32.gmra.mxu3 %vm638_vm1, %v2880_v40  ;;  %3222 = vst.msk [vmem:[#allocation2 + $0x4a] sm:$0xff] %vm638_vm1, %v2880_v40  ;;  %v2534_v55 = vmax.f32 %v2438_v17, %v2486_v8  ;;  %v2444_v39 = vmax.f32 %v2348_v29, %v2396_v62  ;;  %v5816_v1 = vld [vmem:[#allocation2 + $0xc8] sm:$0xff]  ;;  %v2537_v38 = vmax.f32 %v2441_v21, %v2489_v19  ;;  %v2399_v10 = vld [vmem:[#allocation2 + $0xd0] sm:$0xf]  ;;  %v2625_v37 = vld [vmem:[#allocation3 + $0x20] sm:$0xff] }
 0x147   : > { %1489 = vst.msk [vmem:[#allocation3 + $0xc8] sm:$0xff] %vm638_vm1, %v1441_v36  ;;  %v2445_v28 = vmax.f32 %v2349_v42, %v5812_v44  ;;  %v2538_v58 = vmax.f32 %v2442_v5, %v5812_v44  ;;  %v2447_v9 = vmax.f32 %v2351_v34, %v2399_v10  ;;  %v2492_v56 = vld [vmem:[#allocation2 + $0xd0] sm:$0xf]  ;;  %v2539_v43 = vmax.f32 %v2443_v22, %v5816_v1  ;;  %v7461_v36 = vld [vmem:[#allocation21_spill] sm:$0xff]  ;;  %v5843_v18 = vld [vmem:[#allocation2 + $0x140] sm:$0xff] }
 0x148   : > { %2581 = vst.msk [vmem:[#allocation3 + $0x38] sm:$0xff] %vm638_vm1, %v2533_v32  ;;  %v1160_v16 = vmax.f32 %v5746_v49, %v5827_v54  ;;  %v2540_v52 = vmax.f32 %v2444_v39, %v2492_v56  ;;  %v2657_v17 = vld [vmem:[#allocation3 + $0x21] sm:$0xff]  ;;  %v5855_v42 = vld [vmem:[#allocation2 + $0x10] sm:$0xf]  ;;  %v5862_v8 = vld [vmem:[#allocation2 + $0x158] sm:$0xff] }
 0x149   : > { %2582 = vst.msk [vmem:[#allocation3 + $0x40] sm:$0xf] %vm951_vm4, %v2534_v55  ;;  %v2541_v61 = vmax.f32 %v2445_v28, %v5831_v53  ;;  %v2543_v49 = vmax.f32 %v2447_v9, %v2495_v15  ;;  %v2689_v12 = vmax.f32 %v2625_v37, %v2657_v17  ;;  %v2721_v14 = vld [vmem:[#allocation3 + $0x22] sm:$0xff] }
 0x14a   : > { %2583 = vst.msk [vmem:[#allocation3 + $0x48] sm:$0xff] %vm638_vm1, %v2535_v31  ;;  %v2626_v30 = vld [vmem:[#allocation3 + $0x30] sm:$0xff]  ;;  %v5846_v59 = vmax.f32 %v1160_v16, %v5843_v18  ;;  %v2785_v3 = vld [vmem:[#allocation3 + $0x23] sm:$0xff] }
 0x14b   : > { %2584 = vst.msk [vmem:[#allocation3 + $0x50] sm:$0xff] %vm638_vm1, %v2536_v46  ;;  %v2753_v40 = vmax.f32 %v2689_v12, %v2721_v14  ;;  %v5857_v21 = vld [vmem:[#allocation2 + $0x28] sm:$0xf] }
 0x14c   : > { %4633 = vmatmul.msk.f32.gmra.mxu1 %vm638_vm1, %v7460_v35  ;;  %2585 = vst.msk [vmem:[#allocation3 + $0x58] sm:$0xf] %vm951_vm4, %v2537_v38  ;;  %v1353_v32 = vmax.f32 %v5846_v59, %v5862_v8  ;;  %v2849_v39 = vld [vmem:[#allocation3 + $0x24] sm:$0xff] }
 0x14d   : > { %4656 = vmatmul.msk.f32.gmra.mxu2 %vm638_vm1, %v5720_v48  ;;  %v2350_v48 = vmax.f32 %v2254_v11, %v5799_v13  ;;  %2586 = vst.msk [vmem:[#allocation3 + $0x60] sm:$0xff] %vm638_vm1, %v2538_v58  ;;  %v2817_v31 = vmax.f32 %v2753_v40, %v2785_v3  ;;  %v5868_v58 = vld [vmem:[#allocation2 + $0x40] sm:$0xf]  ;;  %v5888_v40 = vld [vmem:[#allocation2 + $0x170] sm:$0xff] }
 0x14e   : > { %2587 = vst.msk [vmem:[#allocation3 + $0x68] sm:$0xff] %vm638_vm1, %v2539_v43 }
 0x14f   : > { %v2446_v50 = vmax.f32 %v2350_v48, %v5816_v1  ;;  %2588 = vst.msk [vmem:[#allocation3 + $0x70] sm:$0xf] %vm951_vm4, %v2540_v52  ;;  %v2627_v51 = vld [vmem:[#allocation3 + $0x38] sm:$0xff]  ;;  %v2881_v37 = vmax.f32 %v2817_v31, %v2849_v39 }
 0x150   : > { %v2658_v20 = vld [vmem:[#allocation3 + $0x31] sm:$0xff]  ;;  %2589 = vst.msk [vmem:[#allocation3 + $0x78] sm:$0xff] %vm638_vm1, %v2541_v61  ;;  %v2659_v11 = vld [vmem:[#allocation3 + $0x39] sm:$0xff] }
 0x151   : > { %v2690_v45 = vmax.f32 %v2626_v30, %v2658_v20  ;;  %v2628_v24 = vld [vmem:[#allocation3 + $0x48] sm:$0xff]  ;;  %v2691_v29 = vmax.f32 %v2627_v51, %v2659_v11  ;;  %v2722_v33 = vld [vmem:[#allocation3 + $0x32] sm:$0xff]  ;;  %v2723_v47 = vld [vmem:[#allocation3 + $0x3a] sm:$0xff]  ;;  %2591 = vst.msk [vmem:[#allocation3 + $0x88] sm:$0xf] %vm951_vm4, %v2543_v49  ;;  %4683 = vmatmul.msk.f32.gmra.mxu3 %vm638_vm1, %v2881_v37 }
 0x152   : > { %v2629_v6 = vld [vmem:[#allocation3 + $0x50] sm:$0xff]  ;;  %v2787_v55 = vld [vmem:[#allocation3 + $0x3b] sm:$0xff]  ;;  %v7462_v30 = vld [vmem:[#allocation13_spill] sm:$0xff]  ;;  %3223 = vst.msk [vmem:[#allocation2 + $0x52] sm:$0xff] %vm638_vm1, %v2881_v37 }
 0x153   : > { %v2660_v48 = vld [vmem:[#allocation3 + $0x49] sm:$0xff]  ;;  %v2754_v5 = vmax.f32 %v2690_v45, %v2722_v33  ;;  %v2786_v22 = vld [vmem:[#allocation3 + $0x33] sm:$0xff]  ;;  %v2755_v62 = vmax.f32 %v2691_v29, %v2723_v47  ;;  %v3444_v15 = vmax.f32 %v7462_v30, %v5852_v7  ;;  %v3350_v45 = vmax.f32 %v5855_v42, %v5857_v21  ;;  %v2851_v33 = vld [vmem:[#allocation3 + $0x3c] sm:$0xff] }
 0x154   : > { %4634 = vmatmul.msk.f32.gmra.mxu1 %vm638_vm1, %v7461_v36  ;;  %v2661_v35 = vld [vmem:[#allocation3 + $0x51] sm:$0xff]  ;;  %v2692_v34 = vmax.f32 %v2628_v24, %v2660_v48  ;;  %v2630_v19 = vld [vmem:[#allocation3 + $0x60] sm:$0xff]  ;;  %v7463_v49 = vld [vmem:[#allocation25_spill] sm:$0xff] }
 0x155   : > { %4657 = vmatmul.msk.f32.gmra.mxu2 %vm638_vm1, %v5724_v63  ;;  %v2542_v63 = vmax.f32 %v2446_v50, %v5834_v27  ;;  %v2693_v46 = vmax.f32 %v2629_v6, %v2661_v35  ;;  %v2724_v28 = vld [vmem:[#allocation3 + $0x4a] sm:$0xff]  ;;  %v2725_v38 = vld [vmem:[#allocation3 + $0x52] sm:$0xff]  ;;  %v2818_v10 = vmax.f32 %v2754_v5, %v2786_v22  ;;  %v2662_v43 = vld [vmem:[#allocation3 + $0x61] sm:$0xff]  ;;  %v2819_v52 = vmax.f32 %v2755_v62, %v2787_v55 }
 0x156   : > { %v5866_v50 = vld [vmem:[#allocation2 + $0x28] sm:$0xf]  ;;  %v2756_v16 = vmax.f32 %v2692_v34, %v2724_v28  ;;  %v2850_v61 = vld [vmem:[#allocation3 + $0x34] sm:$0xff]  ;;  %v3398_v36 = vld [vmem:[#allocation2 + $0x40] sm:$0xf]  ;;  %v2694_v59 = vmax.f32 %v2630_v19, %v2662_v43  ;;  %v1450_v6 = vmax.f32 %v1353_v32, %v5888_v40 }
 0x157   : > { %2590 = vst.msk [vmem:[#allocation3 + $0x80] sm:$0xff] %vm638_vm1, %v2542_v63  ;;  %v2631_v56 = vld [vmem:[#allocation3 + $0x68] sm:$0xff]  ;;  %v5876_v63 = vpop.f32.mrf.mxu1  ;;  %v2757_v51 = vmax.f32 %v2693_v46, %v2725_v38  ;;  %v2789_v12 = vld [vmem:[#allocation3 + $0x53] sm:$0xff]  ;;  %v5880_v11 = vmax.f32 %v2818_v10, %v2850_v61  ;;  %v5891_v21 = vmax.f32 %v2819_v52, %v2851_v33  ;;  %v3353_v28 = vmax.f32 %v5866_v50, %v5868_v58 }
 0x158   : > { %v2663_v17 = vld [vmem:[#allocation3 + $0x69] sm:$0xff]  ;;  %v2632_v14 = vld [vmem:[#allocation3 + $0x78] sm:$0xff]  ;;  %v5896_v55 = vld [vmem:[#allocation3 + $0xc1] sm:$0xff]  ;;  %1498 = vst.msk [vmem:[#allocation3 + $0x110] sm:$0xff] %vm638_vm1, %v1450_v6  ;;  %v5905_v37 = vmax.f32 %v3350_v45, %v3398_v36 }
 0x159   : > { %v2788_v20 = vld [vmem:[#allocation3 + $0x4b] sm:$0xff]  ;;  %v2695_v3 = vmax.f32 %v2631_v56, %v2663_v17  ;;  %v2726_v24 = vld [vmem:[#allocation3 + $0x62] sm:$0xff]  ;;  %v2821_v42 = vmax.f32 %v2757_v51, %v2789_v12  ;;  %3224 = vst.msk [vmem:[#allocation2 + $0x62] sm:$0xff] %vm638_vm1, %v5880_v11  ;;  %v4786_v34 = vld [vmem:[#allocation2 + $0x18] sm:$0xff]  ;;  %4684 = vmatmul.msk.f32.gmra.mxu3 %vm638_vm1, %v5880_v11 }
 0x15a   : > { %v2820_v29 = vmax.f32 %v2756_v16, %v2788_v20  ;;  %v5886_v47 = vld [vmem:[#allocation2 + $0x48] sm:$0xff]  ;;  %v2758_v35 = vmax.f32 %v2694_v59, %v2726_v24  ;;  %v3351_v62 = vmax.f32 %v4786_v34, %v5852_v7  ;;  %v2853_v61 = vld [vmem:[#allocation3 + $0x54] sm:$0xff]  ;;  %3225 = vst.msk [vmem:[#allocation2 + $0x6a] sm:$0xff] %vm638_vm1, %v5891_v21  ;;  %v5913_v51 = vld [vmem:[#allocation3 + $0xc0] sm:$0xff] }
 0x15b   : > { %v2727_v22 = vld [vmem:[#allocation3 + $0x6a] sm:$0xff]  ;;  %v5911_v59 = vmax.f32 %v2821_v42, %v2853_v61  ;;  %v3540_v36 = vmax.f32 %v3444_v15, %v5886_v47  ;;  %v5922_v24 = vld [vmem:[#allocation2 + $0xa0] sm:$0xf]  ;;  %v1592_v15 = vmax.f32 %v5913_v51, %v5896_v55 }
 0x15c   : > { %4635 = vmatmul.msk.f32.gmra.mxu1 %vm638_vm1, %v7463_v49  ;;  %v2759_v19 = vmax.f32 %v2695_v3, %v2727_v22  ;;  %v2790_v46 = vld [vmem:[#allocation3 + $0x63] sm:$0xff]  ;;  %v2791_v32 = vld [vmem:[#allocation3 + $0x6b] sm:$0xff]  ;;  %v855_v22 = vld [vmem:[%s5544_s15 + $0x18] sm:$0xff] }
 0x15d   : > { %4658 = vmatmul.msk.f32.gmra.mxu2 %vm638_vm1, %v5731_v25  ;;  %v5870_v25 = vld [vmem:[#allocation2 + $0x20] sm:$0xff]  ;;  %v7464_v38 = vld [vmem:[#allocation17_spill] sm:$0xff]  ;;  %v2822_v16 = vmax.f32 %v2758_v35, %v2790_v46  ;;  %v854_v45 = vld [vmem:[%s5544_s15 + $0x10] sm:$0xff]  ;;  %v3354_v35 = vmax.f32 %v5852_v7, %v5886_v47  ;;  %3227 = vst.msk [vmem:[#allocation2 + $0x82] sm:$0xff] %vm638_vm1, %v5911_v59 }
 0x15e   : > { %v3352_v9 = vmax.f32 %v5870_v25, %v5849_v4  ;;  %v2633_v48 = vld [vmem:[#allocation3 + $0x80] sm:$0xff]  ;;  %v3445_v10 = vmax.f32 %v7464_v38, %v5849_v4  ;;  %v2852_v52 = vld [vmem:[#allocation3 + $0x4c] sm:$0xff]  ;;  %v2823_v30 = vmax.f32 %v2759_v19, %v2791_v32  ;;  %v5940_v32 = vld [vmem:[#allocation2 + $0xb8] sm:$0xf] }
 0x15f   : > { %v2664_v5 = vld [vmem:[#allocation3 + $0x79] sm:$0xff]  ;;  %v2665_v31 = vld [vmem:[#allocation3 + $0x81] sm:$0xff]  ;;  %v5909_v17 = vmax.f32 %v2820_v29, %v2852_v52  ;;  %v3262_v34 = vld [vmem:[#allocation2 + $0x50] sm:$0xff] }
 0x160   : > { %v2696_v39 = vmax.f32 %v2632_v14, %v2664_v5  ;;  %v2697_v56 = vmax.f32 %v2633_v48, %v2665_v31  ;;  %v2728_v43 = vld [vmem:[#allocation3 + $0x7a] sm:$0xff]  ;;  %v2729_v50 = vld [vmem:[#allocation3 + $0x82] sm:$0xff]  ;;  %v2855_v14 = vld [vmem:[#allocation3 + $0x6c] sm:$0xff]  ;;  %v765_v5 = vpop.f32.mrf.mxu1  ;;  %v886_v31 = vadd.f32 %v854_v45, %v5876_v63  ;;  %v3355_v55 = vmax.f32 %v5849_v4, %v3262_v34 }
 0x161   : > { %v2854_v49 = vld [vmem:[#allocation3 + $0x64] sm:$0xff]  ;;  %v2792_v12 = vld [vmem:[#allocation3 + $0x7b] sm:$0xff]  ;;  %v5924_v48 = vmax.f32 %v2823_v30, %v2855_v14  ;;  %3226 = vst.msk [vmem:[#allocation2 + $0x7a] sm:$0xff] %vm638_vm1, %v5909_v17  ;;  %v5936_v19 = vadd.f32 %v855_v22, %v765_v5  ;;  %v7465_v46 = vld [vmem:[#allocation6_spill] sm:$0xff]  ;;  %v3448_v63 = vmax.f32 %v3352_v9, %v3262_v34  ;;  %4685 = vmatmul.msk.f32.gmra.mxu3 %vm638_vm1, %v5891_v21 }
 0x162   : > { %v2760_v58 = vmax.f32 %v2696_v39, %v2728_v43  ;;  %v2761_v20 = vmax.f32 %v2697_v56, %v2729_v50  ;;  %v5915_v3 = vmax.f32 %v2822_v16, %v2854_v49  ;;  %v2793_v29 = vld [vmem:[#allocation3 + $0x83] sm:$0xff]  ;;  %v3494_v39 = vld [vmem:[#allocation2 + $0x58] sm:$0xf]  ;;  %v3541_v50 = vmax.f32 %v3445_v10, %v3262_v34  ;;  %v3497_v25 = vld [vmem:[#allocation2 + $0x70] sm:$0xf]  ;;  %919 = vst.msk [vmem:[%s5544_s15 + $0x10] sm:$0xff] %vm604_vm5, %v886_v31 }
 0x163   : > { %v2856_v6 = vld [vmem:[#allocation3 + $0x7c] sm:$0xff]  ;;  %v2857_v7 = vld [vmem:[#allocation3 + $0x84] sm:$0xff]  ;;  %v3308_v16 = vld [vmem:[#allocation2 + $0x58] sm:$0xf]  ;;  %3229 = vst.msk [vmem:[#allocation2 + $0x9a] sm:$0xff] %vm638_vm1, %v5924_v48  ;;  %v3542_v9 = vmax.f32 %v5905_v37, %v3494_v39 }
 0x164   : > { %v2824_v33 = vmax.f32 %v2760_v58, %v2792_v12  ;;  %v2825_v42 = vmax.f32 %v2761_v20, %v2793_v29  ;;  %4636 = vmatmul.msk.f32.gmra.mxu1 %vm638_vm1, %v7465_v46  ;;  %3228 = vst.msk [vmem:[#allocation2 + $0x92] sm:$0xff] %vm638_vm1, %v5915_v3  ;;  %v5950_v43 = vld [vmem:[#allocation2 + $0x60] sm:$0xff]  ;;  %v5952_v52 = vld [vmem:[#allocation2 + $0xb8] sm:$0xf]  ;;  %v5963_v4 = vld [vmem:[#allocation2 + $0x68] sm:$0xff] }
 0x165   : > { %4659 = vmatmul.msk.f32.gmra.mxu2 %vm638_vm1, %v5733_v0  ;;  %v5920_v0 = vmax.f32 %v3351_v62, %v5886_v47  ;;  %v3401_v62 = vld [vmem:[#allocation2 + $0x58] sm:$0xf]  ;;  %v3636_v58 = vmax.f32 %v3540_v36, %v5950_v43  ;;  %v3260_v30 = vld [vmem:[#allocation2 + $0x40] sm:$0xf]  ;;  %v5969_v10 = vmax.f32 %v3354_v35, %v5950_v43  ;;  %v3358_v11 = vmax.f32 %v3262_v34, %v5963_v4  ;;  %v3404_v37 = vld [vmem:[#allocation2 + $0x70] sm:$0xf] }
 0x166   : > { %v5942_v38 = vmax.f32 %v2824_v33, %v2856_v6  ;;  %v3449_v56 = vmax.f32 %v3353_v28, %v3401_v62  ;;  %v5954_v61 = vmax.f32 %v2825_v42, %v2857_v7  ;;  %v3590_v28 = vld [vmem:[#allocation2 + $0x70] sm:$0xf]  ;;  %v3356_v51 = vmax.f32 %v3260_v30, %v3308_v16  ;;  %v1529_v36 = vld [vmem:[#allocation3 + $0xc8] sm:$0xff]  ;;  %v1530_v5 = vld [vmem:[#allocation3 + $0xd8] sm:$0xff]  ;;  %920 = vst.msk [vmem:[%s5544_s15 + $0x18] sm:$0xff] %vm604_vm5, %v5936_v19 }
 0x167   : > { %v3543_v49 = vmax.f32 %v5920_v0, %v5950_v43  ;;  %v3451_v20 = vmax.f32 %v3355_v55, %v5963_v4  ;;  %v3544_v12 = vmax.f32 %v3448_v63, %v5963_v4  ;;  %v1561_v45 = vld [vmem:[#allocation3 + $0xc9] sm:$0xff]  ;;  %v3637_v0 = vmax.f32 %v3541_v50, %v5963_v4  ;;  %3684 = vst.msk [vmem:[#allocation3] sm:$0xff] %vm638_vm1, %v3636_v58  ;;  %v1562_v22 = vld [vmem:[#allocation3 + $0xd9] sm:$0xff] }
 0x168   : > { %3230 = vst.msk [vmem:[#allocation2 + $0xaa] sm:$0xff] %vm638_vm1, %v5942_v38  ;;  %v3545_v14 = vmax.f32 %v3449_v56, %v3497_v25  ;;  %v3638_v29 = vmax.f32 %v3542_v9, %v3590_v28  ;;  %v3452_v33 = vmax.f32 %v3356_v51, %v3404_v37  ;;  %v1624_v6 = vld [vmem:[#allocation3 + $0xc2] sm:$0xff]  ;;  %v5982_v35 = vld [vmem:[#allocation2 + $0x78] sm:$0xff]  ;;  %v3357_v42 = vmax.f32 %v5886_v47, %v5950_v43  ;;  %v1625_v25 = vld [vmem:[#allocation3 + $0xca] sm:$0xff] }
 0x169   : > { %3231 = vst.msk [vmem:[#allocation2 + $0xb2] sm:$0xff] %vm638_vm1, %v5954_v61  ;;  %v5986_v34 = vmax.f32 %v1592_v15, %v1624_v6  ;;  %v5988_v62 = vld [vmem:[#allocation2 + $0x80] sm:$0xff]  ;;  %v3593_v39 = vld [vmem:[#allocation2 + $0x88] sm:$0xf]  ;;  %v3546_v46 = vmax.f32 %v5969_v10, %v5982_v35  ;;  %v1593_v31 = vmax.f32 %v1529_v36, %v1561_v45  ;;  %v1594_v55 = vmax.f32 %v1530_v5, %v1562_v22  ;;  %v1532_v22 = vld [vmem:[#allocation3 + $0xf0] sm:$0xff] }
 0x16a   : > { %3685 = vst.msk [vmem:[#allocation3 + $0x8] sm:$0xff] %vm638_vm1, %v3637_v0  ;;  %v5993_v7 = vld [vmem:[#allocation3 + $0xc3] sm:$0xff]  ;;  %v1626_v63 = vld [vmem:[#allocation3 + $0xda] sm:$0xff]  ;;  %v3454_v47 = vmax.f32 %v3358_v11, %v5988_v62  ;;  %v3547_v15 = vmax.f32 %v3451_v20, %v5988_v62  ;;  %v3640_v56 = vmax.f32 %v3544_v12, %v5988_v62  ;;  %v3641_v16 = vmax.f32 %v3545_v14, %v3593_v39 }
 0x16b   : > { %3686 = vst.msk [vmem:[#allocation3 + $0x10] sm:$0xf] %vm951_vm4, %v3638_v29  ;;  %v856_v50 = vld [vmem:[%s5544_s15 + $0x20] sm:$0xff]  ;;  %v6000_v58 = vld [vmem:[#allocation2 + $0x90] sm:$0xff]  ;;  %v3500_v30 = vld [vmem:[#allocation2 + $0x88] sm:$0xf]  ;;  %v3639_v28 = vmax.f32 %v3543_v49, %v5982_v35  ;;  %v3453_v51 = vmax.f32 %v3357_v42, %v5982_v35  ;;  %v1720_v19 = vmax.f32 %v5986_v34, %v5993_v7  ;;  %v1657_v6 = vmax.f32 %v1593_v31, %v1625_v25 }
 0x16c   : > { %v6002_v9 = vld [vmem:[#allocation2 + $0x98] sm:$0xff]  ;;  %v3548_v10 = vmax.f32 %v3452_v33, %v3500_v30  ;;  %v1531_v11 = vld [vmem:[#allocation3 + $0xe0] sm:$0xff]  ;;  %3689 = vst.msk [vmem:[#allocation3 + $0x28] sm:$0xf] %vm951_vm4, %v3641_v16  ;;  %v1658_v5 = vmax.f32 %v1594_v55, %v1626_v63  ;;  %v3642_v39 = vmax.f32 %v3546_v46, %v6000_v58  ;;  %v1689_v7 = vld [vmem:[#allocation3 + $0xcb] sm:$0xff]  ;;  %4686 = vmatmul.msk.f32.gmra.mxu3 %vm638_vm1, %v5909_v17 }
 0x16d   : > { %4660 = vmatmul.msk.f32.gmra.mxu2 %vm638_vm1, %v5742_v23  ;;  %v768_v23 = vpop.f32.mrf.mxu1  ;;  %v1563_v20 = vld [vmem:[#allocation3 + $0xe1] sm:$0xff]  ;;  %v3550_v12 = vmax.f32 %v3454_v47, %v6002_v9  ;;  %v3643_v14 = vmax.f32 %v3547_v15, %v6002_v9  ;;  %v7466_v49 = vld [vmem:[#allocation7_spill] sm:$0xff]  ;;  %3688 = vst.msk [vmem:[#allocation3 + $0x20] sm:$0xff] %vm638_vm1, %v3640_v56  ;;  %v3549_v33 = vmax.f32 %v3453_v51, %v6000_v58  ;;  %v1753_v46 = vld [vmem:[#allocation3 + $0xcc] sm:$0xff] }
 0x16e   : > { %v3596_v37 = vld [vmem:[#allocation2 + $0xa0] sm:$0xf]  ;;  %4637 = vmatmul.msk.f32.gmra.mxu1 %vm638_vm1, %v7466_v49  ;;  %v888_v29 = vadd.f32 %v856_v50, %v768_v23  ;;  %v1595_v47 = vmax.f32 %v1531_v11, %v1563_v20  ;;  %v1564_v15 = vld [vmem:[#allocation3 + $0xf1] sm:$0xff]  ;;  %3687 = vst.msk [vmem:[#allocation3 + $0x18] sm:$0xff] %vm638_vm1, %v3639_v28  ;;  %v1752_v23 = vld [vmem:[#allocation3 + $0xc4] sm:$0xff]  ;;  %v1721_v31 = vmax.f32 %v1657_v6, %v1689_v7 }
 0x16f   : > { %v6014_v36 = vld [vmem:[#allocation2 + $0xa8] sm:$0xff]  ;;  %v1690_v45 = vld [vmem:[#allocation3 + $0xdb] sm:$0xff]  ;;  %3691 = vst.msk [vmem:[#allocation3 + $0x38] sm:$0xff] %vm638_vm1, %v3643_v14  ;;  %v3644_v56 = vmax.f32 %v3548_v10, %v3596_v37  ;;  %v1628_v63 = vld [vmem:[#allocation3 + $0xf2] sm:$0xff]  ;;  %v1596_v11 = vmax.f32 %v1532_v22, %v1564_v15  ;;  %v2257_v17 = vmax.f32 %v5786_v57, %v5799_v13 }
 0x170   : > { %v6020_v0 = vld [vmem:[#allocation2 + $0xb0] sm:$0xff]  ;;  %v1627_v21 = vld [vmem:[#allocation3 + $0xe2] sm:$0xff]  ;;  %v3645_v50 = vmax.f32 %v3549_v33, %v6014_v36  ;;  %v1722_v30 = vmax.f32 %v1658_v5, %v1690_v45  ;;  %921 = vst.msk [vmem:[%s5544_s15 + $0x20] sm:$0xff] %vm604_vm5, %v888_v29  ;;  %v6037_v22 = vmax.f32 %v1721_v31, %v1753_v46 }
 0x171   : > { %v3646_v42 = vmax.f32 %v3550_v12, %v6020_v0  ;;  %v3732_v34 = vld [vmem:[#allocation3] sm:$0xff]  ;;  %v1659_v51 = vmax.f32 %v1595_v47, %v1627_v21  ;;  %v3733_v10 = vld [vmem:[#allocation3 + $0x8] sm:$0xff]  ;;  %v1784_v12 = vmax.f32 %v1720_v19, %v1752_v23  ;;  %3690 = vst.msk [vmem:[#allocation3 + $0x30] sm:$0xff] %vm638_vm1, %v3642_v39  ;;  %v1660_v6 = vmax.f32 %v1596_v11, %v1628_v63  ;;  %v1692_v33 = vld [vmem:[#allocation3 + $0xf3] sm:$0xff] }
 0x172   : > { %v1691_v55 = vld [vmem:[#allocation3 + $0xe3] sm:$0xff]  ;;  %3692 = vst.msk [vmem:[#allocation3 + $0x40] sm:$0xf] %vm951_vm4, %v3644_v56  ;;  %v2256_v19 = vmax.f32 %v5772_v60, %v5796_v26  ;;  %v1756_v31 = vld [vmem:[#allocation3 + $0xf4] sm:$0xff] }
 0x173   : > { %3694 = vst.msk [vmem:[#allocation3 + $0x50] sm:$0xff] %vm638_vm1, %v3646_v42  ;;  %v3764_v16 = vld [vmem:[#allocation3 + $0x1] sm:$0xff]  ;;  %v3765_v20 = vld [vmem:[#allocation3 + $0x9] sm:$0xff]  ;;  %v1723_v49 = vmax.f32 %v1659_v51, %v1691_v55  ;;  %v1533_v42 = vld [vmem:[#allocation3 + $0xf8] sm:$0xff]  ;;  %v1724_v23 = vmax.f32 %v1660_v6, %v1692_v33 }
 0x174   : > { %v1754_v25 = vld [vmem:[#allocation3 + $0xdc] sm:$0xff]  ;;  %v3796_v28 = vmax.f32 %v3732_v34, %v3764_v16  ;;  %v1755_v14 = vld [vmem:[#allocation3 + $0xe4] sm:$0xff]  ;;  %v3797_v5 = vmax.f32 %v3733_v10, %v3765_v20  ;;  %3693 = vst.msk [vmem:[#allocation3 + $0x48] sm:$0xff] %vm638_vm1, %v3645_v50  ;;  %v2352_v11 = vmax.f32 %v2256_v19, %v5812_v44  ;;  %4687 = vmatmul.msk.f32.gmra.mxu3 %vm638_vm1, %v5911_v59 }
 0x175   : > { %4661 = vmatmul.msk.f32.gmra.mxu2 %vm638_vm1, %v5751_v41  ;;  %v771_v41 = vpop.f32.mrf.mxu1  ;;  %v3828_v37 = vld [vmem:[#allocation3 + $0x2] sm:$0xff]  ;;  %v1565_v34 = vld [vmem:[#allocation3 + $0xf9] sm:$0xff]  ;;  %v6046_v47 = vmax.f32 %v1722_v30, %v1754_v25  ;;  %2126 = vst.msk [vmem:[#allocation2 + $0xf2] sm:$0xff] %vm638_vm1, %v1784_v12  ;;  %v6049_v56 = vmax.f32 %v1723_v49, %v1755_v14  ;;  %v3829_v16 = vld [vmem:[#allocation3 + $0xa] sm:$0xff]  ;;  %v2258_v30 = vmax.f32 %v5922_v24, %v5952_v52 }
 0x176   : > { %v3860_v45 = vmax.f32 %v3796_v28, %v3828_v37  ;;  %v857_v21 = vld [vmem:[%s5544_s15 + $0x28] sm:$0xff]  ;;  %v1597_v60 = vmax.f32 %v1533_v42, %v1565_v34  ;;  %v1629_v55 = vld [vmem:[#allocation3 + $0xfa] sm:$0xff]  ;;  %v3861_v46 = vmax.f32 %v3797_v5, %v3829_v16  ;;  %2127 = vst.msk [vmem:[#allocation2 + $0xfa] sm:$0xff] %vm638_vm1, %v6037_v22  ;;  %v6063_v57 = vmax.f32 %v1724_v23, %v1756_v31  ;;  %v3311_v52 = vld [vmem:[#allocation2 + $0x70] sm:$0xf] }
 0x177   : > { %v3892_v7 = vld [vmem:[#allocation3 + $0x3] sm:$0xff]  ;;  %v889_v29 = vadd.f32 %v857_v21, %v771_v41  ;;  %v3734_v25 = vld [vmem:[#allocation3 + $0x18] sm:$0xff]  ;;  %2128 = vst.msk [vmem:[#allocation2 + $0x10a] sm:$0xff] %vm638_vm1, %v6046_v47  ;;  %v3893_v41 = vld [vmem:[#allocation3 + $0xb] sm:$0xff]  ;;  %v2353_v37 = vmax.f32 %v2257_v17, %v5816_v1 }
 0x178   : > { %v7467_v39 = vld [vmem:[#allocation9_spill] sm:$0xff]  ;;  %v3924_v15 = vmax.f32 %v3860_v45, %v3892_v7  ;;  %v3766_v51 = vld [vmem:[#allocation3 + $0x19] sm:$0xff]  ;;  %v1661_v28 = vmax.f32 %v1597_v60, %v1629_v55  ;;  %2129 = vst.msk [vmem:[#allocation2 + $0x112] sm:$0xff] %vm638_vm1, %v6049_v56  ;;  %v2306_v14 = vld [vmem:[#allocation2 + $0xd0] sm:$0xf]  ;;  %v3925_v33 = vmax.f32 %v3861_v46, %v3893_v41 }
 0x179   : > { %4638 = vmatmul.msk.f32.gmra.mxu1 %vm638_vm1, %v7467_v39  ;;  %v3956_v63 = vld [vmem:[#allocation3 + $0x4] sm:$0xff]  ;;  %922 = vst.msk [vmem:[%s5544_s15 + $0x28] sm:$0xff] %vm604_vm5, %v889_v29  ;;  %v1693_v10 = vld [vmem:[#allocation3 + $0xfb] sm:$0xff]  ;;  %v858_v49 = vld [vmem:[%s5544_s15 + $0x30] sm:$0xff]  ;;  %v3798_v42 = vmax.f32 %v3734_v25, %v3766_v51  ;;  %v2354_v45 = vmax.f32 %v2258_v30, %v2306_v14 }
 0x17a   : > { %v3988_v50 = vmax.f32 %v3924_v15, %v3956_v63  ;;  %v1757_v20 = vld [vmem:[#allocation3 + $0xfc] sm:$0xff]  ;;  %2130 = vst.msk [vmem:[#allocation2 + $0x122] sm:$0xff] %vm638_vm1, %v6063_v57  ;;  %v1725_v6 = vmax.f32 %v1661_v28, %v1693_v10  ;;  %v3263_v21 = vld [vmem:[#allocation2 + $0x58] sm:$0xf]  ;;  %v2213_v34 = vld [vmem:[#allocation2 + $0xd0] sm:$0xf]  ;;  %v2260_v15 = vmax.f32 %v5799_v13, %v5816_v1  ;;  %v2262_v13 = vmax.f32 %v5812_v44, %v5831_v53 }
 0x17b   : > { %v3359_v7 = vmax.f32 %v3263_v21, %v3311_v52  ;;  %v7468_v19 = vld [vmem:[#allocation12_spill] sm:$0xff]  ;;  %v3957_v39 = vld [vmem:[#allocation3 + $0xc] sm:$0xff]  ;;  %v2261_v23 = vmax.f32 %v5940_v32, %v2213_v34  ;;  %v2402_v31 = vld [vmem:[#allocation2 + $0xe8] sm:$0xf]  ;;  %v2449_v32 = vmax.f32 %v2353_v37, %v5834_v27 }
 0x17c   : > { %4714 = vmatmul.msk.f32.vlgmr.msrb.gmra.mxu0 %vm638_vm1, %v3988_v50  ;;  %v6079_v29 = vmax.f32 %v1725_v6, %v1757_v20  ;;  %v3830_v60 = vld [vmem:[#allocation3 + $0x1a] sm:$0xff]  ;;  %v3407_v63 = vld [vmem:[#allocation2 + $0x88] sm:$0xf]  ;;  %v3989_v16 = vmax.f32 %v3925_v33, %v3957_v39  ;;  %v6092_v46 = vld [vmem:[#allocation2 + $0xf0] sm:$0xff]  ;;  %v2356_v20 = vmax.f32 %v2260_v15, %v5834_v27  ;;  %4688 = vmatmul.msk.f32.gmra.mxu3 %vm638_vm1, %v5915_v3 }
 0x17d   : > { %4662 = vmatmul.msk.f32.gmra.mxu2 %vm638_vm1, %v1784_v12  ;;  %v774_v24 = vpop.f32.mrf.mxu1  ;;  %v2259_v12 = vmax.f32 %v5796_v26, %v5812_v44  ;;  %v2448_v26 = vmax.f32 %v2352_v11, %v5831_v53  ;;  %v3735_v59 = vld [vmem:[#allocation3 + $0x20] sm:$0xff]  ;;  %v3862_v17 = vmax.f32 %v3798_v42, %v3830_v60  ;;  %v2216_v25 = vld [vmem:[#allocation2 + $0xe8] sm:$0xf]  ;;  %v2450_v11 = vmax.f32 %v2354_v45, %v2402_v31  ;;  %v859_v52 = vld [vmem:[%s5544_s15 + $0x38] sm:$0xff] }
 0x17e   : > { %v890_v5 = vadd.f32 %v858_v49, %v774_v24  ;;  %2131 = vst.msk [vmem:[#allocation2 + $0x12a] sm:$0xff] %vm638_vm1, %v6079_v29  ;;  %v3767_v50 = vld [vmem:[#allocation3 + $0x21] sm:$0xff]  ;;  %v3455_v10 = vmax.f32 %v3359_v7, %v3407_v63  ;;  %v2263_v44 = vmax.f32 %v5816_v1, %v5834_v27  ;;  %v2168_v37 = vld [vmem:[#allocation2 + $0xd0] sm:$0xf]  ;;  %v6104_v42 = vld [vmem:[#allocation2 + $0xf8] sm:$0xff]  ;;  %v2358_v1 = vmax.f32 %v2262_v13, %v6092_v46 }
 0x17f   : > { %v2355_v55 = vmax.f32 %v2259_v12, %v5831_v53  ;;  %v3503_v30 = vld [vmem:[#allocation2 + $0xa0] sm:$0xf]  ;;  %v2309_v51 = vld [vmem:[#allocation2 + $0xe8] sm:$0xf]  ;;  %v2544_v28 = vmax.f32 %v2448_v26, %v6092_v46  ;;  %v3599_v12 = vld [vmem:[#allocation2 + $0xb8] sm:$0xf]  ;;  %v2545_v34 = vmax.f32 %v2449_v32, %v6104_v42  ;;  %v1163_v26 = vmax.f32 %v5827_v54, %v5843_v18 }
 0x180   : > { %923 = vst.msk [vmem:[%s5544_s15 + $0x30] sm:$0xff] %vm604_vm5, %v890_v5  ;;  %v2357_v41 = vmax.f32 %v2261_v23, %v2309_v51  ;;  %v3894_v14 = vld [vmem:[#allocation3 + $0x1b] sm:$0xff]  ;;  %v3551_v33 = vmax.f32 %v3455_v10, %v3503_v30  ;;  %v2264_v5 = vmax.f32 %v2168_v37, %v2216_v25  ;;  %v3736_v60 = vld [vmem:[#allocation3 + $0x30] sm:$0xff]  ;;  %v6118_v54 = vld [vmem:[#allocation2 + $0x108] sm:$0xff] }
 0x181   : > { %4639 = vmatmul.msk.f32.gmra.mxu1 %vm638_vm1, %v7468_v19  ;;  %v2451_v6 = vmax.f32 %v2355_v55, %v6092_v46  ;;  %2592 = vst.msk [vmem:[#allocation3 + $0x90] sm:$0xff] %vm638_vm1, %v2544_v28  ;;  %v3926_v45 = vmax.f32 %v3862_v17, %v3894_v14  ;;  %v2498_v21 = vld [vmem:[#allocation2 + $0x100] sm:$0xf]  ;;  %v2452_v55 = vmax.f32 %v2356_v20, %v6104_v42  ;;  %v3737_v28 = vld [vmem:[#allocation3 + $0x38] sm:$0xff]  ;;  %v6131_v10 = vld [vmem:[#allocation2 + $0x110] sm:$0xff] }
 0x182   : > { %v3831_v7 = vld [vmem:[#allocation3 + $0x22] sm:$0xff]  ;;  %v3647_v19 = vmax.f32 %v3551_v33, %v3599_v12  ;;  %v2546_v23 = vmax.f32 %v2450_v11, %v2498_v21  ;;  %2593 = vst.msk [vmem:[#allocation3 + $0x98] sm:$0xff] %vm638_vm1, %v2545_v34  ;;  %v2454_v25 = vmax.f32 %v2358_v1, %v6118_v54  ;;  %v6128_v51 = vmax.f32 %v1163_v26, %v5862_v8 }
 0x183   : > { %v2312_v39 = vld [vmem:[#allocation2 + $0x100] sm:$0xf]  ;;  %v2547_v17 = vmax.f32 %v2451_v6, %v6118_v54  ;;  %v3959_v33 = vld [vmem:[#allocation3 + $0x24] sm:$0xff] }
 0x184   : > { %4715 = vmatmul.msk.f32.gmra.mxu0 %vm638_vm1, %v3989_v16  ;;  %v2405_v15 = vld [vmem:[#allocation2 + $0x100] sm:$0xf]  ;;  %3695 = vst.msk [vmem:[#allocation3 + $0x58] sm:$0xf] %vm951_vm4, %v3647_v19  ;;  %v2359_v16 = vmax.f32 %v2263_v44, %v6104_v42  ;;  %v2360_v30 = vmax.f32 %v2264_v5, %v2312_v39  ;;  %v3738_v44 = vld [vmem:[#allocation3 + $0x48] sm:$0xff]  ;;  %v1356_v26 = vmax.f32 %v6128_v51, %v5888_v40 }
 0x185   : > { %4663 = vmatmul.msk.f32.gmra.mxu2 %vm638_vm1, %v6037_v22  ;;  %v777_v24 = vpop.f32.mrf.mxu1  ;;  %v3799_v22 = vmax.f32 %v3735_v59, %v3767_v50  ;;  %v7469_v31 = vld [vmem:[#allocation16_spill] sm:$0xff]  ;;  %v3768_v59 = vld [vmem:[#allocation3 + $0x31] sm:$0xff]  ;;  %v2453_v63 = vmax.f32 %v2357_v41, %v2405_v15  ;;  %2594 = vst.msk [vmem:[#allocation3 + $0xa0] sm:$0xf] %vm951_vm4, %v2546_v23  ;;  %v6141_v34 = vld [vmem:[#allocation3 + $0x108] sm:$0xff]  ;;  %4689 = vmatmul.msk.f32.gmra.mxu3 %vm638_vm1, %v5924_v48 }
 0x186   : > { %v891_v49 = vadd.f32 %v859_v52, %v777_v24  ;;  %v3958_v18 = vld [vmem:[#allocation3 + $0x1c] sm:$0xff]  ;;  %v2501_v50 = vld [vmem:[#allocation2 + $0x118] sm:$0xf]  ;;  %v3800_v11 = vmax.f32 %v3736_v60, %v3768_v59  ;;  %2595 = vst.msk [vmem:[#allocation3 + $0xa8] sm:$0xff] %vm638_vm1, %v2547_v17  ;;  %v2504_v21 = vld [vmem:[#allocation2 + $0x130] sm:$0xf] }
 0x187   : > { %v3863_v3 = vmax.f32 %v3799_v22, %v3831_v7  ;;  %v3990_v13 = vmax.f32 %v3926_v45, %v3958_v18  ;;  %v3895_v32 = vld [vmem:[#allocation3 + $0x23] sm:$0xff]  ;;  %v2408_v24 = vld [vmem:[#allocation2 + $0x118] sm:$0xf]  ;;  %v2549_v12 = vmax.f32 %v2453_v63, %v2501_v50  ;;  %v3360_v50 = vmax.f32 %v5950_v43, %v5982_v35  ;;  %v3266_v51 = vld [vmem:[#allocation2 + $0x70] sm:$0xf] }
 0x188   : > { %924 = vst.msk [vmem:[%s5544_s15 + $0x38] sm:$0xff] %vm604_vm5, %v891_v49  ;;  %v3769_v52 = vld [vmem:[#allocation3 + $0x39] sm:$0xff]  ;;  %v3770_v22 = vld [vmem:[#allocation3 + $0x49] sm:$0xff]  ;;  %v2455_v49 = vmax.f32 %v2359_v16, %v6131_v10  ;;  %v2456_v5 = vmax.f32 %v2360_v30, %v2408_v24 }
 0x189   : > { %4640 = vmatmul.msk.f32.gmra.mxu1 %vm638_vm1, %v7469_v31  ;;  %v860_v41 = vld [vmem:[%s5544_s15 + $0x40] sm:$0xff]  ;;  %v3927_v14 = vmax.f32 %v3863_v3, %v3895_v32  ;;  %v2634_v37 = vld [vmem:[#allocation3 + $0x90] sm:$0xff]  ;;  %v3801_v19 = vmax.f32 %v3737_v28, %v3769_v52  ;;  %v2635_v39 = vld [vmem:[#allocation3 + $0x98] sm:$0xff]  ;;  %2597 = vst.msk [vmem:[#allocation3 + $0xb8] sm:$0xf] %vm951_vm4, %v2549_v12 }
 0x18a   : > { %v6137_v6 = vld [vmem:[#allocation2 + $0x120] sm:$0xff]  ;;  %v3832_v45 = vld [vmem:[#allocation3 + $0x32] sm:$0xff]  ;;  %v1566_v31 = vld [vmem:[#allocation3 + $0x109] sm:$0xff]  ;;  %v2552_v28 = vmax.f32 %v2456_v5, %v2504_v21 }
 0x18b   : > { %v2550_v1 = vmax.f32 %v2454_v25, %v6137_v6  ;;  %v6145_v7 = vmax.f32 %v3800_v11, %v3832_v45  ;;  %v2666_v15 = vld [vmem:[#allocation3 + $0x91] sm:$0xff]  ;;  %v7470_v23 = vld [vmem:[#allocation20_spill] sm:$0xff]  ;;  %v6154_v18 = vld [vmem:[#allocation2 + $0x128] sm:$0xff]  ;;  %v3991_v3 = vmax.f32 %v3927_v14, %v3959_v33  ;;  %v1598_v24 = vmax.f32 %v6141_v34, %v1566_v31  ;;  %v1918_v33 = vpop.f32.mrf.mxu2 }
 0x18c   : > { %4716 = vmatmul.msk.f32.gmra.mxu0 %vm638_vm1, %v3990_v13  ;;  %v3896_v60 = vld [vmem:[#allocation3 + $0x33] sm:$0xff]  ;;  %v2698_v63 = vmax.f32 %v2634_v37, %v2666_v15  ;;  %v3834_v16 = vld [vmem:[#allocation3 + $0x4a] sm:$0xff]  ;;  %v2551_v13 = vmax.f32 %v2455_v49, %v6154_v18  ;;  %v2014_v32 = vld [vmem:[%s5544_s15] sm:$0xff]  ;;  %2600 = vst.msk [vmem:[#allocation3 + $0xd0] sm:$0xf] %vm951_vm4, %v2552_v28 }
 0x18d   : > { %4664 = vmatmul.msk.f32.gmra.mxu2 %vm638_vm1, %v6046_v47  ;;  %v780_v20 = vpop.f32.mrf.mxu1  ;;  %v2548_v47 = vmax.f32 %v2452_v55, %v6131_v10  ;;  %v3833_v59 = vld [vmem:[#allocation3 + $0x3a] sm:$0xff]  ;;  %v3802_v55 = vmax.f32 %v3738_v44, %v3770_v22  ;;  %v2730_v17 = vld [vmem:[#allocation3 + $0x92] sm:$0xff]  ;;  %2598 = vst.msk [vmem:[#allocation3 + $0xc0] sm:$0xff] %vm638_vm1, %v2550_v1  ;;  %v3314_v11 = vld [vmem:[#allocation2 + $0x88] sm:$0xf]  ;;  %v3928_v44 = vmax.f32 %v6145_v7, %v3896_v60 }
 0x18e   : > { %v892_v8 = vadd.f32 %v860_v41, %v780_v20  ;;  %v2667_v48 = vld [vmem:[#allocation3 + $0x99] sm:$0xff]  ;;  %v2762_v25 = vmax.f32 %v2698_v63, %v2730_v17  ;;  %v1630_v52 = vld [vmem:[#allocation3 + $0x10a] sm:$0xff]  ;;  %v6165_v43 = vmax.f32 %v3801_v19, %v3833_v59  ;;  %2599 = vst.msk [vmem:[#allocation3 + $0xc8] sm:$0xff] %vm638_vm1, %v2551_v13  ;;  %v2046_v34 = vadd.f32 %v2014_v32, %v1918_v33 }
 0x18f   : > { %2596 = vst.msk [vmem:[#allocation3 + $0xb0] sm:$0xff] %vm638_vm1, %v2548_v47  ;;  %v2699_v30 = vmax.f32 %v2635_v39, %v2667_v48  ;;  %v2731_v20 = vld [vmem:[#allocation3 + $0x9a] sm:$0xff]  ;;  %v3361_v47 = vmax.f32 %v5963_v4, %v5988_v62  ;;  %v2636_v12 = vld [vmem:[#allocation3 + $0xa8] sm:$0xff]  ;;  %v3362_v19 = vmax.f32 %v3266_v51, %v3314_v11  ;;  %v1662_v63 = vmax.f32 %v1598_v24, %v1630_v52  ;;  %v6201_v24 = vld [vmem:[#allocation3 + $0x110] sm:$0xff] }
 0x190   : > { %925 = vst.msk [vmem:[%s5544_s15 + $0x40] sm:$0xff] %vm604_vm5, %v892_v8  ;;  %v2794_v41 = vld [vmem:[#allocation3 + $0x93] sm:$0xff]  ;;  %v6170_v14 = vld [vmem:[#allocation2 + $0x188] sm:$0xff]  ;;  %v6174_v8 = vmax.f32 %v3802_v55, %v3834_v16  ;;  %v2795_v5 = vld [vmem:[#allocation3 + $0x9b] sm:$0xff]  ;;  %4690 = vmatmul.msk.f32.gmra.mxu3 %vm638_vm1, %v5942_v38  ;;  %v2265_v48 = vmax.f32 %v5831_v53, %v6092_v46 }
 0x191   : > { %4641 = vmatmul.msk.f32.gmra.mxu1 %vm638_vm1, %v7470_v23  ;;  %v3960_v22 = vld [vmem:[#allocation3 + $0x34] sm:$0xff]  ;;  %v861_v49 = vld [vmem:[%s5544_s15 + $0x48] sm:$0xff]  ;;  %v2763_v45 = vmax.f32 %v2699_v30, %v2731_v20  ;;  %v2826_v1 = vmax.f32 %v2762_v25, %v2794_v41  ;;  %v3410_v59 = vld [vmem:[#allocation2 + $0xa0] sm:$0xf]  ;;  %2078 = vst.msk [vmem:[%s5544_s15] sm:$0xff] %vm604_vm5, %v2046_v34 }
 0x192   : > { %v1694_v4 = vld [vmem:[#allocation3 + $0x10b] sm:$0xff]  ;;  %v2858_v7 = vld [vmem:[#allocation3 + $0x94] sm:$0xff]  ;;  %v3992_v16 = vmax.f32 %v3928_v44, %v3960_v22  ;;  %v2859_v17 = vld [vmem:[#allocation3 + $0x9c] sm:$0xff]  ;;  %v6211_v41 = vmax.f32 %v3362_v19, %v3410_v59  ;;  %v3363_v22 = vmax.f32 %v5982_v35, %v6000_v58 }
 0x193   : > { %v6182_v23 = vld [vmem:[#allocation3 + $0x3b] sm:$0xff]  ;;  %v2827_v31 = vmax.f32 %v2763_v45, %v2795_v5  ;;  %v6184_v60 = vmax.f32 %v2826_v1, %v2858_v7  ;;  %v1726_v28 = vmax.f32 %v1662_v63, %v1694_v4  ;;  %v6203_v52 = vld [vmem:[#allocation3 + $0x111] sm:$0xff]  ;;  %v6224_v1 = vld [vmem:[#allocation2 + $0x88] sm:$0xf]  ;;  %v1921_v63 = vpop.f32.mrf.mxu2 }
 0x194   : > { %4717 = vmatmul.msk.f32.gmra.mxu0 %vm638_vm1, %v3991_v3  ;;  %v1758_v3 = vld [vmem:[#allocation3 + $0x10c] sm:$0xff]  ;;  %v7471_v30 = vld [vmem:[#allocation23_spill] sm:$0xff]  ;;  %v2638_v11 = vld [vmem:[#allocation3 + $0xc0] sm:$0xff]  ;;  %v3929_v44 = vmax.f32 %v6165_v43, %v6182_v23  ;;  %v1599_v59 = vmax.f32 %v6201_v24, %v6203_v52 }
 0x195   : > { %4665 = vmatmul.msk.f32.gmra.mxu2 %vm638_vm1, %v6049_v56  ;;  %v1453_v56 = vmax.f32 %v1356_v26, %v6170_v14  ;;  %v783_v37 = vpop.f32.mrf.mxu1  ;;  %v6179_v26 = vmax.f32 %v3360_v50, %v6000_v58  ;;  %v6193_v50 = vmax.f32 %v3361_v47, %v6002_v9  ;;  %v6199_v25 = vmax.f32 %v2827_v31, %v2859_v17  ;;  %v6213_v47 = vld [vmem:[#allocation2 + $0xb8] sm:$0xf]  ;;  %v2639_v4 = vld [vmem:[#allocation3 + $0xc8] sm:$0xff]  ;;  %v1536_v24 = vld [vmem:[#allocation3 + $0x120] sm:$0xff] }
 0x196   : > { %v893_v21 = vadd.f32 %v861_v49, %v783_v37  ;;  %v2637_v39 = vld [vmem:[#allocation3 + $0xb0] sm:$0xff]  ;;  %3232 = vst.msk [vmem:[#allocation2 + $0xc2] sm:$0xff] %vm638_vm1, %v6184_v60  ;;  %v6217_v37 = vld [vmem:[#allocation2 + $0xa0] sm:$0xf]  ;;  %v2015_v49 = vld [vmem:[%s5544_s15 + $0x8] sm:$0xff]  ;;  %v6226_v34 = vmax.f32 %v1726_v28, %v1758_v3 }
 0x197   : > { %v2668_v15 = vld [vmem:[#allocation3 + $0xa9] sm:$0xff]  ;;  %1501 = vst.msk [vmem:[#allocation3 + $0x128] sm:$0xff] %vm638_vm1, %v1453_v56  ;;  %v2669_v13 = vld [vmem:[#allocation3 + $0xb1] sm:$0xff]  ;;  %v3552_v20 = vmax.f32 %v6179_v26, %v6014_v36  ;;  %v3553_v35 = vmax.f32 %v6193_v50, %v6020_v0 }
 0x198   : > { %v2700_v55 = vmax.f32 %v2636_v12, %v2668_v15  ;;  %926 = vst.msk [vmem:[%s5544_s15 + $0x48] sm:$0xff] %vm604_vm5, %v893_v21  ;;  %v2732_v32 = vld [vmem:[#allocation3 + $0xaa] sm:$0xff]  ;;  %v2701_v51 = vmax.f32 %v2637_v39, %v2669_v13  ;;  %v2733_v12 = vld [vmem:[#allocation3 + $0xb2] sm:$0xff]  ;;  %v2670_v21 = vld [vmem:[#allocation3 + $0xc1] sm:$0xff]  ;;  %v3364_v39 = vmax.f32 %v5988_v62, %v6002_v9  ;;  %4691 = vmatmul.msk.f32.gmra.mxu3 %vm638_vm1, %v5954_v61 }
 0x199   : > { %4642 = vmatmul.msk.f32.gmra.mxu1 %vm638_vm1, %v7471_v30  ;;  %v2796_v56 = vld [vmem:[#allocation3 + $0xab] sm:$0xff]  ;;  %3233 = vst.msk [vmem:[#allocation2 + $0xca] sm:$0xff] %vm638_vm1, %v6199_v25  ;;  %v2797_v7 = vld [vmem:[#allocation3 + $0xb3] sm:$0xff]  ;;  %v2702_v31 = vmax.f32 %v2638_v11, %v2670_v21  ;;  %v3961_v9 = vld [vmem:[#allocation3 + $0x3c] sm:$0xff] }
 0x19a   : > { %v2764_v38 = vmax.f32 %v2700_v55, %v2732_v32  ;;  %v2765_v33 = vmax.f32 %v2701_v51, %v2733_v12  ;;  %v2860_v5 = vld [vmem:[#allocation3 + $0xac] sm:$0xff]  ;;  %v2861_v19 = vld [vmem:[#allocation3 + $0xb4] sm:$0xff]  ;;  %v2734_v32 = vld [vmem:[#allocation3 + $0xc2] sm:$0xff]  ;;  %2132 = vst.msk [vmem:[#allocation2 + $0x13a] sm:$0xff] %vm638_vm1, %v6226_v34  ;;  %v3993_v61 = vmax.f32 %v3929_v44, %v3961_v9  ;;  %v3460_v44 = vmax.f32 %v3364_v39, %v6020_v0 }
 0x19b   : > { %v2671_v15 = vld [vmem:[#allocation3 + $0xc9] sm:$0xff]  ;;  %v3413_v13 = vld [vmem:[#allocation2 + $0xb8] sm:$0xf]  ;;  %v2766_v28 = vmax.f32 %v2702_v31, %v2734_v32 }
 0x19c   : > { %v2828_v45 = vmax.f32 %v2764_v38, %v2796_v56  ;;  %4718 = vmatmul.msk.f32.gmra.mxu0 %vm638_vm1, %v3992_v16  ;;  %v862_v55 = vld [vmem:[%s5544_s15 + $0x50] sm:$0xff]  ;;  %v2829_v3 = vmax.f32 %v2765_v33, %v2797_v7  ;;  %v2703_v50 = vmax.f32 %v2639_v4, %v2671_v15  ;;  %v2047_v38 = vadd.f32 %v2015_v49, %v1921_v63  ;;  %v6244_v12 = vld [vmem:[#allocation2 + $0xe8] sm:$0xf] }
 0x19d   : > { %4666 = vmatmul.msk.f32.gmra.mxu2 %vm638_vm1, %v6063_v57  ;;  %v786_v57 = vpop.f32.mrf.mxu1  ;;  %v1631_v62 = vld [vmem:[#allocation3 + $0x112] sm:$0xff]  ;;  %v3365_v16 = vmax.f32 %v6224_v1, %v6217_v37  ;;  %v2735_v11 = vld [vmem:[#allocation3 + $0xca] sm:$0xff]  ;;  %v6257_v37 = vmax.f32 %v3363_v22, %v6014_v36  ;;  %v6282_v53 = vld [vmem:[#allocation2 + $0xc0] sm:$0xff] }
 0x19e   : > { %v6236_v17 = vmax.f32 %v2828_v45, %v2860_v5  ;;  %v6240_v30 = vld [vmem:[#allocation3 + $0x4b] sm:$0xff]  ;;  %v894_v51 = vadd.f32 %v862_v55, %v786_v57  ;;  %v1568_v52 = vld [vmem:[#allocation3 + $0x121] sm:$0xff]  ;;  %v3554_v45 = vmax.f32 %v6211_v41, %v6213_v47  ;;  %v6252_v5 = vmax.f32 %v2829_v3, %v2861_v19  ;;  %v6275_v22 = vld [vmem:[#allocation3 + $0x113] sm:$0xff]  ;;  %2079 = vst.msk [vmem:[%s5544_s15 + $0x8] sm:$0xff] %vm604_vm5, %v2047_v38 }
 0x19f   : > { %v6246_v56 = vld [vmem:[#allocation3 + $0x50] sm:$0xff]  ;;  %v6259_v49 = vmax.f32 %v2703_v50, %v2735_v11  ;;  %v2798_v1 = vld [vmem:[#allocation3 + $0xc3] sm:$0xff]  ;;  %v6269_v41 = vmax.f32 %v2265_v48, %v6118_v54  ;;  %v3930_v19 = vmax.f32 %v6174_v8, %v6240_v30  ;;  %v6286_v48 = vmax.f32 %v1599_v59, %v1631_v62  ;;  %v1538_v38 = vld [vmem:[#allocation3 + $0x138] sm:$0xff] }
 0x1a0   : > { %v6248_v33 = vld [vmem:[#allocation3 + $0x51] sm:$0xff]  ;;  %3234 = vst.msk [vmem:[#allocation2 + $0xda] sm:$0xff] %vm638_vm1, %v6236_v17  ;;  %v2830_v4 = vmax.f32 %v2766_v28, %v2798_v1  ;;  %v2862_v21 = vld [vmem:[#allocation3 + $0xc4] sm:$0xff]  ;;  %v1600_v15 = vmax.f32 %v1536_v24, %v1568_v52  ;;  %v3648_v43 = vmax.f32 %v3552_v20, %v6282_v53  ;;  %v6297_v55 = vmax.f32 %v3365_v16, %v3413_v13  ;;  %v1570_v16 = vld [vmem:[#allocation3 + $0x139] sm:$0xff]  ;;  %v1924_v28 = vpop.f32.mrf.mxu2 }
 0x1a1   : > { %927 = vst.msk [vmem:[%s5544_s15 + $0x50] sm:$0xff] %vm604_vm5, %v894_v51  ;;  %v2799_v47 = vld [vmem:[#allocation3 + $0xcb] sm:$0xff]  ;;  %4643 = vmatmul.msk.f32.gmra.mxu1 %vm638_vm1, %v5391_v2  ;;  %v1632_v63 = vld [vmem:[#allocation3 + $0x122] sm:$0xff]  ;;  %v3555_v62 = vmax.f32 %v6257_v37, %v6282_v53  ;;  %v3271_v20 = vld [vmem:[#allocation2 + $0x98] sm:$0xff]  ;;  %v3803_v0 = vmax.f32 %v6246_v56, %v6248_v33  ;;  %v3366_v13 = vmax.f32 %v6000_v58, %v6014_v36 }
 0x1a2   : > { %v6271_v7 = vld [vmem:[#allocation2 + $0xb0] sm:$0xff]  ;;  %v1537_v31 = vld [vmem:[#allocation3 + $0x128] sm:$0xff]  ;;  %3235 = vst.msk [vmem:[#allocation2 + $0xe2] sm:$0xff] %vm638_vm1, %v6252_v5  ;;  %v2831_v59 = vmax.f32 %v6259_v49, %v2799_v47  ;;  %v6306_v26 = vmax.f32 %v2830_v4, %v2862_v21  ;;  %v863_v11 = vld [vmem:[%s5544_s15 + $0x58] sm:$0xff]  ;;  %v1727_v33 = vmax.f32 %v6286_v48, %v6275_v22  ;;  %v1602_v48 = vmax.f32 %v1538_v38, %v1570_v16 }
 0x1a3   : > { %v1569_v57 = vld [vmem:[#allocation3 + $0x129] sm:$0xff]  ;;  %3696 = vst.msk [vmem:[#allocation3 + $0x60] sm:$0xff] %vm638_vm1, %v3648_v43  ;;  %v3367_v52 = vmax.f32 %v3271_v20, %v6271_v7  ;;  %v3272_v56 = vld [vmem:[#allocation2 + $0xa0] sm:$0xf]  ;;  %4692 = vmatmul.msk.f32.gmra.mxu3 %vm638_vm1, %v6184_v60  ;;  %v3462_v43 = vmax.f32 %v3366_v13, %v6282_v53 }
 0x1a4   : > { %v6288_v2 = vld [vmem:[#allocation2 + $0xc8] sm:$0xff]  ;;  %v3602_v23 = vld [vmem:[#allocation2 + $0xd0] sm:$0xf]  ;;  %v1601_v9 = vmax.f32 %v1537_v31, %v1569_v57  ;;  %4719 = vmatmul.msk.f32.gmra.mxu0 %vm638_vm1, %v3993_v61  ;;  %3236 = vst.msk [vmem:[#allocation2 + $0xf2] sm:$0xff] %vm638_vm1, %v6306_v26  ;;  %v6331_v57 = vld [vmem:[#allocation2 + $0x100] sm:$0xf] }
 0x1a5   : > { %v3649_v3 = vmax.f32 %v3553_v35, %v6288_v2  ;;  %v3650_v50 = vmax.f32 %v3554_v45, %v3602_v23  ;;  %v2016_v32 = vld [vmem:[%s5544_s15 + $0x10] sm:$0xff]  ;;  %4667 = vmatmul.msk.f32.gmra.mxu2 %vm638_vm1, %v6079_v29  ;;  %v2457_v35 = vmax.f32 %v6269_v41, %v6137_v6  ;;  %v789_v29 = vpop.f32.mrf.mxu1  ;;  %v1664_v45 = vmax.f32 %v1600_v15, %v1632_v63  ;;  %v3320_v41 = vld [vmem:[#allocation2 + $0xb8] sm:$0xf]  ;;  %v1696_v47 = vld [vmem:[#allocation3 + $0x123] sm:$0xff] }
 0x1a6   : > { %v2863_v39 = vld [vmem:[#allocation3 + $0xcc] sm:$0xff]  ;;  %v895_v58 = vadd.f32 %v863_v11, %v789_v29  ;;  %v2048_v36 = vadd.f32 %v2016_v32, %v1924_v28  ;;  %v3556_v37 = vmax.f32 %v3460_v44, %v6288_v2  ;;  %v3368_v22 = vmax.f32 %v3272_v56, %v3320_v41  ;;  %v1634_v15 = vld [vmem:[#allocation3 + $0x13a] sm:$0xff]  ;;  %v1760_v8 = vld [vmem:[#allocation3 + $0x124] sm:$0xff] }
 0x1a7   : > { %v1633_v51 = vld [vmem:[#allocation3 + $0x12a] sm:$0xff]  ;;  %3697 = vst.msk [vmem:[#allocation3 + $0x68] sm:$0xff] %vm638_vm1, %v3649_v3  ;;  %v6323_v49 = vld [vmem:[#allocation2 + $0xd8] sm:$0xff]  ;;  %v6327_v61 = vmax.f32 %v2831_v59, %v2863_v39  ;;  %v1728_v60 = vmax.f32 %v1664_v45, %v1696_v47  ;;  %v1666_v30 = vmax.f32 %v1602_v48, %v1634_v15 }
 0x1a8   : > { %v3509_v24 = vld [vmem:[#allocation2 + $0xd0] sm:$0xf]  ;;  %3698 = vst.msk [vmem:[#allocation3 + $0x70] sm:$0xf] %vm951_vm4, %v3650_v50  ;;  %v3651_v21 = vmax.f32 %v3555_v62, %v6323_v49  ;;  %v1759_v23 = vld [vmem:[#allocation3 + $0x114] sm:$0xff]  ;;  %v1665_v44 = vmax.f32 %v1601_v9, %v1633_v51  ;;  %v1927_v56 = vpop.f32.mrf.mxu2  ;;  %v1762_v15 = vld [vmem:[#allocation3 + $0x13c] sm:$0xff] }
 0x1a9   : > { %v3557_v1 = vmax.f32 %v6297_v55, %v3509_v24  ;;  %v3962_v4 = vld [vmem:[#allocation3 + $0x4c] sm:$0xff]  ;;  %928 = vst.msk [vmem:[%s5544_s15 + $0x58] sm:$0xff] %vm604_vm5, %v895_v58  ;;  %v6343_v3 = vld [vmem:[#allocation2 + $0xe0] sm:$0xff]  ;;  %v3605_v50 = vld [vmem:[#allocation2 + $0xe8] sm:$0xf]  ;;  %v1791_v51 = vmax.f32 %v1727_v33, %v1759_v23  ;;  %v2266_v24 = vmax.f32 %v5834_v27, %v6104_v42  ;;  %v6363_v45 = vmax.f32 %v1728_v60, %v1760_v8 }
 0x1aa   : > { %v3835_v31 = vld [vmem:[#allocation3 + $0x52] sm:$0xff]  ;;  %v3994_v59 = vmax.f32 %v3930_v19, %v3962_v4  ;;  %2080 = vst.msk [vmem:[%s5544_s15 + $0x10] sm:$0xff] %vm604_vm5, %v2048_v36  ;;  %v2219_v62 = vld [vmem:[#allocation2 + $0x100] sm:$0xf]  ;;  %v3652_v20 = vmax.f32 %v3556_v37, %v6343_v3  ;;  %v3463_v19 = vmax.f32 %v3367_v52, %v6288_v2  ;;  %v2268_v37 = vmax.f32 %v6092_v46, %v6118_v54  ;;  %v3512_v27 = vld [vmem:[#allocation2 + $0xe8] sm:$0xf] }
 0x1ab   : > { %v1697_v55 = vld [vmem:[#allocation3 + $0x12b] sm:$0xff]  ;;  %v3867_v63 = vmax.f32 %v3803_v0, %v3835_v31  ;;  %v6345_v32 = vld [vmem:[#allocation2 + $0x138] sm:$0xff]  ;;  %3699 = vst.msk [vmem:[#allocation3 + $0x78] sm:$0xff] %vm638_vm1, %v3651_v21  ;;  %v3653_v39 = vmax.f32 %v3557_v1, %v3605_v50  ;;  %v3740_v16 = vld [vmem:[#allocation3 + $0x60] sm:$0xff]  ;;  %v2267_v52 = vmax.f32 %v6244_v12, %v2219_v62  ;;  %4693 = vmatmul.msk.f32.gmra.mxu3 %vm638_vm1, %v6199_v25 }
 0x1ac   : > { %v2553_v13 = vmax.f32 %v2457_v35, %v6345_v32  ;;  %v3416_v9 = vld [vmem:[#allocation2 + $0xd0] sm:$0xf]  ;;  %3237 = vst.msk [vmem:[#allocation2 + $0xfa] sm:$0xff] %vm638_vm1, %v6327_v61  ;;  %v1698_v38 = vld [vmem:[#allocation3 + $0x13b] sm:$0xff]  ;;  %v3558_v35 = vmax.f32 %v3462_v43, %v6323_v49  ;;  %v1729_v11 = vmax.f32 %v1665_v44, %v1697_v55  ;;  %4720 = vmatmul.msk.f32.gmra.mxu0 %vm638_vm1, %v3994_v59 }
 0x1ad   : > { %4668 = vmatmul.msk.f32.gmra.mxu2 %vm638_vm1, %v6226_v34  ;;  %v3464_v0 = vmax.f32 %v3368_v22, %v3416_v9  ;;  %3700 = vst.msk [vmem:[#allocation3 + $0x80] sm:$0xff] %vm638_vm1, %v3652_v20  ;;  %v3899_v28 = vld [vmem:[#allocation3 + $0x53] sm:$0xff]  ;;  %v792_v34 = vpop.f32.mrf.mxu1  ;;  %v1730_v47 = vmax.f32 %v1666_v30, %v1698_v38  ;;  %v864_v4 = vld [vmem:[%s5544_s15 + $0x60] sm:$0xff]  ;;  %v3559_v21 = vmax.f32 %v3463_v19, %v6343_v3 }
 0x1ae   : > { %v3772_v29 = vld [vmem:[#allocation3 + $0x61] sm:$0xff]  ;;  %v2017_v33 = vld [vmem:[%s5544_s15 + $0x18] sm:$0xff]  ;;  %3701 = vst.msk [vmem:[#allocation3 + $0x88] sm:$0xf] %vm951_vm4, %v3653_v39  ;;  %v1761_v58 = vld [vmem:[#allocation3 + $0x12c] sm:$0xff]  ;;  %v3931_v36 = vmax.f32 %v3867_v63, %v3899_v28  ;;  %v896_v31 = vadd.f32 %v864_v4, %v792_v34  ;;  %v2269_v55 = vmax.f32 %v6104_v42, %v6131_v10  ;;  %v6385_v59 = vmax.f32 %v2266_v24, %v6131_v10 }
 0x1af   : > { %v2315_v1 = vld [vmem:[#allocation2 + $0x118] sm:$0xf]  ;;  %v2049_v41 = vadd.f32 %v2017_v33, %v1927_v56  ;;  %2601 = vst.msk [vmem:[#allocation3 + $0xd8] sm:$0xff] %vm638_vm1, %v2553_v13  ;;  %v3804_v12 = vmax.f32 %v3740_v16, %v3772_v29  ;;  %v6370_v22 = vld [vmem:[#allocation2 + $0xf0] sm:$0xff]  ;;  %v3560_v48 = vmax.f32 %v3464_v0, %v3512_v27  ;;  %v6380_v23 = vmax.f32 %v1729_v11, %v1761_v58  ;;  %v1539_v25 = vld [vmem:[#allocation3 + $0x140] sm:$0xff] }
 0x1b0   : > { %2133 = vst.msk [vmem:[#allocation2 + $0x142] sm:$0xff] %vm638_vm1, %v1791_v51  ;;  %v6375_v46 = vld [vmem:[#allocation2 + $0x118] sm:$0xf]  ;;  %v3654_v43 = vmax.f32 %v3558_v35, %v6370_v22  ;;  %v1571_v63 = vld [vmem:[#allocation3 + $0x141] sm:$0xff]  ;;  %v2363_v62 = vmax.f32 %v2267_v52, %v2315_v1  ;;  %v6392_v20 = vmax.f32 %v2268_v37, %v6137_v6  ;;  %v6396_v42 = vmax.f32 %v1730_v47, %v1762_v15  ;;  %v3773_v30 = vld [vmem:[#allocation3 + $0x69] sm:$0xff]  ;;  %v1930_v24 = vpop.f32.mrf.mxu2 }
 0x1b1   : > { %2081 = vst.msk [vmem:[%s5544_s15 + $0x18] sm:$0xff] %vm604_vm5, %v2049_v41  ;;  %v3963_v44 = vld [vmem:[#allocation3 + $0x54] sm:$0xff]  ;;  %v3836_v60 = vld [vmem:[#allocation3 + $0x62] sm:$0xff]  ;;  %v2411_v19 = vld [vmem:[#allocation2 + $0x130] sm:$0xf]  ;;  %v2270_v16 = vmax.f32 %v6331_v57, %v6375_v46  ;;  %v2271_v11 = vmax.f32 %v6118_v54, %v6137_v6  ;;  %v2365_v52 = vmax.f32 %v2269_v55, %v6154_v18  ;;  %v2458_v1 = vmax.f32 %v6385_v59, %v6154_v18 }
 0x1b2   : > { %2134 = vst.msk [vmem:[#allocation2 + $0x152] sm:$0xff] %vm638_vm1, %v6363_v45  ;;  %v3995_v50 = vmax.f32 %v3931_v36, %v3963_v44  ;;  %v3868_v9 = vmax.f32 %v3804_v12, %v3836_v60  ;;  %v3741_v8 = vld [vmem:[#allocation3 + $0x68] sm:$0xff]  ;;  %v1540_v29 = vld [vmem:[#allocation3 + $0x150] sm:$0xff]  ;;  %v1541_v34 = vld [vmem:[#allocation3 + $0x158] sm:$0xff]  ;;  %v2459_v41 = vmax.f32 %v2363_v62, %v2411_v19  ;;  %v2460_v54 = vmax.f32 %v6392_v20, %v6345_v32 }
 0x1b3   : > { %929 = vst.msk [vmem:[%s5544_s15 + $0x60] sm:$0xff] %vm604_vm5, %v896_v31  ;;  %v6394_v39 = vld [vmem:[#allocation2 + $0xf8] sm:$0xff]  ;;  %v3608_v13 = vld [vmem:[#allocation2 + $0x100] sm:$0xf]  ;;  %v3805_v58 = vmax.f32 %v3741_v8, %v3773_v30  ;;  %v865_v36 = vld [vmem:[%s5544_s15 + $0x68] sm:$0xff]  ;;  %4694 = vmatmul.msk.f32.gmra.mxu3 %vm638_vm1, %v6236_v17  ;;  %v6442_v19 = vmax.f32 %v2271_v11, %v6345_v32 }
 0x1b4   : > { %v3655_v0 = vmax.f32 %v3559_v21, %v6394_v39  ;;  %3702 = vst.msk [vmem:[#allocation3 + $0x90] sm:$0xff] %vm638_vm1, %v3654_v43  ;;  %v3656_v38 = vmax.f32 %v3560_v48, %v3608_v13  ;;  %v1572_v35 = vld [vmem:[#allocation3 + $0x151] sm:$0xff]  ;;  %4721 = vmatmul.msk.f32.gmra.mxu0 %vm638_vm1, %v3995_v50  ;;  %v1635_v57 = vld [vmem:[#allocation3 + $0x142] sm:$0xff]  ;;  %v1573_v56 = vld [vmem:[#allocation3 + $0x159] sm:$0xff] }
 0x1b5   : > { %4669 = vmatmul.msk.f32.gmra.mxu2 %vm638_vm1, %v1791_v51  ;;  %2135 = vst.msk [vmem:[#allocation2 + $0x15a] sm:$0xff] %vm638_vm1, %v6380_v23  ;;  %v795_v28 = vpop.f32.mrf.mxu1  ;;  %v1603_v51 = vmax.f32 %v1539_v25, %v1571_v63  ;;  %v3900_v33 = vld [vmem:[#allocation3 + $0x63] sm:$0xff]  ;;  %v2318_v4 = vld [vmem:[#allocation2 + $0x130] sm:$0xf]  ;;  %v1604_v48 = vmax.f32 %v1540_v29, %v1572_v35  ;;  %v6421_v15 = vld [vmem:[#allocation2 + $0x178] sm:$0xf]  ;;  %v1605_v63 = vmax.f32 %v1541_v34, %v1573_v56 }
 0x1b6   : > { %3703 = vst.msk [vmem:[#allocation3 + $0x98] sm:$0xff] %vm638_vm1, %v3655_v0  ;;  %v2018_v37 = vld [vmem:[%s5544_s15 + $0x20] sm:$0xff]  ;;  %v3932_v27 = vmax.f32 %v3868_v9, %v3900_v33  ;;  %v897_v47 = vadd.f32 %v865_v36, %v795_v28  ;;  %v1636_v31 = vld [vmem:[#allocation3 + $0x152] sm:$0xff]  ;;  %v3837_v44 = vld [vmem:[#allocation3 + $0x6a] sm:$0xff]  ;;  %v6436_v62 = vmax.f32 %v2270_v16, %v2318_v4  ;;  %v1172_v35 = vmax.f32 %v5888_v40, %v6170_v14 }
 0x1b7   : > { %3704 = vst.msk [vmem:[#allocation3 + $0xa0] sm:$0xf] %vm951_vm4, %v3656_v38  ;;  %v2050_v12 = vadd.f32 %v2018_v37, %v1930_v24  ;;  %v6417_v21 = vld [vmem:[#allocation2 + $0x140] sm:$0xff]  ;;  %v2507_v46 = vld [vmem:[#allocation2 + $0x148] sm:$0xf]  ;;  %v6430_v25 = vmax.f32 %v1603_v51, %v1635_v57  ;;  %v6432_v60 = vmax.f32 %v3805_v58, %v3837_v44  ;;  %v6449_v29 = vmax.f32 %v1604_v48, %v1636_v31  ;;  %v3742_v24 = vld [vmem:[#allocation3 + $0x78] sm:$0xff] }
 0x1b8   : > { %2136 = vst.msk [vmem:[#allocation2 + $0x16a] sm:$0xff] %vm638_vm1, %v6396_v42  ;;  %v1125_v43 = vld [vmem:[#allocation2 + $0x190] sm:$0xf]  ;;  %v2461_v55 = vmax.f32 %v2365_v52, %v6417_v21  ;;  %v3964_v50 = vld [vmem:[#allocation3 + $0x64] sm:$0xff]  ;;  %v2554_v17 = vmax.f32 %v2458_v1, %v6417_v21  ;;  %v2555_v20 = vmax.f32 %v2459_v41, %v2507_v46  ;;  %v1637_v9 = vld [vmem:[#allocation3 + $0x15a] sm:$0xff]  ;;  %v1933_v34 = vpop.f32.mrf.mxu2  ;;  %v3028_v1 = vpop.f32.mrf.mxu3 }
 0x1b9   : > { %930 = vst.msk [vmem:[%s5544_s15 + $0x68] sm:$0xff] %vm604_vm5, %v897_v47  ;;  %v6428_v59 = vld [vmem:[#allocation2 + $0x150] sm:$0xff]  ;;  %v6439_v13 = vld [vmem:[#allocation3 + $0x143] sm:$0xff]  ;;  %v3996_v30 = vmax.f32 %v3932_v27, %v3964_v50  ;;  %v1173_v28 = vmax.f32 %v6421_v15, %v1125_v43  ;;  %v3774_v52 = vld [vmem:[#allocation3 + $0x79] sm:$0xff]  ;;  %v6462_v14 = vmax.f32 %v1605_v63, %v1637_v9 }
 0x1ba   : > { %2082 = vst.msk [vmem:[%s5544_s15 + $0x20] sm:$0xff] %vm604_vm5, %v2050_v12  ;;  %v1221_v8 = vld [vmem:[#allocation2 + $0x1a8] sm:$0xf]  ;;  %v2556_v38 = vmax.f32 %v2460_v54, %v6428_v59  ;;  %v1700_v11 = vld [vmem:[#allocation3 + $0x153] sm:$0xff]  ;;  %v1731_v40 = vmax.f32 %v6430_v25, %v6439_v13  ;;  %v3124_v41 = vld [vmem:[%s5544_s15] sm:$0xff]  ;;  %v3806_v12 = vmax.f32 %v3742_v24, %v3774_v52  ;;  %v2463_v46 = vmax.f32 %v6442_v19, %v6428_v59 }
 0x1bb   : > { %v2414_v0 = vld [vmem:[#allocation2 + $0x148] sm:$0xf]  ;;  %2602 = vst.msk [vmem:[#allocation3 + $0xe0] sm:$0xff] %vm638_vm1, %v2554_v17  ;;  %v866_v57 = vld [vmem:[%s5544_s15 + $0x70] sm:$0xff]  ;;  %v1701_v27 = vld [vmem:[#allocation3 + $0x15b] sm:$0xff]  ;;  %v3156_v15 = vadd.f32 %v3124_v41, %v3028_v1  ;;  %v1732_v43 = vmax.f32 %v6449_v29, %v1700_v11  ;;  %v6476_v25 = vmax.f32 %v1173_v28, %v1221_v8  ;;  %4695 = vmatmul.msk.f32.gmra.mxu3 %vm638_vm1, %v6252_v5 }
 0x1bc   : > { %v6447_v16 = vld [vmem:[#allocation2 + $0x158] sm:$0xff]  ;;  %4722 = vmatmul.msk.f32.gmra.mxu0 %vm638_vm1, %v3996_v30  ;;  %v2019_v56 = vld [vmem:[%s5544_s15 + $0x28] sm:$0xff]  ;;  %2603 = vst.msk [vmem:[#allocation3 + $0xe8] sm:$0xf] %vm951_vm4, %v2555_v20  ;;  %v2462_v54 = vmax.f32 %v6436_v62, %v2414_v0  ;;  %v6468_v47 = vld [vmem:[#allocation2 + $0x1c0] sm:$0xf]  ;;  %v1733_v13 = vmax.f32 %v6462_v14, %v1701_v27  ;;  %v2272_v30 = vmax.f32 %v6131_v10, %v6154_v18 }
 0x1bd   : > { %4670 = vmatmul.msk.f32.gmra.mxu2 %vm638_vm1, %v6363_v45  ;;  %v3901_v45 = vld [vmem:[#allocation3 + $0x6b] sm:$0xff]  ;;  %v798_v51 = vpop.f32.mrf.mxu1  ;;  %v2557_v33 = vmax.f32 %v2461_v55, %v6447_v16  ;;  %v2051_v37 = vadd.f32 %v2019_v56, %v1933_v34  ;;  %2604 = vst.msk [vmem:[#allocation3 + $0xf0] sm:$0xff] %vm638_vm1, %v2556_v38  ;;  %v3743_v4 = vld [vmem:[#allocation3 + $0x80] sm:$0xff]  ;;  %v6478_v63 = vld [vmem:[#allocation2 + $0x118] sm:$0xf]  ;;  %v2274_v27 = vmax.f32 %v6137_v6, %v6345_v32 }
 0x1be   : > { %v3933_v58 = vmax.f32 %v6432_v60, %v3901_v45  ;;  %v898_v36 = vadd.f32 %v866_v57, %v798_v51  ;;  %v3775_v48 = vld [vmem:[#allocation3 + $0x81] sm:$0xff]  ;;  %v6482_v50 = vld [vmem:[#allocation2 + $0x130] sm:$0xf]  ;;  %v1764_v60 = vld [vmem:[#allocation3 + $0x154] sm:$0xff]  ;;  %3188 = vst.msk [vmem:[%s5544_s15] sm:$0xff] %vm604_vm5, %v3156_v15  ;;  %v1366_v57 = vmax.f32 %v6476_v25, %v6468_v47 }
 0x1bf   : > { %2605 = vst.msk [vmem:[#allocation3 + $0xf8] sm:$0xff] %vm638_vm1, %v2557_v33  ;;  %v1763_v31 = vld [vmem:[#allocation3 + $0x144] sm:$0xff]  ;;  %v3965_v62 = vld [vmem:[#allocation3 + $0x6c] sm:$0xff]  ;;  %v2640_v17 = vld [vmem:[#allocation3 + $0xd8] sm:$0xff]  ;;  %v3807_v8 = vmax.f32 %v3743_v4, %v3775_v48  ;;  %v6502_v11 = vmax.f32 %v1732_v43, %v1764_v60  ;;  %v2273_v56 = vmax.f32 %v6478_v63, %v6482_v50 }
 0x1c0   : > { %v4788_v44 = vld [vmem:[#allocation2 + $0x1a0] sm:$0xff]  ;;  %931 = vst.msk [vmem:[%s5544_s15 + $0x70] sm:$0xff] %vm604_vm5, %v898_v36  ;;  %v6493_v19 = vld [vmem:[#allocation2 + $0x168] sm:$0xff]  ;;  %v6495_v0 = vmax.f32 %v1731_v40, %v1763_v31  ;;  %v3997_v29 = vmax.f32 %v3933_v58, %v3965_v62  ;;  %v6504_v45 = vld [vmem:[#allocation2 + $0x1b8] sm:$0xff] }
 0x1c1   : > { %v6474_v55 = vmax.f32 %v1172_v35, %v4788_v44  ;;  %2083 = vst.msk [vmem:[%s5544_s15 + $0x28] sm:$0xff] %vm604_vm5, %v2051_v37  ;;  %v2510_v20 = vld [vmem:[#allocation2 + $0x160] sm:$0xf]  ;;  %v2559_v10 = vmax.f32 %v2463_v46, %v6493_v19  ;;  %v6514_v40 = vld [vmem:[#allocation2 + $0xa8] sm:$0xff]  ;;  %v6516_v14 = vld [vmem:[#allocation2 + $0xb8] sm:$0xf]  ;;  %v1936_v37 = vpop.f32.mrf.mxu2  ;;  %v3031_v46 = vpop.f32.mrf.mxu3 }
 0x1c2   : > { %v3838_v9 = vld [vmem:[#allocation3 + $0x7a] sm:$0xff]  ;;  %v2558_v5 = vmax.f32 %v2462_v54, %v2510_v20  ;;  %v3839_v28 = vld [vmem:[#allocation3 + $0x82] sm:$0xff]  ;;  %v2020_v1 = vld [vmem:[%s5544_s15 + $0x30] sm:$0xff]  ;;  %2137 = vst.msk [vmem:[#allocation2 + $0x172] sm:$0xff] %vm638_vm1, %v6495_v0  ;;  %v6537_v20 = vmax.f32 %v2272_v30, %v6417_v21 }
 0x1c3   : > { %v1765_v38 = vld [vmem:[#allocation3 + $0x15c] sm:$0xff]  ;;  %v6497_v35 = vmax.f32 %v3806_v12, %v3838_v9  ;;  %v1365_v51 = vmax.f32 %v6474_v55, %v6504_v45  ;;  %2607 = vst.msk [vmem:[#allocation3 + $0x108] sm:$0xff] %vm638_vm1, %v2559_v10  ;;  %v6527_v4 = vmax.f32 %v3807_v8, %v3839_v28  ;;  %v2052_v15 = vadd.f32 %v2020_v1, %v1936_v37  ;;  %v3125_v31 = vld [vmem:[%s5544_s15 + $0x8] sm:$0xff]  ;;  %v6530_v60 = vld [vmem:[#allocation2 + $0xd0] sm:$0xf] }
 0x1c4   : > { %v2641_v24 = vld [vmem:[#allocation3 + $0xe0] sm:$0xff]  ;;  %2606 = vst.msk [vmem:[#allocation3 + $0x100] sm:$0xf] %vm951_vm4, %v2558_v5  ;;  %4723 = vmatmul.msk.f32.gmra.mxu0 %vm638_vm1, %v3997_v29  ;;  %v867_v36 = vld [vmem:[%s5544_s15 + $0x78] sm:$0xff]  ;;  %v6525_v12 = vmax.f32 %v1733_v13, %v1765_v38  ;;  %v2642_v8 = vld [vmem:[#allocation3 + $0xf0] sm:$0xff]  ;;  %4696 = vmatmul.msk.f32.gmra.mxu3 %vm638_vm1, %v6306_v26  ;;  %v2275_v10 = vmax.f32 %v6154_v18, %v6417_v21 }
 0x1c5   : > { %v2672_v52 = vld [vmem:[#allocation3 + $0xd9] sm:$0xff]  ;;  %4671 = vmatmul.msk.f32.gmra.mxu2 %vm638_vm1, %v6380_v23  ;;  %v2673_v33 = vld [vmem:[#allocation3 + $0xe1] sm:$0xff]  ;;  %v801_v58 = vpop.f32.mrf.mxu1  ;;  %2138 = vst.msk [vmem:[#allocation2 + $0x182] sm:$0xff] %vm638_vm1, %v6502_v11  ;;  %v3371_v26 = vmax.f32 %v6516_v14, %v6530_v60  ;;  %v6563_v37 = vld [vmem:[#allocation3 + $0x90] sm:$0xff] }
 0x1c6   : > { %v6510_v34 = vld [vmem:[#allocation3 + $0x7b] sm:$0xff]  ;;  %v2704_v23 = vmax.f32 %v2640_v17, %v2672_v52  ;;  %v2705_v41 = vmax.f32 %v2641_v24, %v2673_v33  ;;  %v899_v48 = vadd.f32 %v867_v36, %v801_v58  ;;  %v3157_v17 = vadd.f32 %v3125_v31, %v3031_v46  ;;  %v2674_v5 = vld [vmem:[#allocation3 + $0xf1] sm:$0xff]  ;;  %v6541_v29 = vld [vmem:[#allocation3 + $0x83] sm:$0xff]  ;;  %2084 = vst.msk [vmem:[%s5544_s15 + $0x30] sm:$0xff] %vm604_vm5, %v2052_v15 }
 0x1c7   : > { %v2736_v54 = vld [vmem:[#allocation3 + $0xda] sm:$0xff]  ;;  %v2737_v43 = vld [vmem:[#allocation3 + $0xe2] sm:$0xff]  ;;  %v3934_v62 = vmax.f32 %v6497_v35, %v6510_v34  ;;  %v3369_v24 = vmax.f32 %v6514_v40, %v6282_v53  ;;  %v2706_v52 = vmax.f32 %v2642_v8, %v2674_v5  ;;  %v3370_v33 = vmax.f32 %v6271_v7, %v6288_v2  ;;  %v2738_v58 = vld [vmem:[#allocation3 + $0xf2] sm:$0xff]  ;;  %2139 = vst.msk [vmem:[#allocation2 + $0x18a] sm:$0xff] %vm638_vm1, %v6525_v12 }
 0x1c8   : > { %v2768_v44 = vmax.f32 %v2704_v23, %v2736_v54  ;;  %v2769_v13 = vmax.f32 %v2705_v41, %v2737_v43  ;;  %v2800_v9 = vld [vmem:[#allocation3 + $0xdb] sm:$0xff]  ;;  %932 = vst.msk [vmem:[%s5544_s15 + $0x78] sm:$0xff] %vm604_vm5, %v899_v48  ;;  %v2801_v35 = vld [vmem:[#allocation3 + $0xe3] sm:$0xff]  ;;  %v6557_v36 = vld [vmem:[#allocation2 + $0x1d0] sm:$0xff]  ;;  %v3935_v53 = vmax.f32 %v6527_v4, %v6541_v29  ;;  %v2464_v43 = vmax.f32 %v6537_v20, %v6447_v16 }
 0x1c9   : > { %v3966_v38 = vld [vmem:[#allocation3 + $0x7c] sm:$0xff]  ;;  %v6561_v40 = vld [vmem:[#allocation2 + $0x130] sm:$0xf]  ;;  %3189 = vst.msk [vmem:[%s5544_s15 + $0x8] sm:$0xff] %vm604_vm5, %v3157_v17  ;;  %v6567_v1 = vld [vmem:[#allocation2 + $0x148] sm:$0xf]  ;;  %v2770_v14 = vmax.f32 %v2706_v52, %v2738_v58  ;;  %v1462_v4 = vmax.f32 %v1365_v51, %v6557_v36  ;;  %v6588_v45 = vmax.f32 %v3369_v24, %v6323_v49  ;;  %v1939_v5 = vpop.f32.mrf.mxu2 }
 0x1ca   : > { %v2832_v28 = vmax.f32 %v2768_v44, %v2800_v9  ;;  %v2864_v30 = vld [vmem:[#allocation3 + $0xdc] sm:$0xff]  ;;  %v2833_v34 = vmax.f32 %v2769_v13, %v2801_v35  ;;  %v2321_v41 = vld [vmem:[#allocation2 + $0x148] sm:$0xf]  ;;  %v1415_v48 = vld [vmem:[#allocation2 + $0x1d8] sm:$0xf]  ;;  %v3998_v15 = vmax.f32 %v3934_v62, %v3966_v38  ;;  %v6599_v13 = vmax.f32 %v3370_v33, %v6343_v3 }
 0x1cb   : > { %v2643_v23 = vld [vmem:[#allocation3 + $0xf8] sm:$0xff]  ;;  %v2865_v7 = vld [vmem:[#allocation3 + $0xe4] sm:$0xff]  ;;  %v3278_v24 = vld [vmem:[#allocation2 + $0xd0] sm:$0xf]  ;;  %1510 = vst.msk [vmem:[#allocation3 + $0x170] sm:$0xff] %vm638_vm1, %v1462_v4  ;;  %v3561_v63 = vmax.f32 %v6588_v45, %v6370_v22 }
 0x1cc   : > { %v6569_v2 = vmax.f32 %v2832_v28, %v2864_v30  ;;  %v6571_v54 = vld [vmem:[#allocation2 + $0xc0] sm:$0xff]  ;;  %v6577_v46 = vmax.f32 %v2833_v34, %v2865_v7  ;;  %v3419_v31 = vld [vmem:[#allocation2 + $0xe8] sm:$0xf]  ;;  %v2802_v60 = vld [vmem:[#allocation3 + $0xf3] sm:$0xff]  ;;  %4724 = vmatmul.msk.f32.gmra.mxu0 %vm638_vm1, %v3998_v15  ;;  %4697 = vmatmul.msk.f32.gmra.mxu3 %vm638_vm1, %v6327_v61 }
 0x1cd   : > { %v2675_v44 = vld [vmem:[#allocation3 + $0xf9] sm:$0xff]  ;;  %4672 = vmatmul.msk.f32.gmra.mxu2 %vm638_vm1, %v6396_v42  ;;  %v3776_v55 = vld [vmem:[#allocation3 + $0x91] sm:$0xff]  ;;  %v2834_v62 = vmax.f32 %v2770_v14, %v2802_v60  ;;  %v6590_v20 = vld [vmem:[#allocation2 + $0xc8] sm:$0xff]  ;;  %v1463_v42 = vmax.f32 %v1366_v57, %v1415_v48  ;;  %v804_v9 = vpop.f32.mrf.mxu1  ;;  %v3467_v29 = vmax.f32 %v3371_v26, %v3419_v31  ;;  %v3372_v28 = vmax.f32 %v6571_v54, %v6323_v49 }
 0x1ce   : > { %3238 = vst.msk [vmem:[#allocation2 + $0x10a] sm:$0xff] %vm638_vm1, %v6569_v2  ;;  %v2707_v51 = vmax.f32 %v2643_v23, %v2675_v44  ;;  %v2866_v17 = vld [vmem:[#allocation3 + $0xf4] sm:$0xff]  ;;  %v868_v8 = vld [vmem:[%s5544_s15 + $0x80] sm:$0xff]  ;;  %v3326_v52 = vld [vmem:[#allocation2 + $0xe8] sm:$0xf]  ;;  %v3808_v23 = vmax.f32 %v6563_v37, %v3776_v55  ;;  %v2276_v26 = vmax.f32 %v6561_v40, %v6567_v1  ;;  %v6616_v49 = vmax.f32 %v2273_v56, %v2321_v41  ;;  %v3034_v41 = vpop.f32.mrf.mxu3 }
 0x1cf   : > { %3239 = vst.msk [vmem:[#allocation2 + $0x112] sm:$0xff] %vm638_vm1, %v6577_v46  ;;  %v2021_v38 = vld [vmem:[%s5544_s15 + $0x38] sm:$0xff]  ;;  %v900_v30 = vadd.f32 %v868_v8, %v804_v9  ;;  %v6605_v57 = vmax.f32 %v2834_v62, %v2866_v17  ;;  %v6607_v34 = vld [vmem:[#allocation2 + $0x170] sm:$0xff]  ;;  %v3967_v33 = vld [vmem:[#allocation3 + $0x84] sm:$0xff]  ;;  %v3373_v40 = vmax.f32 %v6590_v20, %v6343_v3  ;;  %v3562_v1 = vmax.f32 %v6599_v13, %v6394_v39 }
 0x1d0   : > { %v2739_v35 = vld [vmem:[#allocation3 + $0xfa] sm:$0xff]  ;;  %v2053_v47 = vadd.f32 %v2021_v38, %v1939_v5  ;;  %v2560_v14 = vmax.f32 %v2464_v43, %v6607_v34  ;;  %1511 = vst.msk [vmem:[#allocation3 + $0x178] sm:$0xf] %vm951_vm4, %v1463_v42  ;;  %v3999_v37 = vmax.f32 %v3935_v53, %v3967_v33  ;;  %v3126_v48 = vld [vmem:[%s5544_s15 + $0x10] sm:$0xff]  ;;  %v3374_v43 = vmax.f32 %v3278_v24, %v3326_v52  ;;  %v1542_v6 = vld [vmem:[#allocation3 + $0x168] sm:$0xff] }
 0x1d1   : > { %v2771_v25 = vmax.f32 %v2707_v51, %v2739_v35  ;;  %v3515_v58 = vld [vmem:[#allocation2 + $0x100] sm:$0xf]  ;;  %v6620_v54 = vld [vmem:[#allocation3 + $0x98] sm:$0xff]  ;;  %933 = vst.msk [vmem:[%s5544_s15 + $0x80] sm:$0xff] %vm604_vm5, %v900_v30  ;;  %v3158_v60 = vadd.f32 %v3126_v48, %v3034_v41  ;;  %v3468_v3 = vmax.f32 %v3372_v28, %v6370_v22  ;;  %v6646_v53 = vmax.f32 %v2274_v27, %v6428_v59  ;;  %v869_v35 = vld [vmem:[%s5544_s15 + $0x88] sm:$0xff]  ;;  %v1942_v28 = vpop.f32.mrf.mxu2 }
 0x1d2   : > { %v2803_v7 = vld [vmem:[#allocation3 + $0xfb] sm:$0xff]  ;;  %2085 = vst.msk [vmem:[%s5544_s15 + $0x38] sm:$0xff] %vm604_vm5, %v2053_v47  ;;  %v3563_v15 = vmax.f32 %v3467_v29, %v3515_v58  ;;  %v3840_v44 = vld [vmem:[#allocation3 + $0x92] sm:$0xff]  ;;  %v6656_v62 = vmax.f32 %v2275_v10, %v6447_v16  ;;  %v6672_v9 = vmax.f32 %v3373_v40, %v6394_v39  ;;  %v2644_v33 = vld [vmem:[#allocation3 + $0x108] sm:$0xff] }
 0x1d3   : > { %v6622_v4 = vld [vmem:[#allocation3 + $0x99] sm:$0xff]  ;;  %v2835_v56 = vmax.f32 %v2771_v25, %v2803_v7  ;;  %3240 = vst.msk [vmem:[#allocation2 + $0x122] sm:$0xff] %vm638_vm1, %v6605_v57  ;;  %v6648_v45 = vmax.f32 %v3808_v23, %v3840_v44  ;;  %v2466_v23 = vmax.f32 %v6646_v53, %v6493_v19 }
 0x1d4   : > { %v2417_v50 = vld [vmem:[#allocation2 + $0x160] sm:$0xf]  ;;  %2608 = vst.msk [vmem:[#allocation3 + $0x110] sm:$0xff] %vm638_vm1, %v2560_v14  ;;  %v3809_v27 = vmax.f32 %v6620_v54, %v6622_v4  ;;  %4725 = vmatmul.msk.f32.gmra.mxu0 %vm638_vm1, %v3999_v37  ;;  %v3904_v8 = vld [vmem:[#allocation3 + $0x93] sm:$0xff]  ;;  %4698 = vmatmul.msk.f32.gmra.mxu3 %vm638_vm1, %v6569_v2  ;;  %v2467_v40 = vmax.f32 %v6656_v62, %v6607_v34 }
 0x1d5   : > { %v2324_v61 = vld [vmem:[#allocation2 + $0x160] sm:$0xf]  ;;  %v6650_v51 = vld [vmem:[#allocation2 + $0x108] sm:$0xff]  ;;  %v2465_v17 = vmax.f32 %v6616_v49, %v2417_v50  ;;  %4673 = vmatmul.msk.f32.gmra.mxu2 %vm638_vm1, %v6495_v0  ;;  %3190 = vst.msk [vmem:[%s5544_s15 + $0x10] sm:$0xff] %vm604_vm5, %v3158_v60  ;;  %v2513_v0 = vld [vmem:[#allocation2 + $0x178] sm:$0xf]  ;;  %v807_v29 = vpop.f32.mrf.mxu1  ;;  %v3936_v58 = vmax.f32 %v6648_v45, %v3904_v8 }
 0x1d6   : > { %v2867_v31 = vld [vmem:[#allocation3 + $0xfc] sm:$0xff]  ;;  %v6664_v42 = vld [vmem:[#allocation2 + $0x110] sm:$0xff]  ;;  %v3657_v18 = vmax.f32 %v3561_v63, %v6650_v51  ;;  %v3611_v10 = vld [vmem:[#allocation2 + $0x118] sm:$0xf]  ;;  %v6669_v13 = vmax.f32 %v2276_v26, %v2324_v61  ;;  %v901_v25 = vadd.f32 %v869_v35, %v807_v29  ;;  %v3564_v52 = vmax.f32 %v3468_v3, %v6650_v51 }
 0x1d7   : > { %v6637_v55 = vmax.f32 %v2835_v56, %v2867_v31  ;;  %v3422_v20 = vld [vmem:[#allocation2 + $0x100] sm:$0xf]  ;;  %v3658_v5 = vmax.f32 %v3562_v1, %v6664_v42  ;;  %v3659_v38 = vmax.f32 %v3563_v15, %v3611_v10  ;;  %v1574_v26 = vld [vmem:[#allocation3 + $0x169] sm:$0xff]  ;;  %v2561_v7 = vmax.f32 %v2465_v17, %v2513_v0  ;;  %v2420_v54 = vld [vmem:[#allocation2 + $0x178] sm:$0xf] }
 0x1d8   : > { %v2022_v30 = vld [vmem:[%s5544_s15 + $0x40] sm:$0xff]  ;;  %v3470_v47 = vmax.f32 %v3374_v43, %v3422_v20  ;;  %3705 = vst.msk [vmem:[#allocation3 + $0xa8] sm:$0xff] %vm638_vm1, %v3657_v18  ;;  %v1638_v49 = vld [vmem:[#allocation3 + $0x16a] sm:$0xff]  ;;  %v1606_v4 = vmax.f32 %v1542_v6, %v1574_v26  ;;  %v3968_v50 = vld [vmem:[#allocation3 + $0x94] sm:$0xff]  ;;  %v3565_v48 = vmax.f32 %v6672_v9, %v6664_v42  ;;  %v2468_v62 = vmax.f32 %v6669_v13, %v2420_v54 }
 0x1d9   : > { %3241 = vst.msk [vmem:[#allocation2 + $0x12a] sm:$0xff] %vm638_vm1, %v6637_v55  ;;  %v2054_v24 = vadd.f32 %v2022_v30, %v1942_v28  ;;  %v6686_v14 = vld [vmem:[#allocation2 + $0x180] sm:$0xff]  ;;  %v1543_v63 = vld [vmem:[#allocation3 + $0x170] sm:$0xff]  ;;  %v3518_v56 = vld [vmem:[#allocation2 + $0x118] sm:$0xf]  ;;  %v4000_v20 = vmax.f32 %v3936_v58, %v3968_v50 }
 0x1da   : > { %3706 = vst.msk [vmem:[#allocation3 + $0xb0] sm:$0xff] %vm638_vm1, %v3658_v5  ;;  %v1575_v37 = vld [vmem:[#allocation3 + $0x171] sm:$0xff]  ;;  %v3841_v41 = vld [vmem:[#allocation3 + $0x9a] sm:$0xff]  ;;  %v3566_v61 = vmax.f32 %v3470_v47, %v3518_v56  ;;  %v1670_v31 = vmax.f32 %v1606_v4, %v1638_v49  ;;  %v2562_v45 = vmax.f32 %v2466_v23, %v6686_v14  ;;  %v6704_v17 = vld [vmem:[#allocation2 + $0x188] sm:$0xff] }
 0x1db   : > { %3707 = vst.msk [vmem:[#allocation3 + $0xb8] sm:$0xf] %vm951_vm4, %v3659_v38  ;;  %v1639_v1 = vld [vmem:[#allocation3 + $0x172] sm:$0xff]  ;;  %v6697_v15 = vld [vmem:[#allocation2 + $0x120] sm:$0xff]  ;;  %v1607_v2 = vmax.f32 %v1543_v63, %v1575_v37  ;;  %v3873_v44 = vmax.f32 %v3809_v27, %v3841_v41  ;;  %v2676_v3 = vld [vmem:[#allocation3 + $0x109] sm:$0xff]  ;;  %v3037_v37 = vpop.f32.mrf.mxu3 }
 0x1dc   : > { %934 = vst.msk [vmem:[%s5544_s15 + $0x88] sm:$0xff] %vm604_vm5, %v901_v25  ;;  %v1702_v43 = vld [vmem:[#allocation3 + $0x16b] sm:$0xff]  ;;  %v3660_v60 = vmax.f32 %v3564_v52, %v6697_v15  ;;  %v3279_v53 = vld [vmem:[#allocation2 + $0xd8] sm:$0xff]  ;;  %v2708_v6 = vmax.f32 %v2644_v33, %v2676_v3  ;;  %4726 = vmatmul.msk.f32.gmra.mxu0 %vm638_vm1, %v4000_v20  ;;  %4699 = vmatmul.msk.f32.gmra.mxu3 %vm638_vm1, %v6577_v46  ;;  %v3280_v3 = vld [vmem:[#allocation2 + $0xe0] sm:$0xff] }
 0x1dd   : > { %2086 = vst.msk [vmem:[%s5544_s15 + $0x40] sm:$0xff] %vm604_vm5, %v2054_v24  ;;  %v2740_v18 = vld [vmem:[#allocation3 + $0x10a] sm:$0xff]  ;;  %4674 = vmatmul.msk.f32.gmra.mxu2 %vm638_vm1, %v6502_v11  ;;  %v1671_v10 = vmax.f32 %v1607_v2, %v1639_v1  ;;  %v1703_v9 = vld [vmem:[#allocation3 + $0x173] sm:$0xff]  ;;  %v1734_v13 = vmax.f32 %v1670_v31, %v1702_v43  ;;  %v3905_v38 = vld [vmem:[#allocation3 + $0x9b] sm:$0xff]  ;;  %v2563_v11 = vmax.f32 %v2467_v40, %v6704_v17 }
 0x1de   : > { %2609 = vst.msk [vmem:[#allocation3 + $0x118] sm:$0xf] %vm951_vm4, %v2561_v7  ;;  %v2516_v27 = vld [vmem:[#allocation2 + $0x190] sm:$0xf]  ;;  %v2772_v30 = vmax.f32 %v2708_v6, %v2740_v18  ;;  %v3937_v25 = vmax.f32 %v3873_v44, %v3905_v38  ;;  %v3375_v52 = vmax.f32 %v3279_v53, %v6370_v22  ;;  %v1767_v58 = vld [vmem:[#allocation3 + $0x174] sm:$0xff]  ;;  %v3969_v63 = vld [vmem:[#allocation3 + $0x9c] sm:$0xff]  ;;  %v3376_v18 = vmax.f32 %v3280_v3, %v6394_v39 }
 0x1df   : > { %3708 = vst.msk [vmem:[#allocation3 + $0xc0] sm:$0xff] %vm638_vm1, %v3660_v60  ;;  %v2804_v5 = vld [vmem:[#allocation3 + $0x10b] sm:$0xff]  ;;  %v2564_v33 = vmax.f32 %v2468_v62, %v2516_v27  ;;  %v1735_v49 = vmax.f32 %v1671_v10, %v1703_v9  ;;  %v3127_v22 = vld [vmem:[%s5544_s15 + $0x18] sm:$0xff]  ;;  %v2280_v62 = vmax.f32 %v6428_v59, %v6493_v19  ;;  %v3329_v9 = vld [vmem:[#allocation2 + $0x100] sm:$0xf] }
 0x1e0   : > { %v6709_v0 = vld [vmem:[#allocation2 + $0x128] sm:$0xff]  ;;  %v3614_v8 = vld [vmem:[#allocation2 + $0x130] sm:$0xf]  ;;  %2610 = vst.msk [vmem:[#allocation3 + $0x120] sm:$0xff] %vm638_vm1, %v2562_v45  ;;  %v2836_v26 = vmax.f32 %v2772_v30, %v2804_v5  ;;  %v4001_v56 = vmax.f32 %v3937_v25, %v3969_v63  ;;  %v3471_v46 = vmax.f32 %v3375_v52, %v6650_v51  ;;  %v3159_v44 = vadd.f32 %v3127_v22, %v3037_v37  ;;  %v3425_v25 = vld [vmem:[#allocation2 + $0x118] sm:$0xf] }
 0x1e1   : > { %v3746_v29 = vld [vmem:[#allocation3 + $0xa8] sm:$0xff]  ;;  %v3661_v35 = vmax.f32 %v3565_v48, %v6709_v0  ;;  %v3662_v28 = vmax.f32 %v3566_v61, %v3614_v8  ;;  %v2645_v7 = vld [vmem:[#allocation3 + $0x110] sm:$0xff]  ;;  %2611 = vst.msk [vmem:[#allocation3 + $0x128] sm:$0xff] %vm638_vm1, %v2563_v11  ;;  %v2277_v48 = vmax.f32 %v6345_v32, %v6428_v59  ;;  %v6731_v61 = vmax.f32 %v1735_v49, %v1767_v58  ;;  %v2231_v3 = vld [vmem:[#allocation2 + $0x160] sm:$0xf] }
 0x1e2   : > { %v1766_v47 = vld [vmem:[#allocation3 + $0x16c] sm:$0xff]  ;;  %2612 = vst.msk [vmem:[#allocation3 + $0x130] sm:$0xf] %vm951_vm4, %v2564_v33  ;;  %v3281_v45 = vld [vmem:[#allocation2 + $0xe8] sm:$0xf]  ;;  %v3567_v10 = vmax.f32 %v3471_v46, %v6697_v15  ;;  %v2376_v52 = vmax.f32 %v2280_v62, %v6686_v14  ;;  %v6764_v49 = vmax.f32 %v3376_v18, %v6664_v42 }
 0x1e3   : > { %v3778_v24 = vld [vmem:[#allocation3 + $0xa9] sm:$0xff]  ;;  %3709 = vst.msk [vmem:[#allocation3 + $0xc8] sm:$0xff] %vm638_vm1, %v3661_v35  ;;  %v6721_v4 = vmax.f32 %v1734_v13, %v1766_v47  ;;  %v3779_v2 = vld [vmem:[#allocation3 + $0xb1] sm:$0xff]  ;;  %v2373_v8 = vmax.f32 %v2277_v48, %v6493_v19  ;;  %v3377_v38 = vmax.f32 %v3281_v45, %v3329_v9  ;;  %v3040_v63 = vpop.f32.mrf.mxu3 }
 0x1e4   : > { %v3810_v23 = vmax.f32 %v3746_v29, %v3778_v24  ;;  %3710 = vst.msk [vmem:[#allocation3 + $0xd0] sm:$0xf] %vm951_vm4, %v3662_v28  ;;  %v2868_v54 = vld [vmem:[#allocation3 + $0x10c] sm:$0xff]  ;;  %4727 = vmatmul.msk.f32.gmra.mxu0 %vm638_vm1, %v4001_v56  ;;  %v6749_v5 = vld [vmem:[#allocation2 + $0x148] sm:$0xf]  ;;  %4700 = vmatmul.msk.f32.gmra.mxu3 %vm638_vm1, %v6605_v57  ;;  %v810_v29 = vpop.f32.mrf.mxu1  ;;  %v1945_v28 = vpop.f32.mrf.mxu2  ;;  %v2283_v24 = vmax.f32 %v6493_v19, %v6686_v14  ;;  %v3128_v57 = vld [vmem:[%s5544_s15 + $0x20] sm:$0xff] }
 0x1e5   : > { %v6724_v50 = vmax.f32 %v2836_v26, %v2868_v54  ;;  %v3842_v40 = vld [vmem:[#allocation3 + $0xaa] sm:$0xff]  ;;  %v2741_v41 = vld [vmem:[#allocation3 + $0x112] sm:$0xff]  ;;  %4675 = vmatmul.msk.f32.gmra.mxu2 %vm638_vm1, %v6525_v12  ;;  %2140 = vst.msk [vmem:[#allocation2 + $0x19a] sm:$0xff] %vm638_vm1, %v6721_v4  ;;  %v2469_v37 = vmax.f32 %v2373_v8, %v6686_v14  ;;  %v3160_v46 = vadd.f32 %v3128_v57, %v3040_v63 }
 0x1e6   : > { %v2677_v1 = vld [vmem:[#allocation3 + $0x111] sm:$0xff]  ;;  %v3874_v31 = vmax.f32 %v3810_v23, %v3842_v40  ;;  %3191 = vst.msk [vmem:[%s5544_s15 + $0x18] sm:$0xff] %vm604_vm5, %v3159_v44  ;;  %v2023_v30 = vld [vmem:[%s5544_s15 + $0x48] sm:$0xff]  ;;  %v3473_v48 = vmax.f32 %v3377_v38, %v3425_v25  ;;  %v2278_v38 = vmax.f32 %v6417_v21, %v6447_v16 }
 0x1e7   : > { %v3747_v43 = vld [vmem:[#allocation3 + $0xb0] sm:$0xff]  ;;  %v2709_v60 = vmax.f32 %v2645_v7, %v2677_v1  ;;  %3242 = vst.msk [vmem:[#allocation2 + $0x13a] sm:$0xff] %vm638_vm1, %v6724_v50  ;;  %v2646_v47 = vld [vmem:[#allocation3 + $0x120] sm:$0xff]  ;;  %v2055_v26 = vadd.f32 %v2023_v30, %v1945_v28  ;;  %v2234_v8 = vld [vmem:[#allocation2 + $0x178] sm:$0xf] }
 0x1e8   : > { %v2805_v53 = vld [vmem:[#allocation3 + $0x113] sm:$0xff]  ;;  %v3906_v20 = vld [vmem:[#allocation3 + $0xab] sm:$0xff]  ;;  %v3811_v6 = vmax.f32 %v3747_v43, %v3779_v2  ;;  %2141 = vst.msk [vmem:[#allocation2 + $0x1a2] sm:$0xff] %vm638_vm1, %v6731_v61  ;;  %v2678_v22 = vld [vmem:[#allocation3 + $0x121] sm:$0xff] }
 0x1e9   : > { %v2773_v32 = vmax.f32 %v2709_v60, %v2741_v41  ;;  %v3938_v12 = vmax.f32 %v3874_v31, %v3906_v20  ;;  %v3970_v13 = vld [vmem:[#allocation3 + $0xac] sm:$0xff]  ;;  %v2869_v39 = vld [vmem:[#allocation3 + $0x114] sm:$0xff]  ;;  %v2742_v40 = vld [vmem:[#allocation3 + $0x122] sm:$0xff]  ;;  %v2710_v31 = vmax.f32 %v2646_v47, %v2678_v22  ;;  %2087 = vst.msk [vmem:[%s5544_s15 + $0x48] sm:$0xff] %vm604_vm5, %v2055_v26 }
 0x1ea   : > { %v3843_v59 = vld [vmem:[#allocation3 + $0xb2] sm:$0xff]  ;;  %v2647_v7 = vld [vmem:[#allocation3 + $0x128] sm:$0xff]  ;;  %v3748_v1 = vld [vmem:[#allocation3 + $0xc0] sm:$0xff]  ;;  %3192 = vst.msk [vmem:[%s5544_s15 + $0x20] sm:$0xff] %vm604_vm5, %v3160_v46 }
 0x1eb   : > { %v2837_v27 = vmax.f32 %v2773_v32, %v2805_v53  ;;  %v870_v35 = vld [vmem:[%s5544_s15 + $0x90] sm:$0xff]  ;;  %v6760_v33 = vmax.f32 %v3811_v6, %v3843_v59  ;;  %v4002_v54 = vmax.f32 %v3938_v12, %v3970_v13  ;;  %v3780_v41 = vld [vmem:[#allocation3 + $0xc1] sm:$0xff]  ;;  %v3568_v53 = vmax.f32 %v6764_v49, %v6709_v0  ;;  %v871_v30 = vld [vmem:[%s5544_s15 + $0x98] sm:$0xff]  ;;  %v3043_v22 = vpop.f32.mrf.mxu3 }
 0x1ec   : > { %v902_v23 = vadd.f32 %v870_v35, %v810_v29  ;;  %v2679_v56 = vld [vmem:[#allocation3 + $0x129] sm:$0xff]  ;;  %v3907_v44 = vld [vmem:[#allocation3 + $0xb3] sm:$0xff]  ;;  %v6777_v60 = vld [vmem:[#allocation2 + $0x160] sm:$0xf]  ;;  %v2774_v32 = vmax.f32 %v2710_v31, %v2742_v40  ;;  %v3812_v6 = vmax.f32 %v3748_v1, %v3780_v41  ;;  %4701 = vmatmul.msk.f32.gmra.mxu3 %vm638_vm1, %v6637_v55  ;;  %v813_v28 = vpop.f32.mrf.mxu1  ;;  %v1948_v47 = vpop.f32.mrf.mxu2  ;;  %v2281_v55 = vmax.f32 %v6447_v16, %v6607_v34 }
 0x1ed   : > { %v6755_v11 = vmax.f32 %v2837_v27, %v2869_v39  ;;  %4676 = vmatmul.msk.f32.gmra.mxu2 %vm638_vm1, %v6721_v4  ;;  %v2711_v43 = vmax.f32 %v2647_v7, %v2679_v56  ;;  %v2743_v2 = vld [vmem:[#allocation3 + $0x12a] sm:$0xff]  ;;  %4728 = vmatmul.msk.f32.gmra.mxu0 %vm638_vm1, %v4002_v54  ;;  %v2331_v4 = vld [vmem:[#allocation2 + $0x198] sm:$0xff]  ;;  %v3939_v14 = vmax.f32 %v6760_v33, %v3907_v44  ;;  %v3844_v59 = vld [vmem:[#allocation3 + $0xc2] sm:$0xff] }
 0x1ee   : > { %v6766_v58 = vld [vmem:[#allocation2 + $0x138] sm:$0xff]  ;;  %935 = vst.msk [vmem:[%s5544_s15 + $0x90] sm:$0xff] %vm604_vm5, %v902_v23  ;;  %v2806_v62 = vld [vmem:[#allocation3 + $0x123] sm:$0xff]  ;;  %v6786_v20 = vld [vmem:[#allocation2 + $0x1b0] sm:$0xff]  ;;  %v2379_v27 = vmax.f32 %v2283_v24, %v2331_v4  ;;  %v2565_v9 = vmax.f32 %v2469_v37, %v2331_v4  ;;  %v2279_v33 = vmax.f32 %v6749_v5, %v2231_v3  ;;  %v903_v21 = vadd.f32 %v871_v30, %v813_v28 }
 0x1ef   : > { %3243 = vst.msk [vmem:[#allocation2 + $0x142] sm:$0xff] %vm638_vm1, %v6755_v11  ;;  %v3663_v19 = vmax.f32 %v3567_v10, %v6766_v58  ;;  %v2775_v45 = vmax.f32 %v2711_v43, %v2743_v2  ;;  %v3521_v18 = vld [vmem:[#allocation2 + $0x130] sm:$0xf]  ;;  %v2472_v10 = vmax.f32 %v2376_v52, %v2331_v4  ;;  %v3971_v13 = vld [vmem:[#allocation3 + $0xb4] sm:$0xff]  ;;  %v6793_v35 = vld [vmem:[#allocation3 + $0xc8] sm:$0xff]  ;;  %v2838_v24 = vmax.f32 %v2774_v32, %v2806_v62 }
 0x1f0   : > { %v2807_v12 = vld [vmem:[#allocation3 + $0x12b] sm:$0xff]  ;;  %v3569_v39 = vmax.f32 %v3473_v48, %v3521_v18  ;;  %v2327_v29 = vld [vmem:[#allocation2 + $0x178] sm:$0xf]  ;;  %2613 = vst.msk [vmem:[#allocation3 + $0x138] sm:$0xff] %vm638_vm1, %v2565_v9  ;;  %v2282_v54 = vmax.f32 %v6777_v60, %v2234_v8  ;;  %v4003_v63 = vmax.f32 %v3939_v14, %v3971_v13  ;;  %v2475_v16 = vmax.f32 %v2379_v27, %v6786_v20  ;;  %v3908_v44 = vld [vmem:[#allocation3 + $0xc3] sm:$0xff] }
 0x1f1   : > { %3711 = vst.msk [vmem:[#allocation3 + $0xd8] sm:$0xff] %vm638_vm1, %v3663_v19  ;;  %v2024_v25 = vld [vmem:[%s5544_s15 + $0x50] sm:$0xff]  ;;  %v2568_v52 = vmax.f32 %v2472_v10, %v6786_v20  ;;  %v2839_v49 = vmax.f32 %v2775_v45, %v2807_v12  ;;  %v2870_v7 = vld [vmem:[#allocation3 + $0x124] sm:$0xff]  ;;  %v3876_v19 = vmax.f32 %v3812_v6, %v3844_v59  ;;  %v2374_v31 = vmax.f32 %v2278_v38, %v6607_v34  ;;  %v3283_v32 = vld [vmem:[#allocation2 + $0xf8] sm:$0xff] }
 0x1f2   : > { %v3781_v23 = vld [vmem:[#allocation3 + $0xc9] sm:$0xff]  ;;  %v2056_v26 = vadd.f32 %v2024_v25, %v1948_v47  ;;  %936 = vst.msk [vmem:[%s5544_s15 + $0x98] sm:$0xff] %vm604_vm5, %v903_v21  ;;  %v6817_v43 = vmax.f32 %v2838_v24, %v2870_v7  ;;  %v2375_v2 = vmax.f32 %v2279_v33, %v2327_v29  ;;  %v6826_v62 = vld [vmem:[#allocation2 + $0x1a0] sm:$0xff]  ;;  %v3332_v12 = vld [vmem:[#allocation2 + $0x118] sm:$0xf]  ;;  %v3379_v38 = vmax.f32 %v3283_v32, %v6664_v42 }
 0x1f3   : > { %v3129_v56 = vld [vmem:[%s5544_s15 + $0x28] sm:$0xff]  ;;  %2616 = vst.msk [vmem:[#allocation3 + $0x150] sm:$0xff] %vm638_vm1, %v2568_v52  ;;  %v2330_v48 = vld [vmem:[#allocation2 + $0x190] sm:$0xf]  ;;  %v3813_v60 = vmax.f32 %v6793_v35, %v3781_v23  ;;  %v3940_v3 = vmax.f32 %v3876_v19, %v3908_v44  ;;  %v4234_v6 = vld [vmem:[%s5544_s15] sm:$0xff]  ;;  %v2470_v10 = vmax.f32 %v2374_v31, %v6704_v17 }
 0x1f4   : > { %v2871_v37 = vld [vmem:[#allocation3 + $0x12c] sm:$0xff]  ;;  %v3161_v1 = vadd.f32 %v3129_v56, %v3043_v22  ;;  %2088 = vst.msk [vmem:[%s5544_s15 + $0x50] sm:$0xff] %vm604_vm5, %v2056_v26  ;;  %v2378_v20 = vmax.f32 %v2282_v54, %v2330_v48  ;;  %4702 = vmatmul.msk.f32.gmra.mxu3 %vm638_vm1, %v6724_v50  ;;  %v2426_v27 = vld [vmem:[#allocation2 + $0x1a8] sm:$0xf]  ;;  %v816_v8 = vpop.f32.mrf.mxu1  ;;  %v872_v13 = vld [vmem:[%s5544_s15 + $0xa0] sm:$0xff]  ;;  %v1951_v59 = vpop.f32.mrf.mxu2 }
 0x1f5   : > { %v2523_v46 = vld [vmem:[#allocation2 + $0x1c8] sm:$0xff]  ;;  %4677 = vmatmul.msk.f32.gmra.mxu2 %vm638_vm1, %v6731_v61  ;;  %4729 = vmatmul.msk.f32.gmra.mxu0 %vm638_vm1, %v4003_v63  ;;  %v6822_v4 = vmax.f32 %v2839_v49, %v2871_v37  ;;  %v2377_v61 = vmax.f32 %v2281_v55, %v6704_v17  ;;  %v2423_v14 = vld [vmem:[#allocation2 + $0x190] sm:$0xf]  ;;  %3244 = vst.msk [vmem:[#allocation2 + $0x152] sm:$0xff] %vm638_vm1, %v6817_v43  ;;  %v3284_v47 = vld [vmem:[#allocation2 + $0x100] sm:$0xf]  ;;  %v3046_v55 = vpop.f32.mrf.mxu3 }
 0x1f6   : > { %v6802_v57 = vld [vmem:[#allocation2 + $0x140] sm:$0xff]  ;;  %v3617_v40 = vld [vmem:[#allocation2 + $0x148] sm:$0xf]  ;;  %3193 = vst.msk [vmem:[%s5544_s15 + $0x28] sm:$0xff] %vm604_vm5, %v3161_v1  ;;  %v2571_v45 = vmax.f32 %v2475_v16, %v2523_v46  ;;  %v2471_v50 = vmax.f32 %v2375_v2, %v2423_v14  ;;  %v3130_v23 = vld [vmem:[%s5544_s15 + $0x30] sm:$0xff]  ;;  %v3380_v42 = vmax.f32 %v3284_v47, %v3332_v12  ;;  %v2474_v26 = vmax.f32 %v2378_v20, %v2426_v27 }
 0x1f7   : > { %v3664_v5 = vmax.f32 %v3568_v53, %v6802_v57  ;;  %v3665_v41 = vmax.f32 %v3569_v39, %v3617_v40  ;;  %v3282_v53 = vld [vmem:[#allocation2 + $0xf0] sm:$0xff]  ;;  %v2025_v39 = vld [vmem:[%s5544_s15 + $0x58] sm:$0xff]  ;;  %v3972_v35 = vld [vmem:[#allocation3 + $0xc4] sm:$0xff]  ;;  %3245 = vst.msk [vmem:[#allocation2 + $0x15a] sm:$0xff] %vm638_vm1, %v6822_v4  ;;  %v2473_v25 = vmax.f32 %v2377_v61, %v6826_v62  ;;  %v3162_v7 = vadd.f32 %v3130_v23, %v3046_v55 }
 0x1f8   : > { %v3378_v18 = vmax.f32 %v3282_v53, %v6650_v51  ;;  %v3845_v9 = vld [vmem:[#allocation3 + $0xca] sm:$0xff]  ;;  %v904_v51 = vadd.f32 %v872_v13, %v816_v8  ;;  %v2057_v30 = vadd.f32 %v2025_v39, %v1951_v59  ;;  %v4004_v33 = vmax.f32 %v3940_v3, %v3972_v35  ;;  %2619 = vst.msk [vmem:[#allocation3 + $0x168] sm:$0xff] %vm638_vm1, %v2571_v45  ;;  %v6844_v21 = vld [vmem:[#allocation2 + $0x1b8] sm:$0xff]  ;;  %v2522_v63 = vld [vmem:[#allocation2 + $0x1c0] sm:$0xf] }
 0x1f9   : > { %3712 = vst.msk [vmem:[#allocation3 + $0xe0] sm:$0xff] %vm638_vm1, %v3664_v5  ;;  %v4138_v29 = vpop.f32.mrf.mxu0  ;;  %v3877_v28 = vmax.f32 %v3813_v60, %v3845_v9  ;;  %v2519_v24 = vld [vmem:[#allocation2 + $0x1a8] sm:$0xf]  ;;  %v3750_v49 = vld [vmem:[#allocation3 + $0xd8] sm:$0xff]  ;;  %v2566_v19 = vmax.f32 %v2470_v10, %v6826_v62  ;;  %v2237_v56 = vld [vmem:[#allocation2 + $0x190] sm:$0xf]  ;;  %v3475_v16 = vmax.f32 %v3379_v38, %v6709_v0  ;;  %v2569_v1 = vmax.f32 %v2473_v25, %v6844_v21 }
 0x1fa   : > { %3713 = vst.msk [vmem:[#allocation3 + $0xe8] sm:$0xf] %vm951_vm4, %v3665_v41  ;;  %v4266_v52 = vadd.f32 %v4234_v6, %v4138_v29  ;;  %v3474_v54 = vmax.f32 %v3378_v18, %v6697_v15  ;;  %v2189_v22 = vld [vmem:[#allocation2 + $0x178] sm:$0xf]  ;;  %v2567_v5 = vmax.f32 %v2471_v50, %v2519_v24  ;;  %v3909_v40 = vld [vmem:[#allocation3 + $0xcb] sm:$0xff]  ;;  %v2570_v31 = vmax.f32 %v2474_v26, %v2522_v63  ;;  %v2026_v53 = vld [vmem:[%s5544_s15 + $0x60] sm:$0xff] }
 0x1fb   : > { %937 = vst.msk [vmem:[%s5544_s15 + $0xa0] sm:$0xff] %vm604_vm5, %v904_v51  ;;  %v3428_v15 = vld [vmem:[#allocation2 + $0x130] sm:$0xf]  ;;  %v3941_v41 = vmax.f32 %v3877_v28, %v3909_v40  ;;  %v4235_v2 = vld [vmem:[%s5544_s15 + $0x8] sm:$0xff]  ;;  %v2284_v0 = vmax.f32 %v6607_v34, %v6704_v17  ;;  %v2285_v32 = vmax.f32 %v2189_v22, %v2237_v56  ;;  %v3571_v34 = vmax.f32 %v3475_v16, %v6802_v57  ;;  %v3131_v59 = vld [vmem:[%s5544_s15 + $0x38] sm:$0xff] }
 0x1fc   : > { %4298 = vst.msk [vmem:[%s5544_s15] sm:$0xff] %vm604_vm5, %v4266_v52  ;;  %v3476_v48 = vmax.f32 %v3380_v42, %v3428_v15  ;;  %v3973_v44 = vld [vmem:[#allocation3 + $0xcc] sm:$0xff]  ;;  %4703 = vmatmul.msk.f32.gmra.mxu3 %vm638_vm1, %v6755_v11  ;;  %v3570_v60 = vmax.f32 %v3474_v54, %v6766_v58  ;;  %v819_v61 = vpop.f32.mrf.mxu1  ;;  %v1954_v3 = vpop.f32.mrf.mxu2  ;;  %v2333_v45 = vld [vmem:[#allocation2 + $0x1a8] sm:$0xf]  ;;  %v2648_v25 = vld [vmem:[#allocation3 + $0x138] sm:$0xff] }
 0x1fd   : > { %4730 = vmatmul.msk.f32.gmra.mxu0 %vm638_vm1, %v4004_v33  ;;  %2089 = vst.msk [vmem:[%s5544_s15 + $0x58] sm:$0xff] %vm604_vm5, %v2057_v30  ;;  %v873_v14 = vld [vmem:[%s5544_s15 + $0xa8] sm:$0xff]  ;;  %v2058_v12 = vadd.f32 %v2026_v53, %v1954_v3  ;;  %v4005_v10 = vmax.f32 %v3941_v41, %v3973_v44  ;;  %v3049_v13 = vpop.f32.mrf.mxu3  ;;  %v6874_v39 = vld [vmem:[#allocation2 + $0x150] sm:$0xff]  ;;  %v2380_v51 = vmax.f32 %v2284_v0, %v6826_v62  ;;  %v6892_v42 = vld [vmem:[#allocation2 + $0x1c0] sm:$0xf] }
 0x1fe   : > { %3194 = vst.msk [vmem:[%s5544_s15 + $0x30] sm:$0xff] %vm604_vm5, %v3162_v7  ;;  %v905_v18 = vadd.f32 %v873_v14, %v819_v61  ;;  %v3524_v17 = vld [vmem:[#allocation2 + $0x148] sm:$0xf]  ;;  %v3163_v29 = vadd.f32 %v3131_v59, %v3049_v13  ;;  %v3666_v35 = vmax.f32 %v3570_v60, %v6874_v39  ;;  %v3620_v28 = vld [vmem:[#allocation2 + $0x160] sm:$0xf]  ;;  %v6885_v47 = vld [vmem:[#allocation2 + $0x158] sm:$0xff]  ;;  %v6887_v24 = vmax.f32 %v2285_v32, %v2333_v45 }
 0x1ff   : > { %2614 = vst.msk [vmem:[#allocation3 + $0x140] sm:$0xff] %vm638_vm1, %v2566_v19  ;;  %v3572_v38 = vmax.f32 %v3476_v48, %v3524_v17  ;;  %v3667_v55 = vmax.f32 %v3571_v34, %v6885_v47  ;;  %v2650_v23 = vld [vmem:[#allocation3 + $0x150] sm:$0xff]  ;;  %v6908_v60 = vld [vmem:[#allocation2 + $0x108] sm:$0xff]  ;;  %v3132_v3 = vld [vmem:[%s5544_s15 + $0x40] sm:$0xff] }
 0x200   : > { %v3782_v37 = vld [vmem:[#allocation3 + $0xd9] sm:$0xff]  ;;  %2615 = vst.msk [vmem:[#allocation3 + $0x148] sm:$0xf] %vm951_vm4, %v2567_v5  ;;  %v4236_v19 = vld [vmem:[%s5544_s15 + $0x10] sm:$0xff]  ;;  %v2476_v5 = vmax.f32 %v2380_v51, %v6844_v21  ;;  %v2477_v48 = vmax.f32 %v6887_v24, %v6892_v42 }
 0x201   : > { %v3814_v46 = vmax.f32 %v3750_v49, %v3782_v37  ;;  %v4141_v20 = vpop.f32.mrf.mxu0  ;;  %v3846_v6 = vld [vmem:[#allocation3 + $0xda] sm:$0xff]  ;;  %2617 = vst.msk [vmem:[#allocation3 + $0x158] sm:$0xff] %vm638_vm1, %v2569_v1  ;;  %v3668_v49 = vmax.f32 %v3572_v38, %v3620_v28  ;;  %v3847_v56 = vld [vmem:[#allocation3 + $0xe2] sm:$0xff]  ;;  %v874_v1 = vld [vmem:[%s5544_s15 + $0xb0] sm:$0xff] }
 0x202   : > { %v3751_v11 = vld [vmem:[#allocation3 + $0xe0] sm:$0xff]  ;;  %v4267_v27 = vadd.f32 %v4235_v2, %v4141_v20  ;;  %2618 = vst.msk [vmem:[#allocation3 + $0x160] sm:$0xf] %vm951_vm4, %v2570_v31  ;;  %v2525_v31 = vld [vmem:[#allocation2 + $0x1d8] sm:$0xf] }
 0x203   : > { %v6871_v9 = vmax.f32 %v3814_v46, %v3846_v6  ;;  %v3783_v8 = vld [vmem:[#allocation3 + $0xe1] sm:$0xff]  ;;  %938 = vst.msk [vmem:[%s5544_s15 + $0xa8] sm:$0xff] %vm604_vm5, %v905_v18 }
 0x204   : > { %v4333_v50 = vld [vmem:[%s5544_s15] sm:$0xff]  ;;  %4299 = vst.msk [vmem:[%s5544_s15 + $0x8] sm:$0xff] %vm604_vm5, %v4267_v27  ;;  %v3815_v33 = vmax.f32 %v3751_v11, %v3783_v8  ;;  %4704 = vmatmul.msk.f32.gmra.mxu3 %vm638_vm1, %v6817_v43  ;;  %v822_v15 = vpop.f32.mrf.mxu1  ;;  %v1957_v41 = vpop.f32.mrf.mxu2  ;;  %v2027_v46 = vld [vmem:[%s5544_s15 + $0x68] sm:$0xff]  ;;  %v2572_v8 = vmax.f32 %v2476_v5, %v6557_v36  ;;  %v2573_v36 = vmax.f32 %v2477_v48, %v2525_v31  ;;  %v3335_v48 = vld [vmem:[#allocation2 + $0x130] sm:$0xf] }
 0x205   : > { %v4365_v30 = vmul.f32 0.1, %v4333_v50  ;;  %4731 = vmatmul.msk.f32.gmra.mxu0 %vm638_vm1, %v4005_v10  ;;  %v3910_v52 = vld [vmem:[#allocation3 + $0xdb] sm:$0xff]  ;;  %2090 = vst.msk [vmem:[%s5544_s15 + $0x60] sm:$0xff] %vm604_vm5, %v2058_v12  ;;  %v906_v61 = vadd.f32 %v874_v1, %v822_v15  ;;  %v2059_v14 = vadd.f32 %v2027_v46, %v1957_v41  ;;  %v3052_v11 = vpop.f32.mrf.mxu3  ;;  %v3975_v15 = vld [vmem:[#allocation3 + $0xe4] sm:$0xff] }
 0x206   : > { %v3942_v26 = vmax.f32 %v6871_v9, %v3910_v52  ;;  %3195 = vst.msk [vmem:[%s5544_s15 + $0x38] sm:$0xff] %vm604_vm5, %v3163_v29  ;;  %v2649_v7 = vld [vmem:[#allocation3 + $0x140] sm:$0xff]  ;;  %v6912_v0 = vmax.f32 %v3815_v33, %v3847_v56  ;;  %v3164_v9 = vadd.f32 %v3132_v3, %v3052_v11  ;;  %v3286_v52 = vld [vmem:[#allocation2 + $0x110] sm:$0xff]  ;;  %v6927_v33 = vld [vmem:[#allocation2 + $0x128] sm:$0xff] }
 0x207   : > { %v4397_v62 = vmax.f32 %v4333_v50, %v4365_v30  ;;  %v2680_v54 = vld [vmem:[#allocation3 + $0x139] sm:$0xff]  ;;  %3714 = vst.msk [vmem:[#allocation3 + $0xf0] sm:$0xff] %vm638_vm1, %v3666_v35  ;;  %v2681_v40 = vld [vmem:[#allocation3 + $0x141] sm:$0xff] }
 0x208   : > { %v2744_v63 = vld [vmem:[#allocation3 + $0x13a] sm:$0xff]  ;;  %v2712_v37 = vmax.f32 %v2648_v25, %v2680_v54  ;;  %v2745_v16 = vld [vmem:[#allocation3 + $0x142] sm:$0xff]  ;;  %v2713_v2 = vmax.f32 %v2649_v7, %v2681_v40  ;;  %3715 = vst.msk [vmem:[#allocation3 + $0xf8] sm:$0xff] %vm638_vm1, %v3667_v55  ;;  %v2682_v32 = vld [vmem:[#allocation3 + $0x151] sm:$0xff]  ;;  %v3382_v40 = vmax.f32 %v3286_v52, %v6927_v33 }
 0x209   : > { %v3974_v22 = vld [vmem:[#allocation3 + $0xdc] sm:$0xff]  ;;  %4429 = vst.msk [vmem:[%s5544_s15] sm:$0xff] %vm604_vm5, %v4397_v62  ;;  %v4144_v21 = vpop.f32.mrf.mxu0  ;;  %v2714_v12 = vmax.f32 %v2650_v23, %v2682_v32  ;;  %v2746_v34 = vld [vmem:[#allocation3 + $0x152] sm:$0xff]  ;;  %v2873_v25 = vld [vmem:[#allocation3 + $0x144] sm:$0xff] }
 0x20a   : > { %v2808_v44 = vld [vmem:[#allocation3 + $0x13b] sm:$0xff]  ;;  %v2776_v45 = vmax.f32 %v2712_v37, %v2744_v63  ;;  %v4268_v20 = vadd.f32 %v4236_v19, %v4144_v21  ;;  %v4006_v6 = vmax.f32 %v3942_v26, %v3974_v22  ;;  %3716 = vst.msk [vmem:[#allocation3 + $0x100] sm:$0xf] %vm951_vm4, %v3668_v49  ;;  %v2777_v27 = vmax.f32 %v2713_v2, %v2745_v16  ;;  %v2809_v59 = vld [vmem:[#allocation3 + $0x143] sm:$0xff]  ;;  %v2810_v38 = vld [vmem:[#allocation3 + $0x153] sm:$0xff] }
 0x20b   : > { %v6910_v43 = vld [vmem:[#allocation2 + $0x120] sm:$0xff]  ;;  %v2651_v53 = vld [vmem:[#allocation3 + $0x158] sm:$0xff]  ;;  %v4334_v10 = vld [vmem:[%s5544_s15 + $0x8] sm:$0xff]  ;;  %939 = vst.msk [vmem:[%s5544_s15 + $0xb0] sm:$0xff] %vm604_vm5, %v906_v61  ;;  %v2778_v28 = vmax.f32 %v2714_v12, %v2746_v34 }
 0x20c   : > { %v2683_v18 = vld [vmem:[#allocation3 + $0x159] sm:$0xff]  ;;  %v2840_v50 = vmax.f32 %v2776_v45, %v2808_v44  ;;  %v4366_v29 = vmul.f32 0.1, %v4334_v10  ;;  %4300 = vst.msk [vmem:[%s5544_s15 + $0x10] sm:$0xff] %vm604_vm5, %v4268_v20  ;;  %v3911_v35 = vld [vmem:[#allocation3 + $0xe3] sm:$0xff]  ;;  %v2841_v51 = vmax.f32 %v2777_v27, %v2809_v59  ;;  %v3381_v55 = vmax.f32 %v6908_v60, %v6910_v43  ;;  %4705 = vmatmul.msk.f32.gmra.mxu3 %vm638_vm1, %v6822_v4  ;;  %v825_v56 = vpop.f32.mrf.mxu1  ;;  %v1960_v5 = vpop.f32.mrf.mxu2  ;;  %v2028_v32 = vld [vmem:[%s5544_s15 + $0x70] sm:$0xff] }
 0x20d   : > { %v2747_v17 = vld [vmem:[#allocation3 + $0x15a] sm:$0xff]  ;;  %v2715_v13 = vmax.f32 %v2651_v53, %v2683_v18  ;;  %4732 = vmatmul.msk.f32.gmra.mxu0 %vm638_vm1, %v4006_v6  ;;  %v3943_v24 = vmax.f32 %v6912_v0, %v3911_v35  ;;  %2091 = vst.msk [vmem:[%s5544_s15 + $0x68] sm:$0xff] %vm604_vm5, %v2059_v14  ;;  %v2842_v26 = vmax.f32 %v2778_v28, %v2810_v38  ;;  %v3055_v0 = vpop.f32.mrf.mxu3  ;;  %v2652_v45 = vld [vmem:[#allocation3 + $0x168] sm:$0xff] }
 0x20e   : > { %v2872_v30 = vld [vmem:[#allocation3 + $0x13c] sm:$0xff]  ;;  %v4398_v23 = vmax.f32 %v4334_v10, %v4366_v29  ;;  %v3752_v42 = vld [vmem:[#allocation3 + $0xf0] sm:$0xff]  ;;  %3196 = vst.msk [vmem:[%s5544_s15 + $0x40] sm:$0xff] %vm604_vm5, %v3164_v9  ;;  %v6936_v63 = vmax.f32 %v2841_v51, %v2873_v25  ;;  %v6942_v37 = vld [vmem:[#allocation2 + $0x118] sm:$0xf]  ;;  %v6948_v46 = vmax.f32 %v3381_v55, %v6766_v58  ;;  %v2060_v6 = vadd.f32 %v2028_v32, %v1960_v5 }
 0x20f   : > { %v2779_v62 = vmax.f32 %v2715_v13, %v2747_v17  ;;  %v2874_v49 = vld [vmem:[#allocation3 + $0x154] sm:$0xff]  ;;  %v2904_v7 = vmax.f32 %v2840_v50, %v2872_v30  ;;  %2620 = vst.msk [vmem:[#allocation3 + $0x170] sm:$0xff] %vm638_vm1, %v2572_v8  ;;  %v2875_v4 = vld [vmem:[#allocation3 + $0x15c] sm:$0xff]  ;;  %v4007_v2 = vmax.f32 %v3943_v24, %v3975_v15  ;;  %v3133_v11 = vld [vmem:[%s5544_s15 + $0x48] sm:$0xff]  ;;  %v3478_v18 = vmax.f32 %v3382_v40, %v6802_v57 }
 0x210   : > { %v2811_v54 = vld [vmem:[#allocation3 + $0x15b] sm:$0xff]  ;;  %4430 = vst.msk [vmem:[%s5544_s15 + $0x8] sm:$0xff] %vm604_vm5, %v4398_v23  ;;  %v3784_v22 = vld [vmem:[#allocation3 + $0xf1] sm:$0xff]  ;;  %v6945_v41 = vmax.f32 %v2842_v26, %v2874_v49  ;;  %v3165_v34 = vadd.f32 %v3133_v11, %v3055_v0  ;;  %v3573_v17 = vmax.f32 %v6948_v46, %v6874_v39  ;;  %v3383_v27 = vmax.f32 %v6942_v37, %v3335_v48  ;;  %v3431_v10 = vld [vmem:[#allocation2 + $0x148] sm:$0xf] }
 0x211   : > { %v4237_v19 = vld [vmem:[%s5544_s15 + $0x18] sm:$0xff]  ;;  %v4147_v16 = vpop.f32.mrf.mxu0  ;;  %v3816_v1 = vmax.f32 %v3752_v42, %v3784_v22  ;;  %2621 = vst.msk [vmem:[#allocation3 + $0x178] sm:$0xf] %vm951_vm4, %v2573_v36  ;;  %v2843_v61 = vmax.f32 %v2779_v62, %v2811_v54  ;;  %v4238_v35 = vld [vmem:[%s5544_s15 + $0x20] sm:$0xff]  ;;  %v3574_v24 = vmax.f32 %v3478_v18, %v6885_v47 }
 0x212   : > { %v4269_v31 = vadd.f32 %v4237_v19, %v4147_v16  ;;  %v3848_v44 = vld [vmem:[#allocation3 + $0xf2] sm:$0xff]  ;;  %3246 = vst.msk [vmem:[#allocation2 + $0x16a] sm:$0xff] %vm638_vm1, %v2904_v7  ;;  %v3849_v62 = vld [vmem:[#allocation3 + $0xfa] sm:$0xff]  ;;  %v3479_v54 = vmax.f32 %v3383_v27, %v3431_v10 }
 0x213   : > { %v3753_v60 = vld [vmem:[#allocation3 + $0xf8] sm:$0xff]  ;;  %v4335_v14 = vld [vmem:[%s5544_s15 + $0x10] sm:$0xff]  ;;  %v3880_v3 = vmax.f32 %v3816_v1, %v3848_v44  ;;  %3247 = vst.msk [vmem:[#allocation2 + $0x172] sm:$0xff] %vm638_vm1, %v6936_v63  ;;  %v6968_v29 = vmax.f32 %v2843_v61, %v2875_v4  ;;  %v876_v48 = vld [vmem:[%s5544_s15 + $0xc0] sm:$0xff] }
 0x214   : > { %v3785_v21 = vld [vmem:[#allocation3 + $0xf9] sm:$0xff]  ;;  %v4367_v58 = vmul.f32 0.1, %v4335_v14  ;;  %4301 = vst.msk [vmem:[%s5544_s15 + $0x18] sm:$0xff] %vm604_vm5, %v4269_v31  ;;  %4706 = vmatmul.msk.f32.gmra.mxu3 %vm638_vm1, %v2904_v7  ;;  %v828_v36 = vpop.f32.mrf.mxu1  ;;  %v1963_v52 = vpop.f32.mrf.mxu2 }
 0x215   : > { %v875_v53 = vld [vmem:[%s5544_s15 + $0xb8] sm:$0xff]  ;;  %4733 = vmatmul.msk.f32.gmra.mxu0 %vm638_vm1, %v4007_v2  ;;  %3248 = vst.msk [vmem:[#allocation2 + $0x182] sm:$0xff] %vm638_vm1, %v6945_v41  ;;  %v3817_v13 = vmax.f32 %v3753_v60, %v3785_v21  ;;  %v3058_v15 = vpop.f32.mrf.mxu3  ;;  %v3527_v31 = vld [vmem:[#allocation2 + $0x160] sm:$0xf] }
 0x216   : > { %v907_v20 = vadd.f32 %v875_v53, %v825_v56  ;;  %v3912_v12 = vld [vmem:[#allocation3 + $0xf3] sm:$0xff]  ;;  %v4399_v9 = vmax.f32 %v4335_v14, %v4367_v58  ;;  %v2684_v38 = vld [vmem:[#allocation3 + $0x169] sm:$0xff]  ;;  %2092 = vst.msk [vmem:[%s5544_s15 + $0x70] sm:$0xff] %vm604_vm5, %v2060_v6  ;;  %v3913_v21 = vld [vmem:[#allocation3 + $0xfb] sm:$0xff]  ;;  %v3388_v14 = vmax.f32 %v6802_v57, %v6885_v47  ;;  %v3575_v6 = vmax.f32 %v3479_v54, %v3527_v31 }
 0x217   : > { %v3944_v8 = vmax.f32 %v3880_v3, %v3912_v12  ;;  %v2653_v59 = vld [vmem:[#allocation3 + $0x170] sm:$0xff]  ;;  %v2716_v28 = vmax.f32 %v2652_v45, %v2684_v38  ;;  %v6977_v55 = vld [vmem:[#allocation2 + $0x138] sm:$0xff]  ;;  %3197 = vst.msk [vmem:[%s5544_s15 + $0x48] sm:$0xff] %vm604_vm5, %v3165_v34  ;;  %v3881_v56 = vmax.f32 %v3817_v13, %v3849_v62  ;;  %v3337_v3 = vld [vmem:[#allocation2 + $0x140] sm:$0xff]  ;;  %v908_v45 = vadd.f32 %v876_v48, %v828_v36 }
 0x218   : > { %940 = vst.msk [vmem:[%s5544_s15 + $0xb8] sm:$0xff] %vm604_vm5, %v907_v20  ;;  %v2748_v50 = vld [vmem:[#allocation3 + $0x16a] sm:$0xff]  ;;  %v2749_v30 = vld [vmem:[#allocation3 + $0x172] sm:$0xff]  ;;  %v3384_v53 = vmax.f32 %v6910_v43, %v6977_v55  ;;  %v3385_v27 = vmax.f32 %v6927_v33, %v3337_v3 }
 0x219   : > { %4431 = vst.msk [vmem:[%s5544_s15 + $0x10] sm:$0xff] %vm604_vm5, %v4399_v9  ;;  %v2685_v51 = vld [vmem:[#allocation3 + $0x171] sm:$0xff]  ;;  %v4150_v23 = vpop.f32.mrf.mxu0  ;;  %v2780_v49 = vmax.f32 %v2716_v28, %v2748_v50  ;;  %v6981_v7 = vld [vmem:[#allocation2 + $0x168] sm:$0xff]  ;;  %v3945_v58 = vmax.f32 %v3881_v56, %v3913_v21 }
 0x21a   : > { %v2812_v25 = vld [vmem:[#allocation3 + $0x16b] sm:$0xff]  ;;  %v3976_v42 = vld [vmem:[#allocation3 + $0xf4] sm:$0xff]  ;;  %v2717_v26 = vmax.f32 %v2653_v59, %v2685_v51  ;;  %v4270_v19 = vadd.f32 %v4238_v35, %v4150_v23  ;;  %3249 = vst.msk [vmem:[#allocation2 + $0x18a] sm:$0xff] %vm638_vm1, %v6968_v29  ;;  %v3669_v16 = vmax.f32 %v3573_v17, %v6981_v7  ;;  %v3481_v62 = vmax.f32 %v3385_v27, %v6885_v47 }
 0x21b   : > { %v4008_v22 = vmax.f32 %v3944_v8, %v3976_v42  ;;  %v2813_v5 = vld [vmem:[#allocation3 + $0x173] sm:$0xff]  ;;  %v2844_v46 = vmax.f32 %v2780_v49, %v2812_v25  ;;  %v877_v34 = vld [vmem:[%s5544_s15 + $0xc8] sm:$0xff]  ;;  %v3977_v8 = vld [vmem:[#allocation3 + $0xfc] sm:$0xff]  ;;  %941 = vst.msk [vmem:[%s5544_s15 + $0xc0] sm:$0xff] %vm604_vm5, %v908_v45 }
 0x21c   : > { %v2876_v40 = vld [vmem:[#allocation3 + $0x16c] sm:$0xff]  ;;  %v4336_v1 = vld [vmem:[%s5544_s15 + $0x18] sm:$0xff]  ;;  %v2781_v4 = vmax.f32 %v2717_v26, %v2749_v30  ;;  %4302 = vst.msk [vmem:[%s5544_s15 + $0x20] sm:$0xff] %vm604_vm5, %v4270_v19  ;;  %4707 = vmatmul.msk.f32.gmra.mxu3 %vm638_vm1, %v6936_v63  ;;  %v831_v12 = vpop.f32.mrf.mxu1  ;;  %v1966_v17 = vpop.f32.mrf.mxu2  ;;  %v3338_v38 = vld [vmem:[#allocation2 + $0x148] sm:$0xf]  ;;  %v4009_v35 = vmax.f32 %v3945_v58, %v3977_v8  ;;  %v3480_v30 = vmax.f32 %v3384_v53, %v6874_v39 }
 0x21d   : > { %v6985_v37 = vld [vmem:[#allocation2 + $0x170] sm:$0xff]  ;;  %v4368_v2 = vmul.f32 0.1, %v4336_v1  ;;  %4734 = vmatmul.msk.f32.gmra.mxu0 %vm638_vm1, %v4008_v22  ;;  %v6994_v61 = vmax.f32 %v2844_v46, %v2876_v40  ;;  %3717 = vst.msk [vmem:[#allocation3 + $0x108] sm:$0xff] %vm638_vm1, %v3669_v16  ;;  %v2029_v20 = vld [vmem:[%s5544_s15 + $0x78] sm:$0xff]  ;;  %v4239_v9 = vld [vmem:[%s5544_s15 + $0x28] sm:$0xff]  ;;  %v3061_v51 = vpop.f32.mrf.mxu3 }
 0x21e   : > { %v2877_v44 = vld [vmem:[#allocation3 + $0x174] sm:$0xff]  ;;  %v3670_v60 = vmax.f32 %v3574_v24, %v6985_v37  ;;  %v2845_v0 = vmax.f32 %v2781_v4, %v2813_v5  ;;  %v2061_v57 = vadd.f32 %v2029_v20, %v1963_v52  ;;  %v3391_v63 = vmax.f32 %v6885_v47, %v6985_v37  ;;  %v3290_v36 = vld [vmem:[#allocation2 + $0x130] sm:$0xf]  ;;  %v2030_v42 = vld [vmem:[%s5544_s15 + $0x80] sm:$0xff] }
 0x21f   : > { %v4400_v32 = vmax.f32 %v4336_v1, %v4368_v2  ;;  %3250 = vst.msk [vmem:[#allocation2 + $0x19a] sm:$0xff] %vm638_vm1, %v6994_v61  ;;  %v3623_v18 = vld [vmem:[#allocation2 + $0x178] sm:$0xf]  ;;  %v3134_v43 = vld [vmem:[%s5544_s15 + $0x50] sm:$0xff]  ;;  %v3484_v13 = vmax.f32 %v3388_v14, %v6985_v37  ;;  %v909_v24 = vadd.f32 %v877_v34, %v831_v12  ;;  %v3386_v26 = vmax.f32 %v3290_v36, %v3338_v38  ;;  %v3434_v40 = vld [vmem:[#allocation2 + $0x160] sm:$0xf] }
 0x220   : > { %3718 = vst.msk [vmem:[#allocation3 + $0x110] sm:$0xff] %vm638_vm1, %v3670_v60  ;;  %v7003_v11 = vmax.f32 %v2845_v0, %v2877_v44  ;;  %v3166_v59 = vadd.f32 %v3134_v43, %v3058_v15  ;;  %v3671_v28 = vmax.f32 %v3575_v6, %v3623_v18  ;;  %v2062_v56 = vadd.f32 %v2030_v42, %v1966_v17  ;;  %v3135_v5 = vld [vmem:[%s5544_s15 + $0x58] sm:$0xff]  ;;  %v7044_v46 = vld [vmem:[#allocation2 + $0x180] sm:$0xff]  ;;  %v4240_v0 = vld [vmem:[%s5544_s15 + $0x30] sm:$0xff] }
 0x221   : > { %4432 = vst.msk [vmem:[%s5544_s15 + $0x18] sm:$0xff] %vm604_vm5, %v4400_v32  ;;  %v4153_v10 = vpop.f32.mrf.mxu0  ;;  %v7020_v33 = vld [vmem:[#allocation2 + $0x188] sm:$0xff]  ;;  %v3167_v47 = vadd.f32 %v3135_v5, %v3061_v51  ;;  %v3576_v1 = vmax.f32 %v3480_v30, %v6981_v7  ;;  %v7050_v60 = vmax.f32 %v3386_v26, %v3434_v40  ;;  %v3530_v18 = vld [vmem:[#allocation2 + $0x178] sm:$0xf]  ;;  %v3341_v51 = vld [vmem:[#allocation2 + $0x160] sm:$0xf] }
 0x222   : > { %3251 = vst.msk [vmem:[#allocation2 + $0x1a2] sm:$0xff] %vm638_vm1, %v7003_v11  ;;  %v4271_v50 = vadd.f32 %v4239_v9, %v4153_v10  ;;  %v3394_v49 = vmax.f32 %v6985_v37, %v7020_v33  ;;  %v3487_v54 = vmax.f32 %v3391_v63, %v7020_v33  ;;  %v3580_v19 = vmax.f32 %v3484_v13, %v7020_v33  ;;  %v4790_v12 = vld [vmem:[#allocation2 + $0x1b8] sm:$0xff]  ;;  %v878_v10 = vld [vmem:[%s5544_s15 + $0xd0] sm:$0xff] }
 0x223   : > { %v4337_v25 = vld [vmem:[%s5544_s15 + $0x20] sm:$0xff]  ;;  %2093 = vst.msk [vmem:[%s5544_s15 + $0x78] sm:$0xff] %vm604_vm5, %v2061_v57  ;;  %v3672_v6 = vmax.f32 %v3576_v1, %v7044_v46  ;;  %v4791_v63 = vld [vmem:[#allocation2 + $0x1d0] sm:$0xff] }
 0x224   : > { %v4369_v52 = vmul.f32 0.1, %v4337_v25  ;;  %4303 = vst.msk [vmem:[%s5544_s15 + $0x28] sm:$0xff] %vm604_vm5, %v4271_v50  ;;  %v3754_v23 = vld [vmem:[#allocation3 + $0x108] sm:$0xff]  ;;  %4708 = vmatmul.msk.f32.gmra.mxu3 %vm638_vm1, %v6945_v41  ;;  %v834_v2 = vpop.f32.mrf.mxu1  ;;  %v1969_v44 = vpop.f32.mrf.mxu2  ;;  %v3577_v41 = vmax.f32 %v3481_v62, %v6985_v37  ;;  %v3387_v37 = vmax.f32 %v6977_v55, %v6874_v39  ;;  %v3578_v50 = vmax.f32 %v7050_v60, %v3530_v18  ;;  %v3294_v36 = vld [vmem:[#allocation2 + $0x150] sm:$0xff]  ;;  %v879_v62 = vld [vmem:[%s5544_s15 + $0xd8] sm:$0xff] }
 0x225   : > { %4735 = vmatmul.msk.f32.gmra.mxu0 %vm638_vm1, %v4009_v35  ;;  %3198 = vst.msk [vmem:[%s5544_s15 + $0x50] sm:$0xff] %vm604_vm5, %v3166_v59  ;;  %v910_v39 = vadd.f32 %v878_v10, %v834_v2  ;;  %v2031_v55 = vld [vmem:[%s5544_s15 + $0x88] sm:$0xff]  ;;  %v3390_v1 = vmax.f32 %v3294_v36, %v6981_v7  ;;  %v3344_v60 = vld [vmem:[#allocation2 + $0x178] sm:$0xf] }
 0x226   : > { %v4401_v16 = vmax.f32 %v4337_v25, %v4369_v52  ;;  %3719 = vst.msk [vmem:[#allocation3 + $0x118] sm:$0xf] %vm951_vm4, %v3671_v28  ;;  %v3064_v57 = vpop.f32.mrf.mxu3  ;;  %v3673_v38 = vmax.f32 %v3577_v41, %v7020_v33  ;;  %v2063_v25 = vadd.f32 %v2031_v55, %v1969_v44  ;;  %v3626_v33 = vld [vmem:[#allocation2 + $0x190] sm:$0xf] }
 0x227   : > { %v3786_v22 = vld [vmem:[#allocation3 + $0x109] sm:$0xff]  ;;  %942 = vst.msk [vmem:[%s5544_s15 + $0xc8] sm:$0xff] %vm604_vm5, %v909_v24  ;;  %v3483_v24 = vmax.f32 %v3387_v37, %v6981_v7 }
 0x228   : > { %v3818_v15 = vmax.f32 %v3754_v23, %v3786_v22  ;;  %v3850_v4 = vld [vmem:[#allocation3 + $0x10a] sm:$0xff]  ;;  %4433 = vst.msk [vmem:[%s5544_s15 + $0x20] sm:$0xff] %vm604_vm5, %v4401_v16  ;;  %v3136_v23 = vld [vmem:[%s5544_s15 + $0x60] sm:$0xff]  ;;  %v3674_v16 = vmax.f32 %v3578_v50, %v3626_v33 }
 0x229   : > { %v3442_v48 = vld [vmem:[#allocation2 + $0x1a0] sm:$0xff]  ;;  %v4156_v21 = vpop.f32.mrf.mxu0  ;;  %v3914_v32 = vld [vmem:[#allocation3 + $0x10b] sm:$0xff]  ;;  %2094 = vst.msk [vmem:[%s5544_s15 + $0x80] sm:$0xff] %vm604_vm5, %v2062_v56  ;;  %v3579_v44 = vmax.f32 %v3483_v24, %v7044_v46 }
 0x22a   : > { %v3882_v31 = vmax.f32 %v3818_v15, %v3850_v4  ;;  %v3490_v14 = vmax.f32 %v3394_v49, %v3442_v48  ;;  %v3583_v3 = vmax.f32 %v3487_v54, %v3442_v48  ;;  %v3676_v53 = vmax.f32 %v3580_v19, %v3442_v48  ;;  %v3978_v20 = vld [vmem:[#allocation3 + $0x10c] sm:$0xff]  ;;  %3199 = vst.msk [vmem:[%s5544_s15 + $0x58] sm:$0xff] %vm604_vm5, %v3167_v47  ;;  %v3293_v49 = vld [vmem:[#allocation2 + $0x148] sm:$0xf]  ;;  %v4241_v19 = vld [vmem:[%s5544_s15 + $0x38] sm:$0xff] }
 0x22b   : > { %v4272_v58 = vadd.f32 %v4240_v0, %v4156_v21  ;;  %v4338_v43 = vld [vmem:[%s5544_s15 + $0x28] sm:$0xff]  ;;  %v3755_v27 = vld [vmem:[#allocation3 + $0x110] sm:$0xff]  ;;  %3720 = vst.msk [vmem:[#allocation3 + $0x120] sm:$0xff] %vm638_vm1, %v3672_v6  ;;  %v3389_v56 = vmax.f32 %v3293_v49, %v3341_v51  ;;  %v3437_v47 = vld [vmem:[#allocation2 + $0x178] sm:$0xf] }
 0x22c   : > { %v3946_v45 = vmax.f32 %v3882_v31, %v3914_v32  ;;  %v3586_v34 = vmax.f32 %v3490_v14, %v4790_v12  ;;  %v3679_v17 = vmax.f32 %v3583_v3, %v4790_v12  ;;  %3724 = vst.msk [vmem:[#allocation3 + $0x140] sm:$0xff] %vm638_vm1, %v3676_v53  ;;  %v4370_v9 = vmul.f32 0.1, %v4338_v43  ;;  %4709 = vmatmul.msk.f32.gmra.mxu3 %vm638_vm1, %v6968_v29  ;;  %v837_v42 = vpop.f32.mrf.mxu1  ;;  %v1972_v26 = vpop.f32.mrf.mxu2  ;;  %v3296_v4 = vld [vmem:[#allocation2 + $0x160] sm:$0xf]  ;;  %v2032_v14 = vld [vmem:[%s5544_s15 + $0x90] sm:$0xff] }
 0x22d   : > { %4304 = vst.msk [vmem:[%s5544_s15 + $0x30] sm:$0xff] %vm604_vm5, %v4272_v58  ;;  %v3787_v59 = vld [vmem:[#allocation3 + $0x111] sm:$0xff]  ;;  %v3168_v29 = vadd.f32 %v3136_v23, %v3064_v57  ;;  %v911_v2 = vadd.f32 %v879_v62, %v837_v42  ;;  %v2064_v53 = vadd.f32 %v2032_v14, %v1972_v26  ;;  %v3137_v32 = vld [vmem:[%s5544_s15 + $0x68] sm:$0xff]  ;;  %v3485_v41 = vmax.f32 %v3389_v56, %v3437_v47 }
 0x22e   : > { %v4010_v8 = vmax.f32 %v3946_v45, %v3978_v20  ;;  %v3682_v13 = vmax.f32 %v3586_v34, %v4791_v63  ;;  %3727 = vst.msk [vmem:[#allocation3 + $0x158] sm:$0xff] %vm638_vm1, %v3679_v17  ;;  %v4402_v35 = vmax.f32 %v4338_v43, %v4370_v9  ;;  %v3819_v28 = vmax.f32 %v3755_v27, %v3787_v59  ;;  %v3851_v30 = vld [vmem:[#allocation3 + $0x112] sm:$0xff]  ;;  %v3067_v15 = vpop.f32.mrf.mxu3  ;;  %v3629_v59 = vld [vmem:[#allocation2 + $0x1a8] sm:$0xf] }
 0x22f   : > { %v3915_v22 = vld [vmem:[#allocation3 + $0x113] sm:$0xff]  ;;  %3721 = vst.msk [vmem:[#allocation3 + $0x128] sm:$0xff] %vm638_vm1, %v3673_v38  ;;  %v3169_v20 = vadd.f32 %v3137_v32, %v3067_v15  ;;  %v3486_v57 = vmax.f32 %v3390_v1, %v7044_v46  ;;  %v3392_v43 = vmax.f32 %v3296_v4, %v3344_v60  ;;  %v3393_v38 = vmax.f32 %v6981_v7, %v7044_v46  ;;  %v3443_v23 = vld [vmem:[#allocation2 + $0x1a8] sm:$0xf] }
 0x230   : > { %4736 = vmatmul.msk.f32.gmra.mxu0 %vm638_vm1, %v4010_v8  ;;  %3730 = vst.msk [vmem:[#allocation3 + $0x170] sm:$0xff] %vm638_vm1, %v3682_v13  ;;  %v3883_v52 = vmax.f32 %v3819_v28, %v3851_v30  ;;  %v3979_v31 = vld [vmem:[#allocation3 + $0x114] sm:$0xff]  ;;  %v3533_v6 = vld [vmem:[#allocation2 + $0x190] sm:$0xf]  ;;  %v4242_v8 = vld [vmem:[%s5544_s15 + $0x40] sm:$0xff] }
 0x231   : > { %4434 = vst.msk [vmem:[%s5544_s15 + $0x28] sm:$0xff] %vm604_vm5, %v4402_v35  ;;  %v4159_v54 = vpop.f32.mrf.mxu0  ;;  %v7092_v3 = vld [vmem:[#allocation2 + $0x198] sm:$0xff]  ;;  %v3347_v34 = vld [vmem:[#allocation2 + $0x190] sm:$0xf]  ;;  %v880_v13 = vld [vmem:[%s5544_s15 + $0xe0] sm:$0xff] }
 0x232   : > { %v4273_v5 = vadd.f32 %v4241_v19, %v4159_v54  ;;  %v3947_v40 = vmax.f32 %v3883_v52, %v3915_v22  ;;  %943 = vst.msk [vmem:[%s5544_s15 + $0xd0] sm:$0xff] %vm604_vm5, %v910_v39  ;;  %v3756_v45 = vld [vmem:[#allocation3 + $0x120] sm:$0xff]  ;;  %v3675_v18 = vmax.f32 %v3579_v44, %v7092_v3  ;;  %v3299_v12 = vld [vmem:[#allocation2 + $0x178] sm:$0xf]  ;;  %v3440_v37 = vld [vmem:[#allocation2 + $0x190] sm:$0xf]  ;;  %v3582_v30 = vmax.f32 %v3486_v57, %v7092_v3 }
 0x233   : > { %2095 = vst.msk [vmem:[%s5544_s15 + $0x88] sm:$0xff] %vm604_vm5, %v2063_v25  ;;  %v2033_v39 = vld [vmem:[%s5544_s15 + $0x98] sm:$0xff]  ;;  %v3138_v51 = vld [vmem:[%s5544_s15 + $0x70] sm:$0xff]  ;;  %v3395_v25 = vmax.f32 %v3299_v12, %v3347_v34  ;;  %v3488_v46 = vmax.f32 %v3392_v43, %v3440_v37  ;;  %v3536_v26 = vld [vmem:[#allocation2 + $0x1a8] sm:$0xf]  ;;  %v3489_v22 = vmax.f32 %v3393_v38, %v7092_v3 }
 0x234   : > { %v4339_v48 = vld [vmem:[%s5544_s15 + $0x30] sm:$0xff]  ;;  %4305 = vst.msk [vmem:[%s5544_s15 + $0x38] sm:$0xff] %vm604_vm5, %v4273_v5  ;;  %v4011_v0 = vmax.f32 %v3947_v40, %v3979_v31  ;;  %4710 = vmatmul.msk.f32.gmra.mxu3 %vm638_vm1, %v6994_v61  ;;  %v840_v27 = vpop.f32.mrf.mxu1  ;;  %v1975_v10 = vpop.f32.mrf.mxu2  ;;  %v3581_v61 = vmax.f32 %v3485_v41, %v3533_v6  ;;  %v881_v44 = vld [vmem:[%s5544_s15 + $0xe8] sm:$0xff]  ;;  %v3139_v57 = vld [vmem:[%s5544_s15 + $0x78] sm:$0xff] }
 0x235   : > { %v4371_v21 = vmul.f32 0.1, %v4339_v48  ;;  %3200 = vst.msk [vmem:[%s5544_s15 + $0x60] sm:$0xff] %vm604_vm5, %v3168_v29  ;;  %v912_v28 = vadd.f32 %v880_v13, %v840_v27  ;;  %v2065_v52 = vadd.f32 %v2033_v39, %v1975_v10  ;;  %v4792_v40 = vld [vmem:[#allocation2 + $0x1b0] sm:$0xff]  ;;  %v3491_v15 = vmax.f32 %v3395_v25, %v3443_v23  ;;  %v4243_v3 = vld [vmem:[%s5544_s15 + $0x48] sm:$0xff] }
 0x236   : > { %3722 = vst.msk [vmem:[#allocation3 + $0x130] sm:$0xf] %vm951_vm4, %v3674_v16  ;;  %v3788_v17 = vld [vmem:[#allocation3 + $0x121] sm:$0xff]  ;;  %v3070_v55 = vpop.f32.mrf.mxu3  ;;  %v3677_v19 = vmax.f32 %v3581_v61, %v3629_v59  ;;  %v3678_v16 = vmax.f32 %v3582_v30, %v4792_v40  ;;  %v3584_v4 = vmax.f32 %v3488_v46, %v3536_v26  ;;  %v3585_v41 = vmax.f32 %v3489_v22, %v4792_v40  ;;  %v3635_v10 = vld [vmem:[#allocation2 + $0x1d8] sm:$0xf]  ;;  %v4244_v30 = vld [vmem:[%s5544_s15 + $0x50] sm:$0xff] }
 0x237   : > { %v4403_v58 = vmax.f32 %v4339_v48, %v4371_v21  ;;  %944 = vst.msk [vmem:[%s5544_s15 + $0xd8] sm:$0xff] %vm604_vm5, %v911_v2  ;;  %v3820_v63 = vmax.f32 %v3756_v45, %v3788_v17  ;;  %v3852_v35 = vld [vmem:[#allocation3 + $0x122] sm:$0xff]  ;;  %v3170_v7 = vadd.f32 %v3138_v51, %v3070_v55  ;;  %v882_v46 = vld [vmem:[%s5544_s15 + $0xf0] sm:$0xff] }
 0x238   : > { %4737 = vmatmul.msk.f32.gmra.mxu0 %vm638_vm1, %v4011_v0  ;;  %2096 = vst.msk [vmem:[%s5544_s15 + $0x90] sm:$0xff] %vm604_vm5, %v2064_v53  ;;  %v3757_v36 = vld [vmem:[#allocation3 + $0x128] sm:$0xff]  ;;  %v3539_v48 = vld [vmem:[#allocation2 + $0x1c0] sm:$0xf] }
 0x239   : > { %4435 = vst.msk [vmem:[%s5544_s15 + $0x30] sm:$0xff] %vm604_vm5, %v4403_v58  ;;  %v4162_v9 = vpop.f32.mrf.mxu0  ;;  %v3884_v24 = vmax.f32 %v3820_v63, %v3852_v35  ;;  %v3916_v62 = vld [vmem:[#allocation3 + $0x123] sm:$0xff] }
 0x23a   : > { %v4274_v50 = vadd.f32 %v4242_v8, %v4162_v9  ;;  %3201 = vst.msk [vmem:[%s5544_s15 + $0x68] sm:$0xff] %vm604_vm5, %v3169_v20  ;;  %v3980_v56 = vld [vmem:[#allocation3 + $0x124] sm:$0xff]  ;;  %v3632_v0 = vld [vmem:[#allocation2 + $0x1c0] sm:$0xf] }
 0x23b   : > { %v4340_v33 = vld [vmem:[%s5544_s15 + $0x38] sm:$0xff]  ;;  %3723 = vst.msk [vmem:[#allocation3 + $0x138] sm:$0xff] %vm638_vm1, %v3675_v18  ;;  %v3948_v49 = vmax.f32 %v3884_v24, %v3916_v62  ;;  %v2034_v21 = vld [vmem:[%s5544_s15 + $0xa0] sm:$0xff]  ;;  %v3587_v18 = vmax.f32 %v3491_v15, %v3539_v48  ;;  %v3680_v27 = vmax.f32 %v3584_v4, %v3632_v0  ;;  %v4793_v9 = vld [vmem:[#allocation2 + $0x1c8] sm:$0xff] }
 0x23c   : > { %v4372_v42 = vmul.f32 0.1, %v4340_v33  ;;  %4306 = vst.msk [vmem:[%s5544_s15 + $0x40] sm:$0xff] %vm604_vm5, %v4274_v50  ;;  %4711 = vmatmul.msk.f32.gmra.mxu3 %vm638_vm1, %v7003_v11  ;;  %v843_v2 = vpop.f32.mrf.mxu1  ;;  %v1978_v60 = vpop.f32.mrf.mxu2  ;;  %v3681_v8 = vmax.f32 %v3585_v41, %v4793_v9  ;;  %v3759_v35 = vld [vmem:[#allocation3 + $0x140] sm:$0xff]  ;;  %v2035_v23 = vld [vmem:[%s5544_s15 + $0xa8] sm:$0xff]  ;;  %v2036_v4 = vld [vmem:[%s5544_s15 + $0xb0] sm:$0xff] }
 0x23d   : > { %v3789_v54 = vld [vmem:[#allocation3 + $0x129] sm:$0xff]  ;;  %945 = vst.msk [vmem:[%s5544_s15 + $0xe0] sm:$0xff] %vm604_vm5, %v912_v28  ;;  %v4012_v47 = vmax.f32 %v3948_v49, %v3980_v56  ;;  %v913_v11 = vadd.f32 %v881_v44, %v843_v2  ;;  %v2066_v32 = vadd.f32 %v2034_v21, %v1978_v60  ;;  %v3683_v59 = vmax.f32 %v3587_v18, %v3635_v10  ;;  %v3140_v49 = vld [vmem:[%s5544_s15 + $0x80] sm:$0xff]  ;;  %v3761_v18 = vld [vmem:[#allocation3 + $0x158] sm:$0xff] }
 0x23e   : > { %v4404_v29 = vmax.f32 %v4340_v33, %v4372_v42  ;;  %v3821_v5 = vmax.f32 %v3757_v36, %v3789_v54  ;;  %2097 = vst.msk [vmem:[%s5544_s15 + $0x98] sm:$0xff] %vm604_vm5, %v2065_v52  ;;  %v3853_v1 = vld [vmem:[#allocation3 + $0x12a] sm:$0xff]  ;;  %v3073_v6 = vpop.f32.mrf.mxu3  ;;  %v4246_v10 = vld [vmem:[%s5544_s15 + $0x60] sm:$0xff] }
 0x23f   : > { %3202 = vst.msk [vmem:[%s5544_s15 + $0x70] sm:$0xff] %vm604_vm5, %v3170_v7  ;;  %v3917_v53 = vld [vmem:[#allocation3 + $0x12b] sm:$0xff]  ;;  %v3171_v17 = vadd.f32 %v3139_v57, %v3073_v6 }
 0x240   : > { %4436 = vst.msk [vmem:[%s5544_s15 + $0x38] sm:$0xff] %vm604_vm5, %v4404_v29  ;;  %v3885_v31 = vmax.f32 %v3821_v5, %v3853_v1  ;;  %4738 = vmatmul.msk.f32.gmra.mxu0 %vm638_vm1, %v4012_v47  ;;  %v3981_v13 = vld [vmem:[#allocation3 + $0x12c] sm:$0xff]  ;;  %v883_v47 = vld [vmem:[%s5544_s15 + $0xf8] sm:$0xff] }
 0x241   : > { %v4165_v14 = vpop.f32.mrf.mxu0  ;;  %3725 = vst.msk [vmem:[#allocation3 + $0x148] sm:$0xf] %vm951_vm4, %v3677_v19 }
 0x242   : > { %v4275_v58 = vadd.f32 %v4243_v3, %v4165_v14  ;;  %v3758_v45 = vld [vmem:[#allocation3 + $0x138] sm:$0xff]  ;;  %3726 = vst.msk [vmem:[#allocation3 + $0x150] sm:$0xff] %vm638_vm1, %v3678_v16  ;;  %v3949_v12 = vmax.f32 %v3885_v31, %v3917_v53  ;;  %v3141_v14 = vld [vmem:[%s5544_s15 + $0x88] sm:$0xff] }
 0x243   : > { %v3790_v20 = vld [vmem:[#allocation3 + $0x139] sm:$0xff]  ;;  %946 = vst.msk [vmem:[%s5544_s15 + $0xe8] sm:$0xff] %vm604_vm5, %v913_v11 }
 0x244   : > { %v4341_v43 = vld [vmem:[%s5544_s15 + $0x40] sm:$0xff]  ;;  %v3822_v34 = vmax.f32 %v3758_v45, %v3790_v20  ;;  %4307 = vst.msk [vmem:[%s5544_s15 + $0x48] sm:$0xff] %vm604_vm5, %v4275_v58  ;;  %v4013_v38 = vmax.f32 %v3949_v12, %v3981_v13  ;;  %v846_v39 = vpop.f32.mrf.mxu1  ;;  %v1981_v55 = vpop.f32.mrf.mxu2  ;;  %v4245_v31 = vld [vmem:[%s5544_s15 + $0x58] sm:$0xff] }
 0x245   : > { %v4373_v37 = vmul.f32 0.1, %v4341_v43  ;;  %2098 = vst.msk [vmem:[%s5544_s15 + $0xa0] sm:$0xff] %vm604_vm5, %v2066_v32  ;;  %v3854_v61 = vld [vmem:[#allocation3 + $0x13a] sm:$0xff]  ;;  %v914_v62 = vadd.f32 %v882_v46, %v846_v39  ;;  %v2067_v26 = vadd.f32 %v2035_v23, %v1981_v55 }
 0x246   : > { %3203 = vst.msk [vmem:[%s5544_s15 + $0x78] sm:$0xff] %vm604_vm5, %v3171_v17  ;;  %v3886_v50 = vmax.f32 %v3822_v34, %v3854_v61  ;;  %v3918_v33 = vld [vmem:[#allocation3 + $0x13b] sm:$0xff] }
 0x247   : > { %v4405_v63 = vmax.f32 %v4341_v43, %v4373_v37  ;;  %3728 = vst.msk [vmem:[#allocation3 + $0x160] sm:$0xf] %vm951_vm4, %v3680_v27  ;;  %v3076_v24 = vpop.f32.mrf.mxu3  ;;  %v3982_v22 = vld [vmem:[#allocation3 + $0x13c] sm:$0xff] }
 0x248   : > { %v3791_v28 = vld [vmem:[#allocation3 + $0x141] sm:$0xff]  ;;  %4739 = vmatmul.msk.f32.gmra.mxu0 %vm638_vm1, %v4013_v38  ;;  %3729 = vst.msk [vmem:[#allocation3 + $0x168] sm:$0xff] %vm638_vm1, %v3681_v8  ;;  %v3950_v52 = vmax.f32 %v3886_v50, %v3918_v33  ;;  %v3172_v54 = vadd.f32 %v3140_v49, %v3076_v24  ;;  %v2037_v17 = vld [vmem:[%s5544_s15 + $0xb8] sm:$0xff] }
 0x249   : > { %4437 = vst.msk [vmem:[%s5544_s15 + $0x40] sm:$0xff] %vm604_vm5, %v4405_v63  ;;  %v4168_v51 = vpop.f32.mrf.mxu0  ;;  %v3823_v7 = vmax.f32 %v3759_v35, %v3791_v28  ;;  %v3855_v29 = vld [vmem:[#allocation3 + $0x142] sm:$0xff]  ;;  %v3760_v40 = vld [vmem:[#allocation3 + $0x150] sm:$0xff] }
 0x24a   : > { %v4276_v25 = vadd.f32 %v4244_v30, %v4168_v51  ;;  %3731 = vst.msk [vmem:[#allocation3 + $0x178] sm:$0xf] %vm951_vm4, %v3683_v59  ;;  %v4014_v56 = vmax.f32 %v3950_v52, %v3982_v22  ;;  %v3792_v16 = vld [vmem:[#allocation3 + $0x151] sm:$0xff]  ;;  %v3919_v21 = vld [vmem:[#allocation3 + $0x143] sm:$0xff] }
 0x24b   : > { %v4342_v36 = vld [vmem:[%s5544_s15 + $0x48] sm:$0xff]  ;;  %947 = vst.msk [vmem:[%s5544_s15 + $0xf0] sm:$0xff] %vm604_vm5, %v914_v62  ;;  %v3887_v5 = vmax.f32 %v3823_v7, %v3855_v29  ;;  %v3824_v11 = vmax.f32 %v3760_v40, %v3792_v16  ;;  %v3856_v58 = vld [vmem:[#allocation3 + $0x152] sm:$0xff] }
 0x24c   : > { %v4374_v42 = vmul.f32 0.1, %v4342_v36  ;;  %4308 = vst.msk [vmem:[%s5544_s15 + $0x50] sm:$0xff] %vm604_vm5, %v4276_v25  ;;  %v849_v15 = vpop.f32.mrf.mxu1  ;;  %v1984_v1 = vpop.f32.mrf.mxu2  ;;  %v3983_v20 = vld [vmem:[#allocation3 + $0x144] sm:$0xff]  ;;  %v3920_v43 = vld [vmem:[#allocation3 + $0x153] sm:$0xff] }
 0x24d   : > { %2099 = vst.msk [vmem:[%s5544_s15 + $0xa8] sm:$0xff] %vm604_vm5, %v2067_v26  ;;  %v915_v2 = vadd.f32 %v883_v47, %v849_v15  ;;  %v2068_v44 = vadd.f32 %v2036_v4, %v1984_v1  ;;  %v3951_v53 = vmax.f32 %v3887_v5, %v3919_v21  ;;  %v3888_v57 = vmax.f32 %v3824_v11, %v3856_v58  ;;  %v3142_v63 = vld [vmem:[%s5544_s15 + $0x90] sm:$0xff]  ;;  %v4247_v7 = vld [vmem:[%s5544_s15 + $0x68] sm:$0xff]  ;;  %v3143_v62 = vld [vmem:[%s5544_s15 + $0x98] sm:$0xff] }
 0x24e   : > { %v4406_v19 = vmax.f32 %v4342_v36, %v4374_v42  ;;  %3204 = vst.msk [vmem:[%s5544_s15 + $0x80] sm:$0xff] %vm604_vm5, %v3172_v54  ;;  %v3793_v12 = vld [vmem:[#allocation3 + $0x159] sm:$0xff]  ;;  %v3763_v15 = vld [vmem:[#allocation3 + $0x170] sm:$0xff] }
 0x24f   : > { %v3079_v0 = vpop.f32.mrf.mxu3  ;;  %948 = vst.msk [vmem:[%s5544_s15 + $0xf8] sm:$0xff] %vm604_vm5, %v915_v2  ;;  %v4015_v6 = vmax.f32 %v3951_v53, %v3983_v20  ;;  %v3952_v61 = vmax.f32 %v3888_v57, %v3920_v43  ;;  %v3825_v59 = vmax.f32 %v3761_v18, %v3793_v12  ;;  %v3984_v35 = vld [vmem:[#allocation3 + $0x154] sm:$0xff]  ;;  %v3762_v25 = vld [vmem:[#allocation3 + $0x168] sm:$0xff]  ;;  %v2038_v36 = vld [vmem:[%s5544_s15 + $0xc0] sm:$0xff] }
 0x250   : > { %4438 = vst.msk [vmem:[%s5544_s15 + $0x48] sm:$0xff] %vm604_vm5, %v4406_v19  ;;  %4740 = vmatmul.msk.f32.gmra.mxu0 %vm638_vm1, %v4014_v56  ;;  %v3173_v32 = vadd.f32 %v3141_v14, %v3079_v0  ;;  %v3857_v28 = vld [vmem:[#allocation3 + $0x15a] sm:$0xff]  ;;  %v3794_v33 = vld [vmem:[#allocation3 + $0x169] sm:$0xff] }
 0x251   : > { %v4171_v48 = vpop.f32.mrf.mxu0  ;;  %2100 = vst.msk [vmem:[%s5544_s15 + $0xb0] sm:$0xff] %vm604_vm5, %v2068_v44  ;;  %v4016_v55 = vmax.f32 %v3952_v61, %v3984_v35  ;;  %v3889_v51 = vmax.f32 %v3825_v59, %v3857_v28  ;;  %v3921_v30 = vld [vmem:[#allocation3 + $0x15b] sm:$0xff]  ;;  %v3826_v54 = vmax.f32 %v3762_v25, %v3794_v33  ;;  %v3858_v56 = vld [vmem:[#allocation3 + $0x16a] sm:$0xff]  ;;  %v3859_v58 = vld [vmem:[#allocation3 + $0x172] sm:$0xff] }
 0x252   : > { %v4277_v60 = vadd.f32 %v4245_v31, %v4171_v48  ;;  %3205 = vst.msk [vmem:[%s5544_s15 + $0x88] sm:$0xff] %vm604_vm5, %v3173_v32  ;;  %v3985_v29 = vld [vmem:[#allocation3 + $0x15c] sm:$0xff]  ;;  %v3922_v47 = vld [vmem:[#allocation3 + $0x16b] sm:$0xff]  ;;  %v3923_v57 = vld [vmem:[#allocation3 + $0x173] sm:$0xff] }
 0x253   : > { %v4343_v3 = vld [vmem:[%s5544_s15 + $0x50] sm:$0xff]  ;;  %v3953_v49 = vmax.f32 %v3889_v51, %v3921_v30  ;;  %v3890_v16 = vmax.f32 %v3826_v54, %v3858_v56  ;;  %v2039_v48 = vld [vmem:[%s5544_s15 + $0xc8] sm:$0xff]  ;;  %v3144_v0 = vld [vmem:[%s5544_s15 + $0xa0] sm:$0xff] }
 0x254   : > { %v4375_v41 = vmul.f32 0.1, %v4343_v3  ;;  %4309 = vst.msk [vmem:[%s5544_s15 + $0x58] sm:$0xff] %vm604_vm5, %v4277_v60  ;;  %v1987_v34 = vpop.f32.mrf.mxu2  ;;  %v3795_v1 = vld [vmem:[#allocation3 + $0x171] sm:$0xff] }
 0x255   : > { %v2069_v37 = vadd.f32 %v2037_v17, %v1987_v34  ;;  %v4017_v40 = vmax.f32 %v3953_v49, %v3985_v29  ;;  %v4248_v2 = vld [vmem:[%s5544_s15 + $0x70] sm:$0xff]  ;;  %v3827_v53 = vmax.f32 %v3763_v15, %v3795_v1  ;;  %v4249_v34 = vld [vmem:[%s5544_s15 + $0x78] sm:$0xff] }
 0x256   : > { %v4407_v45 = vmax.f32 %v4343_v3, %v4375_v41  ;;  %v3954_v3 = vmax.f32 %v3890_v16, %v3922_v47  ;;  %v3986_v41 = vld [vmem:[#allocation3 + $0x16c] sm:$0xff]  ;;  %v3987_v61 = vld [vmem:[#allocation3 + $0x174] sm:$0xff] }
 0x257   : > { %v3082_v8 = vpop.f32.mrf.mxu3  ;;  %2101 = vst.msk [vmem:[%s5544_s15 + $0xb8] sm:$0xff] %vm604_vm5, %v2069_v37  ;;  %v2040_v43 = vld [vmem:[%s5544_s15 + $0xd0] sm:$0xff]  ;;  %v3145_v37 = vld [vmem:[%s5544_s15 + $0xa8] sm:$0xff]  ;;  %v2041_v35 = vld [vmem:[%s5544_s15 + $0xd8] sm:$0xff] }
 0x258   : > { %4439 = vst.msk [vmem:[%s5544_s15 + $0x50] sm:$0xff] %vm604_vm5, %v4407_v45  ;;  %4741 = vmatmul.msk.f32.gmra.mxu0 %vm638_vm1, %v4015_v6  ;;  %v3174_v38 = vadd.f32 %v3142_v63, %v3082_v8  ;;  %v4018_v20 = vmax.f32 %v3954_v3, %v3986_v41  ;;  %v3891_v6 = vmax.f32 %v3827_v53, %v3859_v58  ;;  %v3146_v25 = vld [vmem:[%s5544_s15 + $0xb0] sm:$0xff] }
 0x259   : > { %v4174_v27 = vpop.f32.mrf.mxu0 }
 0x25a   : > { %v4278_v9 = vadd.f32 %v4246_v10, %v4174_v27  ;;  %3206 = vst.msk [vmem:[%s5544_s15 + $0x90] sm:$0xff] %vm604_vm5, %v3174_v38  ;;  %v3955_v8 = vmax.f32 %v3891_v6, %v3923_v57 }
 0x25b   : > { %v4344_v13 = vld [vmem:[%s5544_s15 + $0x58] sm:$0xff] }
 0x25c   : > { %v4376_v50 = vmul.f32 0.1, %v4344_v13  ;;  %4310 = vst.msk [vmem:[%s5544_s15 + $0x60] sm:$0xff] %vm604_vm5, %v4278_v9  ;;  %v1990_v24 = vpop.f32.mrf.mxu2  ;;  %v4019_v38 = vmax.f32 %v3955_v8, %v3987_v61 }
 0x25d   : > { %v2070_v46 = vadd.f32 %v2038_v36, %v1990_v24 }
 0x25e   : > { %v4408_v39 = vmax.f32 %v4344_v13, %v4376_v50  ;;  %v3147_v54 = vld [vmem:[%s5544_s15 + $0xb8] sm:$0xff] }
 0x25f   : > { %v3085_v42 = vpop.f32.mrf.mxu3  ;;  %2102 = vst.msk [vmem:[%s5544_s15 + $0xc0] sm:$0xff] %vm604_vm5, %v2070_v46  ;;  %v2042_v46 = vld [vmem:[%s5544_s15 + $0xe0] sm:$0xff] }
 0x260   : > { %4440 = vst.msk [vmem:[%s5544_s15 + $0x58] sm:$0xff] %vm604_vm5, %v4408_v39  ;;  %4742 = vmatmul.msk.f32.gmra.mxu0 %vm638_vm1, %v4016_v55  ;;  %v3175_v19 = vadd.f32 %v3143_v62, %v3085_v42  ;;  %v4250_v39 = vld [vmem:[%s5544_s15 + $0x80] sm:$0xff]  ;;  %v4251_v42 = vld [vmem:[%s5544_s15 + $0x88] sm:$0xff] }
 0x261   : > { %v4177_v52 = vpop.f32.mrf.mxu0  ;;  %v4252_v15 = vld [vmem:[%s5544_s15 + $0x90] sm:$0xff] }
 0x262   : > { %v4279_v23 = vadd.f32 %v4247_v7, %v4177_v52  ;;  %3207 = vst.msk [vmem:[%s5544_s15 + $0x98] sm:$0xff] %vm604_vm5, %v3175_v19 }
 0x263   : > { %v4345_v26 = vld [vmem:[%s5544_s15 + $0x60] sm:$0xff] }
 0x264   : > { %v4377_v22 = vmul.f32 0.1, %v4345_v26  ;;  %4311 = vst.msk [vmem:[%s5544_s15 + $0x68] sm:$0xff] %vm604_vm5, %v4279_v23  ;;  %v1993_v4 = vpop.f32.mrf.mxu2 }
 0x265   : > { %v2071_v44 = vadd.f32 %v2039_v48, %v1993_v4 }
 0x266   : > { %v4409_v5 = vmax.f32 %v4345_v26, %v4377_v22  ;;  %v3148_v48 = vld [vmem:[%s5544_s15 + $0xc0] sm:$0xff] }
 0x267   : > { %v3088_v21 = vpop.f32.mrf.mxu3  ;;  %2103 = vst.msk [vmem:[%s5544_s15 + $0xc8] sm:$0xff] %vm604_vm5, %v2071_v44 }
 0x268   : > { %4441 = vst.msk [vmem:[%s5544_s15 + $0x60] sm:$0xff] %vm604_vm5, %v4409_v5  ;;  %4743 = vmatmul.msk.f32.gmra.mxu0 %vm638_vm1, %v4017_v40  ;;  %v3176_v11 = vadd.f32 %v3144_v0, %v3088_v21  ;;  %v2043_v40 = vld [vmem:[%s5544_s15 + $0xe8] sm:$0xff]  ;;  %v2044_v0 = vld [vmem:[%s5544_s15 + $0xf0] sm:$0xff] }
 0x269   : > { %v4253_v3 = vld [vmem:[%s5544_s15 + $0x98] sm:$0xff] }
 0x26a   : > { %v4180_v31 = vpop.f32.mrf.mxu0  ;;  %3208 = vst.msk [vmem:[%s5544_s15 + $0xa0] sm:$0xff] %vm604_vm5, %v3176_v11 }
 0x26b   : > { %v4280_v60 = vadd.f32 %v4248_v2, %v4180_v31  ;;  %v4346_v14 = vld [vmem:[%s5544_s15 + $0x68] sm:$0xff] }
 0x26c   : > { %v4378_v32 = vmul.f32 0.1, %v4346_v14  ;;  %v1996_v18 = vpop.f32.mrf.mxu2 }
 0x26d   : > { %4312 = vst.msk [vmem:[%s5544_s15 + $0x70] sm:$0xff] %vm604_vm5, %v4280_v60  ;;  %v2072_v17 = vadd.f32 %v2040_v43, %v1996_v18 }
 0x26e   : > { %v4410_v45 = vmax.f32 %v4346_v14, %v4378_v32  ;;  %v3149_v41 = vld [vmem:[%s5544_s15 + $0xc8] sm:$0xff] }
 0x26f   : > { %v3091_v10 = vpop.f32.mrf.mxu3  ;;  %2104 = vst.msk [vmem:[%s5544_s15 + $0xd0] sm:$0xff] %vm604_vm5, %v2072_v17 }
 0x270   : > { %4442 = vst.msk [vmem:[%s5544_s15 + $0x68] sm:$0xff] %vm604_vm5, %v4410_v45  ;;  %4744 = vmatmul.msk.f32.gmra.mxu0 %vm638_vm1, %v4018_v20  ;;  %v3177_v63 = vadd.f32 %v3145_v37, %v3091_v10 }
 0x271   : > { %v4254_v18 = vld [vmem:[%s5544_s15 + $0xa0] sm:$0xff] }
 0x272   : > { %v4183_v12 = vpop.f32.mrf.mxu0  ;;  %3209 = vst.msk [vmem:[%s5544_s15 + $0xa8] sm:$0xff] %vm604_vm5, %v3177_v63 }
 0x273   : > { %v4281_v27 = vadd.f32 %v4249_v34, %v4183_v12  ;;  %v2045_v34 = vld [vmem:[%s5544_s15 + $0xf8] sm:$0xff] }
 0x274   : > { %v4347_v9 = vld [vmem:[%s5544_s15 + $0x70] sm:$0xff]  ;;  %v1999_v50 = vpop.f32.mrf.mxu2 }
 0x275   : > { %v4379_v13 = vmul.f32 0.1, %v4347_v9  ;;  %4313 = vst.msk [vmem:[%s5544_s15 + $0x78] sm:$0xff] %vm604_vm5, %v4281_v27  ;;  %v2073_v55 = vadd.f32 %v2041_v35, %v1999_v50 }
 0x276   : > { %v3150_v27 = vld [vmem:[%s5544_s15 + $0xd0] sm:$0xff] }
 0x277   : > { %v4411_v59 = vmax.f32 %v4347_v9, %v4379_v13  ;;  %v3094_v30 = vpop.f32.mrf.mxu3  ;;  %2105 = vst.msk [vmem:[%s5544_s15 + $0xd8] sm:$0xff] %vm604_vm5, %v2073_v55 }
 0x278   : > { %4745 = vmatmul.msk.f32.gmra.mxu0 %vm638_vm1, %v4019_v38  ;;  %v3178_v24 = vadd.f32 %v3146_v25, %v3094_v30 }
 0x279   : > { %4443 = vst.msk [vmem:[%s5544_s15 + $0x70] sm:$0xff] %vm604_vm5, %v4411_v59  ;;  %v4255_v61 = vld [vmem:[%s5544_s15 + $0xa8] sm:$0xff] }
 0x27a   : > { %v4186_v28 = vpop.f32.mrf.mxu0  ;;  %3210 = vst.msk [vmem:[%s5544_s15 + $0xb0] sm:$0xff] %vm604_vm5, %v3178_v24 }
 0x27b   : > { %v4282_v51 = vadd.f32 %v4250_v39, %v4186_v28 }
 0x27c   : > { %v4348_v33 = vld [vmem:[%s5544_s15 + $0x78] sm:$0xff]  ;;  %v2002_v7 = vpop.f32.mrf.mxu2 }
 0x27d   : > { %v4380_v36 = vmul.f32 0.1, %v4348_v33  ;;  %4314 = vst.msk [vmem:[%s5544_s15 + $0x80] sm:$0xff] %vm604_vm5, %v4282_v51  ;;  %v2074_v62 = vadd.f32 %v2042_v46, %v2002_v7 }
 0x27e   : > { %v3151_v50 = vld [vmem:[%s5544_s15 + $0xd8] sm:$0xff] }
 0x27f   : > { %v4412_v52 = vmax.f32 %v4348_v33, %v4380_v36  ;;  %v3097_v49 = vpop.f32.mrf.mxu3  ;;  %2106 = vst.msk [vmem:[%s5544_s15 + $0xe0] sm:$0xff] %vm604_vm5, %v2074_v62 }
 0x280   : > { %v3179_v22 = vadd.f32 %v3147_v54, %v3097_v49 }
 0x281   : > { %4444 = vst.msk [vmem:[%s5544_s15 + $0x78] sm:$0xff] %vm604_vm5, %v4412_v52  ;;  %v4256_v25 = vld [vmem:[%s5544_s15 + $0xb0] sm:$0xff] }
 0x282   : > { %v4189_v23 = vpop.f32.mrf.mxu0  ;;  %3211 = vst.msk [vmem:[%s5544_s15 + $0xb8] sm:$0xff] %vm604_vm5, %v3179_v22 }
 0x283   : > { %v4283_v26 = vadd.f32 %v4251_v42, %v4189_v23 }
 0x284   : > { %v4349_v19 = vld [vmem:[%s5544_s15 + $0x80] sm:$0xff]  ;;  %v2005_v5 = vpop.f32.mrf.mxu2 }
 0x285   : > { %v4381_v29 = vmul.f32 0.1, %v4349_v19  ;;  %4315 = vst.msk [vmem:[%s5544_s15 + $0x88] sm:$0xff] %vm604_vm5, %v4283_v26  ;;  %v2075_v47 = vadd.f32 %v2043_v40, %v2005_v5 }
 0x286   : > { %v3152_v52 = vld [vmem:[%s5544_s15 + $0xe0] sm:$0xff] }
 0x287   : > { %v4413_v56 = vmax.f32 %v4349_v19, %v4381_v29  ;;  %v3100_v4 = vpop.f32.mrf.mxu3  ;;  %2107 = vst.msk [vmem:[%s5544_s15 + $0xe8] sm:$0xff] %vm604_vm5, %v2075_v47 }
 0x288   : > { %v3180_v2 = vadd.f32 %v3148_v48, %v3100_v4 }
 0x289   : > { %4445 = vst.msk [vmem:[%s5544_s15 + $0x80] sm:$0xff] %vm604_vm5, %v4413_v56  ;;  %v4257_v42 = vld [vmem:[%s5544_s15 + $0xb8] sm:$0xff] }
 0x28a   : > { %v4192_v16 = vpop.f32.mrf.mxu0  ;;  %3212 = vst.msk [vmem:[%s5544_s15 + $0xc0] sm:$0xff] %vm604_vm5, %v3180_v2 }
 0x28b   : > { %v4284_v1 = vadd.f32 %v4252_v15, %v4192_v16 }
 0x28c   : > { %v4350_v31 = vld [vmem:[%s5544_s15 + $0x88] sm:$0xff]  ;;  %v2008_v21 = vpop.f32.mrf.mxu2 }
 0x28d   : > { %v4382_v44 = vmul.f32 0.1, %v4350_v31  ;;  %4316 = vst.msk [vmem:[%s5544_s15 + $0x90] sm:$0xff] %vm604_vm5, %v4284_v1  ;;  %v2076_v53 = vadd.f32 %v2044_v0, %v2008_v21 }
 0x28e   : > { %v3153_v54 = vld [vmem:[%s5544_s15 + $0xe8] sm:$0xff] }
 0x28f   : > { %v4414_v60 = vmax.f32 %v4350_v31, %v4382_v44  ;;  %v3103_v32 = vpop.f32.mrf.mxu3  ;;  %2108 = vst.msk [vmem:[%s5544_s15 + $0xf0] sm:$0xff] %vm604_vm5, %v2076_v53 }
 0x290   : > { %v3181_v45 = vadd.f32 %v3149_v41, %v3103_v32 }
 0x291   : > { %4446 = vst.msk [vmem:[%s5544_s15 + $0x88] sm:$0xff] %vm604_vm5, %v4414_v60  ;;  %v4258_v47 = vld [vmem:[%s5544_s15 + $0xc0] sm:$0xff] }
 0x292   : > { %v4195_v14 = vpop.f32.mrf.mxu0  ;;  %3213 = vst.msk [vmem:[%s5544_s15 + $0xc8] sm:$0xff] %vm604_vm5, %v3181_v45 }
 0x293   : > { %v4285_v11 = vadd.f32 %v4253_v3, %v4195_v14 }
 0x294   : > { %v4351_v58 = vld [vmem:[%s5544_s15 + $0x90] sm:$0xff]  ;;  %v2011_v12 = vpop.f32.mrf.mxu2 }
 0x295   : > { %v4383_v20 = vmul.f32 0.1, %v4351_v58  ;;  %4317 = vst.msk [vmem:[%s5544_s15 + $0x98] sm:$0xff] %vm604_vm5, %v4285_v11  ;;  %v2077_v37 = vadd.f32 %v2045_v34, %v2011_v12 }
 0x296   : > { %v3154_v40 = vld [vmem:[%s5544_s15 + $0xf0] sm:$0xff] }
 0x297   : > { %v4415_v6 = vmax.f32 %v4351_v58, %v4383_v20  ;;  %v3106_v17 = vpop.f32.mrf.mxu3  ;;  %2109 = vst.msk [vmem:[%s5544_s15 + $0xf8] sm:$0xff] %vm604_vm5, %v2077_v37 }
 0x298   : > { %v3182_v9 = vadd.f32 %v3150_v27, %v3106_v17 }
 0x299   : > { %4447 = vst.msk [vmem:[%s5544_s15 + $0x90] sm:$0xff] %vm604_vm5, %v4415_v6  ;;  %v4259_v60 = vld [vmem:[%s5544_s15 + $0xc8] sm:$0xff] }
 0x29a   : > { %v4198_v57 = vpop.f32.mrf.mxu0  ;;  %3214 = vst.msk [vmem:[%s5544_s15 + $0xd0] sm:$0xff] %vm604_vm5, %v3182_v9 }
 0x29b   : > { %v4286_v43 = vadd.f32 %v4254_v18, %v4198_v57 }
 0x29c   : > { %v4352_v10 = vld [vmem:[%s5544_s15 + $0x98] sm:$0xff] }
 0x29d   : > { %v4384_v8 = vmul.f32 0.1, %v4352_v10  ;;  %4318 = vst.msk [vmem:[%s5544_s15 + $0xa0] sm:$0xff] %vm604_vm5, %v4286_v43 }
 0x29e   : > { %v3155_v2 = vld [vmem:[%s5544_s15 + $0xf8] sm:$0xff] }
 0x29f   : > { %v4416_v63 = vmax.f32 %v4352_v10, %v4384_v8  ;;  %v3109_v38 = vpop.f32.mrf.mxu3 }
 0x2a0   : > { %v3183_v28 = vadd.f32 %v3151_v50, %v3109_v38 }
 0x2a1   : > { %4448 = vst.msk [vmem:[%s5544_s15 + $0x98] sm:$0xff] %vm604_vm5, %v4416_v63  ;;  %v4260_v32 = vld [vmem:[%s5544_s15 + $0xd0] sm:$0xff] }
 0x2a2   : > { %v4201_v13 = vpop.f32.mrf.mxu0  ;;  %3215 = vst.msk [vmem:[%s5544_s15 + $0xd8] sm:$0xff] %vm604_vm5, %v3183_v28 }
 0x2a3   : > { %v4287_v59 = vadd.f32 %v4255_v61, %v4201_v13 }
 0x2a4   : > { %v4353_v35 = vld [vmem:[%s5544_s15 + $0xa0] sm:$0xff] }
 0x2a5   : > { %v4385_v39 = vmul.f32 0.1, %v4353_v35  ;;  %4319 = vst.msk [vmem:[%s5544_s15 + $0xa8] sm:$0xff] %vm604_vm5, %v4287_v59 }
 0x2a7   : > { %v4417_v55 = vmax.f32 %v4353_v35, %v4385_v39  ;;  %v3112_v36 = vpop.f32.mrf.mxu3 }
 0x2a8   : > { %v3184_v46 = vadd.f32 %v3152_v52, %v3112_v36 }
 0x2a9   : > { %4449 = vst.msk [vmem:[%s5544_s15 + $0xa0] sm:$0xff] %vm604_vm5, %v4417_v55  ;;  %v4261_v57 = vld [vmem:[%s5544_s15 + $0xd8] sm:$0xff] }
 0x2aa   : > { %3216 = vst.msk [vmem:[%s5544_s15 + $0xe0] sm:$0xff] %vm604_vm5, %v3184_v46 }
 0x2ac   : > { %v4354_v51 = vld [vmem:[%s5544_s15 + $0xa8] sm:$0xff] }
 0x2ad   : > { %v4204_v30 = vpop.f32.mrf.mxu0  ;;  %v4386_v33 = vmul.f32 0.1, %v4354_v51 }
 0x2ae   : > { %v4288_v24 = vadd.f32 %v4256_v25, %v4204_v30 }
 0x2af   : > { %v4418_v7 = vmax.f32 %v4354_v51, %v4386_v33  ;;  %v3115_v49 = vpop.f32.mrf.mxu3 }
 0x2b0   : > { %4320 = vst.msk [vmem:[%s5544_s15 + $0xb0] sm:$0xff] %vm604_vm5, %v4288_v24  ;;  %v3185_v22 = vadd.f32 %v3153_v54, %v3115_v49 }
 0x2b1   : > { %4450 = vst.msk [vmem:[%s5544_s15 + $0xa8] sm:$0xff] %vm604_vm5, %v4418_v7  ;;  %v4262_v27 = vld [vmem:[%s5544_s15 + $0xe0] sm:$0xff] }
 0x2b2   : > { %3217 = vst.msk [vmem:[%s5544_s15 + $0xe8] sm:$0xff] %vm604_vm5, %v3185_v22 }
 0x2b5   : > { %v4207_v23 = vpop.f32.mrf.mxu0 }
 0x2b6   : > { %v4289_v62 = vadd.f32 %v4257_v42, %v4207_v23 }
 0x2b7   : > { %v4355_v26 = vld [vmem:[%s5544_s15 + $0xb0] sm:$0xff]  ;;  %v3118_v5 = vpop.f32.mrf.mxu3 }
 0x2b8   : > { %v4387_v19 = vmul.f32 0.1, %v4355_v26  ;;  %4321 = vst.msk [vmem:[%s5544_s15 + $0xb8] sm:$0xff] %vm604_vm5, %v4289_v62  ;;  %v3186_v1 = vadd.f32 %v3154_v40, %v3118_v5 }
 0x2b9   : > { %v4263_v13 = vld [vmem:[%s5544_s15 + $0xe8] sm:$0xff] }
 0x2ba   : > { %v4419_v29 = vmax.f32 %v4355_v26, %v4387_v19  ;;  %3218 = vst.msk [vmem:[%s5544_s15 + $0xf0] sm:$0xff] %vm604_vm5, %v3186_v1 }
 0x2bc   : > { %4451 = vst.msk [vmem:[%s5544_s15 + $0xb0] sm:$0xff] %vm604_vm5, %v4419_v29 }
 0x2bd   : > { %v4210_v15 = vpop.f32.mrf.mxu0 }
 0x2be   : > { %v4290_v4 = vadd.f32 %v4258_v47, %v4210_v15 }
 0x2bf   : > { %v4356_v56 = vld [vmem:[%s5544_s15 + $0xb8] sm:$0xff]  ;;  %v3121_v31 = vpop.f32.mrf.mxu3 }
 0x2c0   : > { %v4388_v16 = vmul.f32 0.1, %v4356_v56  ;;  %4322 = vst.msk [vmem:[%s5544_s15 + $0xc0] sm:$0xff] %vm604_vm5, %v4290_v4  ;;  %v3187_v21 = vadd.f32 %v3155_v2, %v3121_v31 }
 0x2c1   : > { %v4264_v28 = vld [vmem:[%s5544_s15 + $0xf0] sm:$0xff] }
 0x2c2   : > { %v4420_v48 = vmax.f32 %v4356_v56, %v4388_v16  ;;  %3219 = vst.msk [vmem:[%s5544_s15 + $0xf8] sm:$0xff] %vm604_vm5, %v3187_v21 }
 0x2c4   : > { %4452 = vst.msk [vmem:[%s5544_s15 + $0xb8] sm:$0xff] %vm604_vm5, %v4420_v48 }
 0x2c5   : > { %v4213_v44 = vpop.f32.mrf.mxu0 }
 0x2c6   : > { %v4291_v0 = vadd.f32 %v4259_v60, %v4213_v44 }
 0x2c7   : > { %v4357_v14 = vld [vmem:[%s5544_s15 + $0xc0] sm:$0xff] }
 0x2c8   : > { %v4389_v3 = vmul.f32 0.1, %v4357_v14  ;;  %4323 = vst.msk [vmem:[%s5544_s15 + $0xc8] sm:$0xff] %vm604_vm5, %v4291_v0 }
 0x2c9   : > { %v4265_v33 = vld [vmem:[%s5544_s15 + $0xf8] sm:$0xff] }
 0x2ca   : > { %v4421_v53 = vmax.f32 %v4357_v14, %v4389_v3 }
 0x2cc   : > { %4453 = vst.msk [vmem:[%s5544_s15 + $0xc0] sm:$0xff] %vm604_vm5, %v4421_v53 }
 0x2cd   : > { %v4216_v11 = vpop.f32.mrf.mxu0 }
 0x2ce   : > { %v4292_v41 = vadd.f32 %v4260_v32, %v4216_v11 }
 0x2cf   : > { %v4358_v58 = vld [vmem:[%s5544_s15 + $0xc8] sm:$0xff] }
 0x2d0   : > { %v4390_v45 = vmul.f32 0.1, %v4358_v58  ;;  %4324 = vst.msk [vmem:[%s5544_s15 + $0xd0] sm:$0xff] %vm604_vm5, %v4292_v41 }
 0x2d2   : > { %v4422_v20 = vmax.f32 %v4358_v58, %v4390_v45 }
 0x2d4   : > { %4454 = vst.msk [vmem:[%s5544_s15 + $0xc8] sm:$0xff] %vm604_vm5, %v4422_v20 }
 0x2d5   : > { %v4219_v6 = vpop.f32.mrf.mxu0 }
 0x2d6   : > { %v4293_v18 = vadd.f32 %v4261_v57, %v4219_v6 }
 0x2d7   : > { %v4359_v43 = vld [vmem:[%s5544_s15 + $0xd0] sm:$0xff] }
 0x2d8   : > { %v4391_v12 = vmul.f32 0.1, %v4359_v43  ;;  %4325 = vst.msk [vmem:[%s5544_s15 + $0xd8] sm:$0xff] %vm604_vm5, %v4293_v18 }
 0x2da   : > { %v4423_v34 = vmax.f32 %v4359_v43, %v4391_v12 }
 0x2dc   : > { %4455 = vst.msk [vmem:[%s5544_s15 + $0xd0] sm:$0xff] %vm604_vm5, %v4423_v34 }
 0x2dd   : > { %v4222_v17 = vpop.f32.mrf.mxu0 }
 0x2de   : > { %v4294_v10 = vadd.f32 %v4262_v27, %v4222_v17 }
 0x2df   : > { %v4360_v37 = vld [vmem:[%s5544_s15 + $0xd8] sm:$0xff] }
 0x2e0   : > { %v4392_v9 = vmul.f32 0.1, %v4360_v37  ;;  %4326 = vst.msk [vmem:[%s5544_s15 + $0xe0] sm:$0xff] %vm604_vm5, %v4294_v10 }
 0x2e2   : > { %v4424_v8 = vmax.f32 %v4360_v37, %v4392_v9 }
 0x2e4   : > { %4456 = vst.msk [vmem:[%s5544_s15 + $0xd8] sm:$0xff] %vm604_vm5, %v4424_v8 }
 0x2e5   : > { %v4225_v63 = vpop.f32.mrf.mxu0 }
 0x2e6   : > { %v4295_v61 = vadd.f32 %v4263_v13, %v4225_v63 }
 0x2e7   : > { %v4361_v59 = vld [vmem:[%s5544_s15 + $0xe0] sm:$0xff] }
 0x2e8   : > { %v4393_v38 = vmul.f32 0.1, %v4361_v59  ;;  %4327 = vst.msk [vmem:[%s5544_s15 + $0xe8] sm:$0xff] %vm604_vm5, %v4295_v61 }
 0x2ea   : > { %v4425_v50 = vmax.f32 %v4361_v59, %v4393_v38 }
 0x2ec   : > { %4457 = vst.msk [vmem:[%s5544_s15 + $0xe0] sm:$0xff] %vm604_vm5, %v4425_v50 }
 0x2ed   : > { %v4228_v35 = vpop.f32.mrf.mxu0 }
 0x2ee   : > { %v4296_v39 = vadd.f32 %v4264_v28, %v4228_v35 }
 0x2ef   : > { %v4362_v55 = vld [vmem:[%s5544_s15 + $0xe8] sm:$0xff] }
 0x2f0   : > { %v4394_v51 = vmul.f32 0.1, %v4362_v55  ;;  %4328 = vst.msk [vmem:[%s5544_s15 + $0xf0] sm:$0xff] %vm604_vm5, %v4296_v39 }
 0x2f2   : > { %v4426_v30 = vmax.f32 %v4362_v55, %v4394_v51 }
 0x2f4   : > { %4458 = vst.msk [vmem:[%s5544_s15 + $0xe8] sm:$0xff] %vm604_vm5, %v4426_v30 }
 0x2f5   : > { %v4231_v25 = vpop.f32.mrf.mxu0 }
 0x2f6   : > { %v4297_v24 = vadd.f32 %v4265_v33, %v4231_v25 }
 0x2f7   : > { %v4363_v36 = vld [vmem:[%s5544_s15 + $0xf0] sm:$0xff] }
 0x2f8   : > { %v4395_v52 = vmul.f32 0.1, %v4363_v36  ;;  %4329 = vst.msk [vmem:[%s5544_s15 + $0xf8] sm:$0xff] %vm604_vm5, %v4297_v24 }
 0x2fa   : > { %v4427_v7 = vmax.f32 %v4363_v36, %v4395_v52 }
 0x2fc   : > { %4459 = vst.msk [vmem:[%s5544_s15 + $0xf0] sm:$0xff] %vm604_vm5, %v4427_v7 }
 0x2ff   : > { %v4364_v46 = vld [vmem:[%s5544_s15 + $0xf8] sm:$0xff] }
 0x300   : > { %v4396_v23 = vmul.f32 0.1, %v4364_v46 }
 0x302   : > { %v4428_v42 = vmax.f32 %v4364_v46, %v4396_v23 }
 0x304   : > { %4460 = vst.msk [vmem:[%s5544_s15 + $0xf8] sm:$0xff] %vm604_vm5, %v4428_v42 }
 0x305 PF: > { %s15_s20 = sadd.s32 1, %s4816_s20   ;;  %s7472_s18 = smov %s4812_s19 }
 0x306   : > { %p12_p5 = scmp.ge.s32.totalorder %s15_s20, 4   ;;  %s7473_s19 = smov %s7475_s21 }
 0x308   :  { %14 = sbr.rel (!%p12_p5) target bundleno = 2 (0x2), region = 95 }

</bundles_post_ra>
